<compile_context>
chip_gen: v7x
topology: tpu7x:2x2x1
jax: 0.10.0
libtpu: 0.0.40
codegen_flags: <defaults>
</compile_context>

<pallas_src>
import jax
import jax.numpy as jnp
from jax import lax
from jax.experimental import pallas as pl
from jax.experimental.pallas import tpu as pltpu

IN_FEATURES = 128 * 318   # 40704, hard-coded in the PyTorch module


def _default_num_k_splits():
    """2-way K split only on v7x (2 TensorCores/chip); 1 on single-TC v5e/v6e."""
    try:
        kind = jax.devices()[0].device_kind.lower()
    except Exception:
        return 1
    return 2 if ("v7" in kind or "7x" in kind) else 1


def _linear_kernel(x_ref, w_ref, b_ref, o_ref, acc_ref):
    """One K step of one K-split: acc += x_tile contracted with w_tile on K."""
    c = pl.program_id(0)   # K-split index ("parallel": shards onto TCs on v7x)
    k = pl.program_id(1)   # K reduction step ("arbitrary")

    @pl.when(k == 0)
    def _():
        # Fold the bias into the accumulator of the first K-split only, so the
        # cross-split sum in the wrapper (nc > 1) stays correct.
        first = (c == 0).astype(jnp.float32)
        acc_ref[...] = first * jnp.broadcast_to(b_ref[...], acc_ref.shape)

    # x_ref: (B, tk), w_ref: (F, tk) -- both lane-dense in K.  Contract on the
    # K axis -> (B, F), accumulated in f32 on the MXU regardless of whether the
    # streamed operands are f32 or bf16.
    acc_ref[...] += lax.dot_general(
        x_ref[...], w_ref[...],
        dimension_numbers=(((1,), (1,)), ((), ())),
        preferred_element_type=jnp.float32,
    )

    @pl.when(k == pl.num_programs(1) - 1)
    def _():
        o_ref[...] = acc_ref[...].astype(o_ref.dtype)


def bottleneck_forward(x, w, b, *, tk=20352, num_k_splits=None):
    """y = x @ w.T + b  (PyTorch nn.Linear forward).

    x: (B, K) activations, w: (F, K) weight in native nn.Linear layout, b: (F,).
    Pass w in bf16 (cast once at init) for ~2x less HBM weight streaming;
    accumulation is always f32.  tk must be a multiple of 128 that divides
    K // num_k_splits.
    """
    B, K = x.shape
    F, K2 = w.shape
    assert K == K2, (K, K2)

    nc = _default_num_k_splits() if num_k_splits is None else num_k_splits
    assert tk % 128 == 0 and K % (nc * tk) == 0, (K, nc, tk)
    ksteps = K // (nc * tk)

    # Keep both streamed operands in one dtype (x is tiny; the weight is the
    # 5.2 MB / 2.6 MB stream that matters).
    if x.dtype != w.dtype:
        x = x.astype(w.dtype)
    b2 = b.reshape(1, F).astype(jnp.float32)

    if nc == 1:
        # Single-TensorCore chips (v5e/v6e): write (B, F) directly,
        # no partials array and no JAX epilogue.
        out_shape = jax.ShapeDtypeStruct((B, F), jnp.float32)
        out_spec = pl.BlockSpec((B, F), lambda c, k: (0, 0))
    else:
        # v7x: one f32 partial per K-half; the halves stream on separate TCs.
        out_shape = jax.ShapeDtypeStruct((nc, B, F), jnp.float32)
        out_spec = pl.BlockSpec((None, B, F), lambda c, k: (c, 0, 0))

    out = pl.pallas_call(
        _linear_kernel,
        out_shape=out_shape,
        grid_spec=pltpu.PrefetchScalarGridSpec(
            num_scalar_prefetch=0,
            grid=(nc, ksteps),
            in_specs=[
                # x tile along K (one pass over x in total).
                pl.BlockSpec((B, tk), lambda c, k: (0, c * ksteps + k)),
                # Weight tile along K, lane-dense (F on sublanes, K on lanes),
                # native (F, K) layout -> no transposed HBM copy of W.
                pl.BlockSpec((F, tk), lambda c, k: (0, c * ksteps + k)),
                # Bias, resident across the whole grid.
                pl.BlockSpec((1, F), lambda c, k: (0, 0)),
            ],
            out_specs=out_spec,
            scratch_shapes=[pltpu.VMEM((B, F), jnp.float32)],
        ),
        compiler_params=pltpu.CompilerParams(
            # K-split axis shards across TensorCores on v7x; k is the reduction.
            dimension_semantics=("parallel", "arbitrary"),
        ),
    )(x, w, b2)

    return out if nc == 1 else out.sum(axis=0)


if __name__ == "__main__":
    fea_num = 32   # small fea_num for the example
    batch = 2

    key = jax.random.PRNGKey(0)
    kx, kw, kb = jax.random.split(key, 3)

    # Deterministic synthetic parameters (PyTorch Linear: W (fea_num, K), b (fea_num,)).
    scale = 1.0 / (IN_FEATURES ** 0.5)
    W = jax.random.uniform(kw, (fea_num, IN_FEATURES), jnp.float32, -scale, scale)
    b = jax.random.uniform(kb, (fea_num,), jnp.float32, -scale, scale)
    x = jax.random.normal(kx, (batch, IN_FEATURES), jnp.float32)

    # Reference: plain JAX, same contraction (no transpose materialized).
    y_ref = lax.dot_general(x, W, (((1,), (1,)), ((), ()))) + b[None, :]

    # f32 path: exact nn.Linear semantics.
    y = jax.block_until_ready(bottleneck_forward(x, W, b))
    assert y.shape == (batch, fea_num)
    assert jnp.allclose(y, y_ref, atol=1e-3, rtol=1e-3), float(
        jnp.max(jnp.abs(y - y_ref)))

    # bf16 weight-streaming path (weight cast ONCE at init): halves the HBM
    # stream; accumulation stays f32, so error is ~1e-3 relative on this size.
    W_bf16 = W.astype(jnp.bfloat16)
    y_bf16 = jax.block_until_ready(bottleneck_forward(x, W_bf16, b))
    assert y_bf16.shape == (batch, fea_num)
    assert jnp.allclose(y_bf16, y_ref, atol=2e-2, rtol=2e-2), float(
        jnp.max(jnp.abs(y_bf16 - y_ref)))

    print("KERNEL_OK")
</pallas_src>

<mosaic_0001>
module attributes {stable_mosaic.version = 11 : i64} {
  func.func @_linear_kernel(%arg0: i32, %arg1: i32, %arg2: memref<2x20352xf32, #tpu.memory_space<vmem>>, %arg3: memref<32x20352xf32, #tpu.memory_space<vmem>>, %arg4: memref<1x32xf32, #tpu.memory_space<vmem>>, %arg5: memref<2x32xf32, #tpu.memory_space<vmem>>, %arg6: memref<2x32xf32, #tpu.memory_space<vmem>>) attributes {dimension_semantics = [#tpu.dimension_semantics<parallel>, #tpu.dimension_semantics<arbitrary>], iteration_bounds = array<i64: 1, 2>, scalar_prefetch = 0 : i64, scratch_operands = 1 : i64, tpu.core_type = #tpu.core_type<tc>, window_params = [{transform_indices = @transform_0, window_bounds = array<i64: 2, 20352>}, {transform_indices = @transform_1, window_bounds = array<i64: 32, 20352>}, {pipeline_mode = #tpu.pipeline_mode<synchronous>, transform_indices = @transform_2, window_bounds = array<i64: 1, 32>}, {pipeline_mode = #tpu.pipeline_mode<synchronous>, transform_indices = @transform_3, window_bounds = array<i64: 2, 32>}]} {
    %c0_i32 = arith.constant 0 : i32
    %0 = arith.cmpi eq, %arg1, %c0_i32 : i32
    %1 = arith.extui %0 : i1 to i32
    %c0_i32_0 = arith.constant 0 : i32
    %2 = arith.cmpi ne, %1, %c0_i32_0 : i32
    scf.if %2 {
      %c0_i32_9 = arith.constant 0 : i32
      %12 = arith.cmpi eq, %arg0, %c0_i32_9 : i32
      %13 = arith.extui %12 : i1 to i32
      %14 = arith.sitofp %13 : i32 to f32
      %c0_10 = arith.constant 0 : index
      %c0_11 = arith.constant 0 : index
      %15 = vector.load %arg4[%c0_10, %c0_11] : memref<1x32xf32, #tpu.memory_space<vmem>>, vector<1x32xf32>
      %16 = vector.shape_cast %15 : vector<1x32xf32> to vector<1x32xf32>
      %17 = vector.broadcast %16 : vector<1x32xf32> to vector<2x32xf32>
      %18 = vector.broadcast %14 : f32 to vector<2x32xf32>
      %19 = arith.mulf %18, %17 : vector<2x32xf32>
      %c0_12 = arith.constant 0 : index
      %c0_13 = arith.constant 0 : index
      %20 = vector.load %arg6[%c0_12, %c0_13] : memref<2x32xf32, #tpu.memory_space<vmem>>, vector<2x32xf32>
      tpu.vector_store %arg6[%c0_12, %c0_13], %19 {strides = array<i32>} : memref<2x32xf32, #tpu.memory_space<vmem>>, vector<2x32xf32>,
    } else {
    }
    %c0 = arith.constant 0 : index
    %c0_1 = arith.constant 0 : index
    %3 = vector.load %arg6[%c0, %c0_1] : memref<2x32xf32, #tpu.memory_space<vmem>>, vector<2x32xf32>
    %c0_2 = arith.constant 0 : index
    %c0_3 = arith.constant 0 : index
    %4 = vector.load %arg2[%c0_2, %c0_3] : memref<2x20352xf32, #tpu.memory_space<vmem>>, vector<2x20352xf32>
    %c0_4 = arith.constant 0 : index
    %c0_5 = arith.constant 0 : index
    %5 = vector.load %arg3[%c0_4, %c0_5] : memref<32x20352xf32, #tpu.memory_space<vmem>>, vector<32x20352xf32>
    %cst = arith.constant dense<0.000000e+00> : vector<2x32xf32>
    %6 = tpu.matmul %4, %5, %cst {dimension_numbers = #tpu.dot_dimension_numbers<[1], [1], [0], [0], [0, 0, 1, 0], [], []>} : vector<2x20352xf32>, vector<32x20352xf32>, vector<2x32xf32> -> vector<2x32xf32>
    %7 = arith.addf %3, %6 : vector<2x32xf32>
    %c0_6 = arith.constant 0 : index
    %c0_7 = arith.constant 0 : index
    %8 = vector.load %arg6[%c0_6, %c0_7] : memref<2x32xf32, #tpu.memory_space<vmem>>, vector<2x32xf32>
    tpu.vector_store %arg6[%c0_6, %c0_7], %7 {strides = array<i32>} : memref<2x32xf32, #tpu.memory_space<vmem>>, vector<2x32xf32>,
    %c1_i32 = arith.constant 1 : i32
    %9 = arith.cmpi eq, %arg1, %c1_i32 : i32
    %10 = arith.extui %9 : i1 to i32
    %c0_i32_8 = arith.constant 0 : i32
    %11 = arith.cmpi ne, %10, %c0_i32_8 : i32
    scf.if %11 {
      %c0_9 = arith.constant 0 : index
      %c0_10 = arith.constant 0 : index
      %12 = vector.load %arg6[%c0_9, %c0_10] : memref<2x32xf32, #tpu.memory_space<vmem>>, vector<2x32xf32>
      %c0_11 = arith.constant 0 : index
      %c0_12 = arith.constant 0 : index
      %13 = vector.load %arg5[%c0_11, %c0_12] : memref<2x32xf32, #tpu.memory_space<vmem>>, vector<2x32xf32>
      tpu.vector_store %arg5[%c0_11, %c0_12], %12 {strides = array<i32>} : memref<2x32xf32, #tpu.memory_space<vmem>>, vector<2x32xf32>,
    } else {
    }
    return
  }
  func.func @transform_0(%arg0: i32, %arg1: i32) -> (i32, i32) {
    %c2_i32 = arith.constant 2 : i32
    %0 = arith.muli %arg0, %c2_i32 : i32
    %1 = arith.addi %0, %arg1 : i32
    %c0_i32 = arith.constant 0 : i32
    %c0_i32_0 = arith.constant 0 : i32
    return %c0_i32, %1 : i32, i32
  }
  func.func @transform_1(%arg0: i32, %arg1: i32) -> (i32, i32) {
    %c2_i32 = arith.constant 2 : i32
    %0 = arith.muli %arg0, %c2_i32 : i32
    %1 = arith.addi %0, %arg1 : i32
    %c0_i32 = arith.constant 0 : i32
    %c0_i32_0 = arith.constant 0 : i32
    return %c0_i32, %1 : i32, i32
  }
  func.func @transform_2(%arg0: i32, %arg1: i32) -> (i32, i32) {
    %c0_i32 = arith.constant 0 : i32
    %c0_i32_0 = arith.constant 0 : i32
    %c0_i32_1 = arith.constant 0 : i32
    return %c0_i32, %c0_i32_0 : i32, i32
  }
  func.func @transform_3(%arg0: i32, %arg1: i32) -> (i32, i32) {
    %c0_i32 = arith.constant 0 : i32
    %c0_i32_0 = arith.constant 0 : i32
    %c0_i32_1 = arith.constant 0 : i32
    return %c0_i32, %c0_i32_0 : i32, i32
  }
}

</mosaic_0001>

<bundles_post_ra>
// kernel: tpu_custom_call.1
= control target key start
LH: loop header
LB: loop body
LE: loop exit
PB: predicated region body
PF: predicated region fallthrough
CT: control target
= control target key end

     0   :  { %8 = vsyncpa [#allocation4], 0  ;;  %s9554_s0 = inlined_call_operand.hbm [shape: f32[2,40704], index: 0, kind: input, shape index: {}]   ;;  %s9555_s1 = inlined_call_operand.hbm [shape: f32[32,40704], index: 1, kind: input, shape index: {}]   ;;  %s9556_s2 = inlined_call_operand.hbm [shape: f32[1,32], index: 2, kind: input, shape index: {}]   ;;  %s9557_s3 = inlined_call_operand.hbm [shape: f32[2,32], index: 3, kind: output, shape index: {}]  }
   0x1   :  { %10 = vsyncpa [#allocation4 + $0x1], 0 }
   0x2   :  { %11 = vsyncpa [#allocation7], 0 }
   0x3   :  { %13 = vsyncpa [#allocation7 + $0x1], 0 }
   0x4   :  { %14 = vsyncpa [#allocation5], 0  ;;  %s8550_s12 = smov 0   ;;  %s8552_s13 = smov 0  }
   0x5   :  { %s8554_s14 = smov 0   ;;  %s8556_s15 = smov 0  }
   0x6   :  { %s8558_s16 = smov 0   ;;  %s8560_s17 = smov 0  }
   0x7 LB: > { %s8579_s18 = sadd.s32 4294967295, %s8517_s17   ;;  %s43_s19 = sadd.s32 1, %s8505_s14  ;;  %s8517_s17 = sphi %s8560_s17, %s20_s17   ;;  %s8513_s16 = sphi %s8558_s16, %s9578_s16   ;;  %s8509_s15 = sphi %s8556_s15, %s9577_s15   ;;  %s8505_s14 = sphi %s8554_s14, %s9576_s14   ;;  %s8501_s13 = sphi %s8552_s13, %s9575_s13   ;;  %s8497_s12 = sphi %s8550_s12, %s9574_s12  }
   0x8   : > { %p50_p0 = scmp.ne.s32.totalorder %s8505_s14, %s8501_s13  ;;  %p56_p1 = scmp.ne.s32.totalorder %s8501_s13, %s8497_s12 }
   0x9   : > { %p9558_p2 = scmp.eq.s32.totalorder %s8579_s18, 0  ;;  %p7542_p3 = scmp.ge.s32.totalorder %s8517_s17, 1 }
   0xa   : > { %p139_p4 = scmp.lt.s32.totalorder %s8517_s17, 3  ;;  %s8519_s22 = smov [#allocation8]  }
   0xb   : > { %p8590_p5 = por %p9558_p2, %p56_p1  ;;  %s152_s23 = sshll.u32 %s8519_s22, 4  ;;  %s153_s23 = int_to_ptr.vmem [resolvable:$true] %s152_s23 }
   0xc   : > { %p8594_p6 = pnand %p7542_p3, %p139_p4  ;;  %p51_p8 = scmp.eq.s32.totalorder %s8517_s17, 0 }
   0xd   : > { %s9561_s20 = scalar_select %p8590_p5, 1, 0 }
   0xe   : > { %s9562_s21 = scalar_select %p8594_p6, 1, 0 }
   0xf   : > { %p8228_p7 = pneg %p8594_p6  ;;  %s29_s25 = sadd.s32 1, %s8513_s16 }
  0x10   : > { %p8608_p10 = scmp.ge.s32.totalorder %s29_s25, 2  ;;  %p8615_p11 = por %p51_p8, %p50_p0 }
  0x11   : > { %p8603_p9 = pnand %p8228_p7, %p9558_p2  ;;  %s8341_s30 = scalar_lea.hbm %s9556_s2, 16 }
  0x12   : > { %s9564_s26 = scalar_select %p8608_p10, 1, 0 }
  0x13   : > { %s9565_s27 = scalar_select %p8615_p11, 1, 0 }
  0x14   : > { %p8342_p13 = scmp.ne.s32.totalorder %s9556_s2, %s8341_s30  ;;  %p8343_p1 = pneg %p8603_p9 }
  0x15   : > { %p8348_p0 = scmp.lt.u32.totalorder %s8341_s30, %s9556_s2 }
  0x16   : > { %p8344_p3 = pnand %p8343_p1, %p8342_p13 }
  0x18   : > { %p8345_p4 = pneg %p8344_p3 }
  0x1a   : > { %p8350_p7 = pnand %p8348_p0, %p8345_p4 }
  0x1c   : > { %8353 = shalt.err (!%p8350_p7)
}
  0x1d   : > { %s8354_s8 = scalar_lea.vmem %s153_s23, 16  ;;  %s8361_s9 = scalar_lea.vmem %s153_s23, 32 }
  0x1e   : > { %p8355_p8 = scmp.ne.s32.totalorder %s153_s23, %s8354_s8  ;;  %p8362_p5 = scmp.lt.s32.totalorder %s153_s23, %s153_s23 }
  0x1f   : > { %p8363_p6 = scmp.lt.s32.totalorder %s8361_s9, %s8354_s8 }
  0x20   : > { %p8357_p2 = pnand %p8355_p8, %p8343_p1 }
  0x21   : > { %p8364_p11 = por %p8363_p6, %p8362_p5 }
  0x22   : > { %p8358_p12 = pneg %p8357_p2 }
  0x24   : > { %p8365_p10 = pnand %p8364_p11, %p8358_p12 }
  0x26   : > { %8368 = shalt.err (!%p8365_p10)
}
  0x27   : > { %8231 = dma.hbm_to_vmem [thread:$0]  (!%p8603_p9), %s9556_s2, 16, %s153_s23, [#allocation7]  }
  0x28   : > { %p9566_p2 = scmp.ne.s32.totalorder %s9564_s26, 0  ;;  %s8641_s12 = sand.u32 1, %s8505_s14  }
  0x29   : > { %s7556_s22 = smul.u32 5088, %s8513_s16  ;;  %p9567_p6 = scmp.ne.s32.totalorder %s9565_s27, 0 }
  0x2a   : > { %s9580_s25 = smov (%p9566_p2, %s29_s25), 0  ;;  %s8212_s28 = smul.u32 318, %s8641_s12 }
  0x2b   : > { %s40_s24 = ssub.s32 %s8513_s16, %s9580_s25  ;;  %s8650_s4 = scalar_lea.hbm %s9554_s0, %s7556_s22 }
  0x2c   : > { %p41_p5 = scmp.eq.s32.totalorder %s40_s24, 0  ;;  %p9568_p9 = scmp.lt.s32.totalorder %s8517_s17, 2 }
  0x2d   : > { %s167_s5 = scalar_lea.vmem [#allocation3], %s8212_s28  ;;  %s8213_s7 = smul.u32 5088, %s8641_s12 }
  0x2e   : > { %p8656_p10 = pnand %p9568_p9, %p9567_p6  ;;  %s177_s6 = sshll.u32 %s167_s5, 4  ;;  %s8666_s6 = int_to_ptr.vmem [resolvable:$true] %s177_s6 }
  0x2f   : > { %s8663_s26 = scalar_select %p41_p5, %s8505_s14, %s43_s19  }
  0x30   : > { %s7557_s27 = smul.u32 20352, %s8513_s16  ;;  %s164_s8 = scalar_lea.sflag [#allocation4], %s8641_s12 }
  0x31   : > { %s8369_s9 = scalar_lea.hbm %s8650_s4, 5088  ;;  %p8371_p12 = pneg %p8656_p10 }
  0x32   : > { %p8370_p11 = scmp.ne.s32.totalorder %s8650_s4, %s8369_s9  ;;  %s8374_s19 = scalar_lea.hbm %s9554_s0, 10176 }
  0x33   : > { %p8375_p3 = scmp.lt.u32.totalorder %s8650_s4, %s9554_s0  ;;  %p8376_p4 = scmp.lt.u32.totalorder %s8374_s19, %s8369_s9 }
  0x34   : > { %p8372_p13 = pnand %p8371_p12, %p8370_p11  ;;  %p8378_p7 = scmp.lt.u32.totalorder %s8369_s9, %s8650_s4 }
  0x35   : > { %p8377_p0 = por %p8376_p4, %p8375_p3 }
  0x36   : > { %p8373_p1 = pneg %p8372_p13 }
  0x37   : > { %p8379_p8 = por %p8378_p7, %p8377_p0 }
  0x39   : > { %p8380_p2 = pnand %p8379_p8, %p8373_p1 }
  0x3b   : > { %8383 = shalt.err (!%p8380_p2)
}
  0x3c   : > { %s8384_s28 = scalar_lea.vmem %s8666_s6, 5088  ;;  %s8520_s29 = smov [#allocation3]  }
  0x3d   : > { %p8385_p5 = scmp.ne.s32.totalorder %s8666_s6, %s8384_s28  ;;  %s8389_s30 = sshll.u32 %s8520_s29, 4  ;;  %s8390_s30 = int_to_ptr.vmem [resolvable:$false] %s8389_s30 }
  0x3e   : > { %s8391_s5 = scalar_lea.vmem %s8390_s30, 10176  ;;  %p8392_p11 = scmp.lt.s32.totalorder %s8666_s6, %s8390_s30 }
  0x3f   : > { %p8387_p6 = pnand %p8385_p5, %p8371_p12  ;;  %p8393_p13 = scmp.lt.s32.totalorder %s8391_s5, %s8384_s28 }
  0x41   : > { %p8388_p9 = pneg %p8387_p6  ;;  %p8394_p3 = por %p8393_p13, %p8392_p11 }
  0x43   : > { %p8395_p4 = pnand %p8394_p3, %p8388_p9 }
  0x45   : > { %8398 = shalt.err (!%p8395_p4)
}
  0x46   : > { %8235 = dma.hbm_to_vmem [thread:$0]  (!%p8656_p10), %s8650_s4, 5088, %s8666_s6, %s164_s8  }
  0x47   : > { %s8700_s11 = scalar_lea.hbm %s9555_s1, %s7557_s27  ;;  %s188_s19 = scalar_lea.vmem [#allocation6], %s8213_s7 }
  0x48   : > { %s197_s22 = sshll.u32 %s188_s19, 4  ;;  %s184_s24 = sand.u32 1, %s8517_s17   ;;  %s8705_s22 = int_to_ptr.vmem [resolvable:$true] %s197_s22 }
  0x49   : > { %s8707_s28 = scalar_lea.sflag [#allocation7], %s184_s24  ;;  %s8399_s29 = scalar_lea.hbm %s8700_s11, 81408 }
  0x4a   : > { %p8400_p1 = scmp.ne.s32.totalorder %s8700_s11, %s8399_s29  ;;  %s8404_s12 = scalar_lea.hbm %s9555_s1, 162816 }
  0x4b   : > { %p8405_p8 = scmp.lt.u32.totalorder %s8700_s11, %s9555_s1  ;;  %p8406_p2 = scmp.lt.u32.totalorder %s8404_s12, %s8399_s29 }
  0x4c   : > { %p8402_p0 = pnand %p8400_p1, %p8371_p12  ;;  %p8408_p6 = scmp.lt.u32.totalorder %s8399_s29, %s8700_s11 }
  0x4d   : > { %p8407_p5 = por %p8406_p2, %p8405_p8 }
  0x4e   : > { %p8403_p7 = pneg %p8402_p0 }
  0x4f   : > { %p8409_p9 = por %p8408_p6, %p8407_p5 }
  0x51   : > { %p8410_p11 = pnand %p8409_p9, %p8403_p7 }
  0x53   : > { %8413 = shalt.err (!%p8410_p11)
}
  0x54   : > { %s8414_s7 = scalar_lea.vmem %s8705_s22, 81408  ;;  %s8521_s30 = smov [#allocation6]  }
  0x55   : > { %p8415_p13 = scmp.ne.s32.totalorder %s8705_s22, %s8414_s7  ;;  %s8419_s5 = sshll.u32 %s8521_s30, 4  ;;  %s8420_s5 = int_to_ptr.vmem [resolvable:$false] %s8419_s5 }
  0x56   : > { %s8421_s9 = scalar_lea.vmem %s8420_s5, 162816  ;;  %p8422_p1 = scmp.lt.s32.totalorder %s8705_s22, %s8420_s5 }
  0x57   : > { %p8417_p3 = pnand %p8415_p13, %p8371_p12  ;;  %p8423_p0 = scmp.lt.s32.totalorder %s8421_s9, %s8414_s7 }
  0x59   : > { %p8418_p4 = pneg %p8417_p3  ;;  %p8424_p8 = por %p8423_p0, %p8422_p1 }
  0x5b   : > { %p8425_p2 = pnand %p8424_p8, %p8418_p4 }
  0x5d   : > { %8428 = shalt.err (!%p8425_p2)
}
  0x5e   : > { %s8522_s10 = smov 40704   ;;  %s8523_s19 = smov 20352  }
  0x5f   : > { %s8524_s24 = smov 1272   ;;  %p9570_p12 = scmp.ne.s32.totalorder %s9562_s21, 0 }
  0x60   : > { %8238 = dma.hbm_to_vmem [thread:$0]  (!%p8656_p10), %s8700_s11, 81408, %s8705_s22, %s8707_s28, %s8522_s10, %s8523_s19, %s8524_s24  }
  0x61   : > { %209 = sbr.rel (%p9570_p12) target bundleno = 1016 (0x3f8), region = 32  ;;  %s211_s29 = sand.u32 (!%p9570_p12), 1, %s8501_s13  }
  0x62   : > { %s8214_s4 = smul.u32 (!%p9570_p12), 318, %s211_s29  ;;  %s212_s6 = scalar_lea.sflag (!%p9570_p12), [#allocation4], %s211_s29 }
  0x63   : > { %p9571_p7 = scmp.ne.s32.totalorder (!%p9570_p12), %s9561_s20, 0 }
  0x64   : > { %s8736_s12 = scalar_lea.vmem (!%p9570_p12), [#allocation3], %s8214_s4 }
  0x68   : > { %8480 = dma.done.wait (%p9571_p7), %s212_s6, 5088  }
  0x69   : > { %8482 = vsyncadd (%p9571_p7), %s212_s6, 4294962208  ;;  %s220_s27 = sand.u32 1, %s8579_s18   ;;  %s8215_s23 = smul.u32 5088, %s211_s29 }
  0x6a   : > { %s221_s11 = scalar_lea.sflag [#allocation7], %s220_s27 }
  0x6b   : > { %s8743_s22 = scalar_lea.vmem [#allocation6], %s8215_s23 }
  0x6c   : > { %8484 = dma.done.wait (%p9571_p7), %s221_s11, 81408  }
  0x6d   : > { %8486 = vsyncadd (%p9571_p7), %s221_s11, 4294885888  ;;  %p9572_p10 = scmp.eq.s32.totalorder %s8579_s18, 0 }
  0x6f   : > { %8488 = dma.done.wait (%p9572_p10), [#allocation7], 16   ;;  %p9573_p5 = pmov %p9572_p10 }
  0x70   : > { %p7549_p6 = scmp.ne.s32.totalorder %s8509_s15, 0 }
  0x71   : > { %8490 = vsyncadd (%p9573_p5), [#allocation7], 4294967280  ;;  %v7550_v0 = vld [vmem:[#allocation8] ss:$0 sm:$0xff] (!%p7549_p6)  ;;  %vm273_vm0 = vcmask (!%p7549_p6), 254976  }
  0x72   : > { %260 = sbr.rel (%p7549_p6) target bundleno = 121 (0x79), region = 48  ;;  %274 = vst.msk [vmem:[#allocation2] sm:$0x3] (!%p7549_p6), %vm273_vm0, %v7550_v0 }
  0x79 PF: > { %v317_v1 = vld [vmem:[%s8743_s22 + $0x8] sm:$0xff]  ;;  %v476_v2 = vld [vmem:[%s8743_s22 + $0x500] sm:$0xff]  ;;  %v996_v4 = vlaneseq  ;;  %v475_v6 = vld [vmem:[%s8743_s22 + $0x4f8] sm:$0xff]  ;;  %v8525_v9 = vmov 1983009808   ;;  %vm8527_vm1 = vmmov 0  }
  0x7a   : > { %v316_v3 = vld [vmem:[%s8743_s22] sm:$0xff]  ;;  %v7574_v5 = vpack.c.bf16 %v476_v2, %v317_v1  ;;  %v319_v7 = vld [vmem:[%s8743_s22 + $0x18] sm:$0xff]  ;;  %v478_v8 = vld [vmem:[%s8743_s22 + $0x510] sm:$0xff]  ;;  %v994_v10 = vunpack.c.l.s4 %v8525_v9  ;;  %vm7431_vm2 = vcmask 254976   ;;  %p7551_p9 = scmp.ne.s32.totalorder %s8509_s15, 1 }
  0x7b   : > { %v7576_v11 = vpack.c.bf16 %v475_v6, %v316_v3  ;;  %v7582_v12 = vpack.c.bf16 %v478_v8, %v319_v7  ;;  %v318_v13 = vld [vmem:[%s8743_s22 + $0x10] sm:$0xff]  ;;  %v477_v14 = vld [vmem:[%s8743_s22 + $0x508] sm:$0xff]  ;;  %v635_v15 = vld [vmem:[%s8743_s22 + $0x9f8] sm:$0xff]  ;;  %v997_v16 = vshrl.u32 %v996_v4, 7 }
  0x7c   : > { %7575 = vmatprep.subr.bf16.mxu0 %v7574_v5  ;;  %v7584_v17 = vpack.c.bf16 %v477_v14, %v318_v13  ;;  %v794_v18 = vld [vmem:[%s8743_s22 + $0xef0] sm:$0xff]  ;;  %v995_v19 = vunpack.c.0.s8 %v994_v10  ;;  %v637_v22 = vld [vmem:[%s8743_s22 + $0xa08] sm:$0xff]  ;;  %v796_v23 = vld [vmem:[%s8743_s22 + $0xf00] sm:$0xff] }
  0x7d   : > { %7577 = vmatpush1.bf16.xpose.msra.mxu0 %v7576_v11  ;;  %7583 = vmatprep.subr.bf16.mxu1 %v7582_v12  ;;  %v7578_v20 = vpack.c.bf16 %v794_v18, %v635_v15  ;;  %v634_v21 = vld [vmem:[%s8743_s22 + $0x9f0] sm:$0xff]  ;;  %v793_v24 = vld [vmem:[%s8743_s22 + $0xee8] sm:$0xff]  ;;  %v7586_v25 = vpack.c.bf16 %v796_v23, %v637_v22  ;;  %v636_v26 = vld [vmem:[%s8743_s22 + $0xa00] sm:$0xff] }
  0x7e   : > { %7585 = vmatpush1.bf16.xpose.msra.mxu1 %v7584_v17  ;;  %v276_v27 = vld [vmem:[%s8736_s12] sm:$0xff]  ;;  %v8770_v28 = vsub.s32 %v995_v19, %v997_v16  ;;  %v795_v29 = vld [vmem:[%s8743_s22 + $0xef8] sm:$0xff]  ;;  %v482_v35 = vld [vmem:[%s8743_s22 + $0x530] sm:$0xff]  ;;  %v7580_v36 = vpack.c.bf16 %v793_v24, %v634_v21 }
  0x7f   : > { %7579 = vmatprep.subr.bf16.mxu0 %v7578_v20  ;;  %v992_v30 = vcombine.high %v276_v27, %v276_v27  ;;  %v321_v31 = vld [vmem:[%s8743_s22 + $0x28] sm:$0xff]  ;;  %v480_v32 = vld [vmem:[%s8743_s22 + $0x520] sm:$0xff]  ;;  %7587 = vmatprep.subr.bf16.mxu1 %v7586_v25  ;;  %v323_v34 = vld [vmem:[%s8743_s22 + $0x38] sm:$0xff]  ;;  %v7588_v38 = vpack.c.bf16 %v795_v29, %v636_v26 }
  0x80   : > { %v999_v33 = vrot.slane %v276_v27, %v8770_v28  ;;  %v7590_v40 = vpack.c.bf16 %v480_v32, %v321_v31  ;;  %v7598_v42 = vpack.c.bf16 %v482_v35, %v323_v34  ;;  %v277_v43 = vld [vmem:[%s8736_s12 + $0x8] sm:$0xff]  ;;  %v320_v45 = vld [vmem:[%s8743_s22 + $0x20] sm:$0xff]  ;;  %v479_v46 = vld [vmem:[%s8743_s22 + $0x518] sm:$0xff] }
  0x81   : > { %v1006_v37 = vrot.slane %v992_v30, %v8770_v28  ;;  %v1009_v44 = vcombine.high %v277_v43, %v277_v43  ;;  %v322_v47 = vld [vmem:[%s8743_s22 + $0x30] sm:$0xff]  ;;  %v481_v48 = vld [vmem:[%s8743_s22 + $0x528] sm:$0xff]  ;;  %v639_v49 = vld [vmem:[%s8743_s22 + $0xa18] sm:$0xff]  ;;  %v1016_v51 = vrot.slane %v277_v43, %v8770_v28  ;;  %v7592_v55 = vpack.c.bf16 %v479_v46, %v320_v45 }
  0x82   : > { %v1007_v39 = vcombine.high %v999_v33, %v999_v33  ;;  %v798_v50 = vld [vmem:[%s8743_s22 + $0xf10] sm:$0xff]  ;;  %v641_v52 = vld [vmem:[%s8743_s22 + $0xa28] sm:$0xff]  ;;  %v800_v53 = vld [vmem:[%s8743_s22 + $0xf20] sm:$0xff]  ;;  %v7600_v56 = vpack.c.bf16 %v481_v48, %v322_v47 }
  0x83   : > { %v1008_v41 = vcombine.high %v1006_v37, %v1006_v37  ;;  %v1023_v54 = vrot.slane %v1009_v44, %v8770_v28  ;;  %v7594_v57 = vpack.c.bf16 %v798_v50, %v639_v49  ;;  %v7602_v58 = vpack.c.bf16 %v800_v53, %v641_v52  ;;  %v638_v61 = vld [vmem:[%s8743_s22 + $0xa10] sm:$0xff]  ;;  %v797_v62 = vld [vmem:[%s8743_s22 + $0xf08] sm:$0xff]  ;;  %v640_v63 = vld [vmem:[%s8743_s22 + $0xa20] sm:$0xff] }
  0x84   : > { %1894 = vmatprep.mubr.f32.mxu0 %v1007_v39  ;;  %v1024_v59 = vcombine.high %v1016_v51, %v1016_v51  ;;  %v799_v0 = vld [vmem:[%s8743_s22 + $0xf18] sm:$0xff]  ;;  %v325_v1 = vld [vmem:[%s8743_s22 + $0x48] sm:$0xff]  ;;  %v484_v2 = vld [vmem:[%s8743_s22 + $0x540] sm:$0xff]  ;;  %v7596_v5 = vpack.c.bf16 %v797_v62, %v638_v61 }
  0x85   : > { %7581 = vmatpush1.bf16.xpose.msra.mxu0 %v7580_v36  ;;  %1964 = vmatprep.mubr.f32.mxu1 %v1008_v41  ;;  %v1025_v60 = vcombine.high %v1023_v54, %v1023_v54  ;;  %v327_v3 = vld [vmem:[%s8743_s22 + $0x58] sm:$0xff]  ;;  %v486_v4 = vld [vmem:[%s8743_s22 + $0x550] sm:$0xff]  ;;  %v7604_v7 = vpack.c.bf16 %v799_v0, %v640_v63  ;;  %v7606_v8 = vpack.c.bf16 %v484_v2, %v325_v1  ;;  %v324_v11 = vld [vmem:[%s8743_s22 + $0x40] sm:$0xff] }
  0x86   : > { %7589 = vmatpush1.bf16.xpose.msra.mxu1 %v7588_v38  ;;  %7591 = vmatprep.subr.bf16.mxu0 %v7590_v40  ;;  %v278_v6 = vld [vmem:[%s8736_s12 + $0x10] sm:$0xff]  ;;  %v7614_v9 = vpack.c.bf16 %v486_v4, %v327_v3  ;;  %v485_v14 = vld [vmem:[%s8743_s22 + $0x548] sm:$0xff]  ;;  %v804_v19 = vld [vmem:[%s8743_s22 + $0xf40] sm:$0xff] }
  0x87   : > { %7599 = vmatprep.subr.bf16.mxu1 %v7598_v42  ;;  %v1026_v10 = vcombine.high %v278_v6, %v278_v6  ;;  %v483_v12 = vld [vmem:[%s8743_s22 + $0x538] sm:$0xff]  ;;  %v326_v13 = vld [vmem:[%s8743_s22 + $0x50] sm:$0xff]  ;;  %v1033_v17 = vrot.slane %v278_v6, %v8770_v28  ;;  %v645_v18 = vld [vmem:[%s8743_s22 + $0xa48] sm:$0xff] }
  0x88   : > { %v643_v15 = vld [vmem:[%s8743_s22 + $0xa38] sm:$0xff]  ;;  %v802_v16 = vld [vmem:[%s8743_s22 + $0xf30] sm:$0xff]  ;;  %v7608_v21 = vpack.c.bf16 %v483_v12, %v324_v11  ;;  %v7616_v22 = vpack.c.bf16 %v485_v14, %v326_v13  ;;  %v7618_v24 = vpack.c.bf16 %v804_v19, %v645_v18  ;;  %v801_v29 = vld [vmem:[%s8743_s22 + $0xf28] sm:$0xff] }
  0x89   : > { %v1040_v20 = vrot.slane %v1026_v10, %v8770_v28  ;;  %v7610_v23 = vpack.c.bf16 %v802_v16, %v643_v15  ;;  %v1041_v25 = vcombine.high %v1033_v17, %v1033_v17  ;;  %v642_v27 = vld [vmem:[%s8743_s22 + $0xa30] sm:$0xff]  ;;  %v644_v30 = vld [vmem:[%s8743_s22 + $0xa40] sm:$0xff]  ;;  %v803_v31 = vld [vmem:[%s8743_s22 + $0xf38] sm:$0xff] }
  0x8a   : > { %v329_v32 = vld [vmem:[%s8743_s22 + $0x68] sm:$0xff]  ;;  %v331_v34 = vld [vmem:[%s8743_s22 + $0x78] sm:$0xff]  ;;  %v490_v35 = vld [vmem:[%s8743_s22 + $0x570] sm:$0xff]  ;;  %v7612_v36 = vpack.c.bf16 %v801_v29, %v642_v27  ;;  %v7620_v38 = vpack.c.bf16 %v803_v31, %v644_v30 }
  0x8b   : > { %v1042_v26 = vcombine.high %v1040_v20, %v1040_v20  ;;  %v7630_v40 = vpack.c.bf16 %v490_v35, %v331_v34  ;;  %v328_v42 = vld [vmem:[%s8743_s22 + $0x60] sm:$0xff]  ;;  %v487_v43 = vld [vmem:[%s8743_s22 + $0x558] sm:$0xff]  ;;  %v330_v44 = vld [vmem:[%s8743_s22 + $0x70] sm:$0xff] }
  0x8c   : > { %1895 = vmatmul.mubr.f32.vlgmr.msra.gmra.mrb[0].mxu0 %v999_v33  ;;  %v488_v33 = vld [vmem:[%s8743_s22 + $0x560] sm:$0xff]  ;;  %v489_v45 = vld [vmem:[%s8743_s22 + $0x568] sm:$0xff]  ;;  %v647_v46 = vld [vmem:[%s8743_s22 + $0xa58] sm:$0xff]  ;;  %v7624_v52 = vpack.c.bf16 %v487_v43, %v328_v42 }
  0x8d   : > { %1965 = vmatmul.mubr.f32.vlgmr.msra.gmra.mrb[0].mxu1 %v1006_v37  ;;  %7593 = vmatpush1.bf16.xpose.msra.mxu0 %v7592_v55  ;;  %v279_v37 = vld [vmem:[%s8736_s12 + $0x18] sm:$0xff]  ;;  %v7622_v39 = vpack.c.bf16 %v488_v33, %v329_v32  ;;  %v806_v47 = vld [vmem:[%s8743_s22 + $0xf50] sm:$0xff]  ;;  %v649_v49 = vld [vmem:[%s8743_s22 + $0xa68] sm:$0xff]  ;;  %v7632_v53 = vpack.c.bf16 %v489_v45, %v330_v44 }
  0x8e   : > { %7601 = vmatpush1.bf16.xpose.msra.mxu1 %v7600_v56  ;;  %7595 = vmatprep.subr.bf16.mxu0 %v7594_v57  ;;  %v1043_v41 = vcombine.high %v279_v37, %v279_v37  ;;  %v1050_v48 = vrot.slane %v279_v37, %v8770_v28  ;;  %v808_v50 = vld [vmem:[%s8743_s22 + $0xf60] sm:$0xff]  ;;  %v807_v61 = vld [vmem:[%s8743_s22 + $0xf58] sm:$0xff]  ;;  %v333_v62 = vld [vmem:[%s8743_s22 + $0x88] sm:$0xff] }
  0x8f   : > { %7603 = vmatprep.subr.bf16.mxu1 %v7602_v58  ;;  %2034 = vmatprep.mubr.f32.mxu0 %v1024_v59  ;;  %v7634_v55 = vpack.c.bf16 %v808_v50, %v649_v49  ;;  %v646_v58 = vld [vmem:[%s8743_s22 + $0xa50] sm:$0xff]  ;;  %v805_v59 = vld [vmem:[%s8743_s22 + $0xf48] sm:$0xff]  ;;  %v492_v63 = vld [vmem:[%s8743_s22 + $0x580] sm:$0xff] }
  0x90   : > { %2104 = vmatprep.mubr.f32.mxu1 %v1025_v60  ;;  %v1058_v56 = vcombine.high %v1050_v48, %v1050_v48  ;;  %v648_v60 = vld [vmem:[%s8743_s22 + $0xa60] sm:$0xff]  ;;  %v335_v0 = vld [vmem:[%s8743_s22 + $0x98] sm:$0xff]  ;;  %v494_v1 = vld [vmem:[%s8743_s22 + $0x590] sm:$0xff]  ;;  %v7628_v2 = vpack.c.bf16 %v805_v59, %v646_v58 }
  0x91   : > { %v280_v3 = vld [vmem:[%s8736_s12 + $0x20] sm:$0xff]  ;;  %v7636_v4 = vpack.c.bf16 %v807_v61, %v648_v60  ;;  %v7646_v6 = vpack.c.bf16 %v494_v1, %v335_v0  ;;  %v334_v10 = vld [vmem:[%s8743_s22 + $0x90] sm:$0xff]  ;;  %v651_v12 = vld [vmem:[%s8743_s22 + $0xa78] sm:$0xff] }
  0x92   : > { %v493_v11 = vld [vmem:[%s8743_s22 + $0x588] sm:$0xff]  ;;  %v810_v13 = vld [vmem:[%s8743_s22 + $0xf70] sm:$0xff]  ;;  %v1067_v14 = vrot.slane %v280_v3, %v8770_v28  ;;  %v812_v16 = vld [vmem:[%s8743_s22 + $0xf80] sm:$0xff] }
  0x93   : > { %v653_v15 = vld [vmem:[%s8743_s22 + $0xa88] sm:$0xff]  ;;  %v7648_v19 = vpack.c.bf16 %v493_v11, %v334_v10  ;;  %v811_v27 = vld [vmem:[%s8743_s22 + $0xf78] sm:$0xff]  ;;  %v496_v30 = vld [vmem:[%s8743_s22 + $0x5a0] sm:$0xff] }
  0x94   : > { %v337_v29 = vld [vmem:[%s8743_s22 + $0xa8] sm:$0xff]  ;;  %v339_v31 = vld [vmem:[%s8743_s22 + $0xb8] sm:$0xff]  ;;  %v498_v32 = vld [vmem:[%s8743_s22 + $0x5b0] sm:$0xff] }
  0x95   : > { %7597 = vmatpush1.bf16.xpose.msra.mxu0 %v7596_v5  ;;  %v7638_v5 = vpack.c.bf16 %v492_v63, %v333_v62  ;;  %v281_v34 = vld [vmem:[%s8736_s12 + $0x28] sm:$0xff]  ;;  %v7662_v37 = vpack.c.bf16 %v498_v32, %v339_v31  ;;  %v655_v43 = vld [vmem:[%s8743_s22 + $0xa98] sm:$0xff]  ;;  %v500_v60 = vld [vmem:[%s8743_s22 + $0x5c0] sm:$0xff] }
  0x96   : > { %7605 = vmatpush1.bf16.xpose.msra.mxu1 %v7604_v7  ;;  %7607 = vmatprep.subr.bf16.mxu0 %v7606_v8  ;;  %v1060_v7 = vcombine.high %v280_v3, %v280_v3  ;;  %v332_v8 = vld [vmem:[%s8743_s22 + $0x80] sm:$0xff]  ;;  %v497_v42 = vld [vmem:[%s8743_s22 + $0x5a8] sm:$0xff]  ;;  %v814_v44 = vld [vmem:[%s8743_s22 + $0xf90] sm:$0xff]  ;;  %v1084_v45 = vrot.slane %v281_v34, %v8770_v28 }
  0x97   : > { %7615 = vmatprep.subr.bf16.mxu1 %v7614_v9  ;;  %v491_v9 = vld [vmem:[%s8743_s22 + $0x578] sm:$0xff]  ;;  %v341_v59 = vld [vmem:[%s8743_s22 + $0xc8] sm:$0xff]  ;;  %v502_v62 = vld [vmem:[%s8743_s22 + $0x5d0] sm:$0xff] }
  0x98   : > { %v7640_v18 = vpack.c.bf16 %v491_v9, %v332_v8  ;;  %v815_v58 = vld [vmem:[%s8743_s22 + $0xf98] sm:$0xff]  ;;  %v501_v8 = vld [vmem:[%s8743_s22 + $0x5c8] sm:$0xff]  ;;  %v818_v10 = vld [vmem:[%s8743_s22 + $0xfb0] sm:$0xff] }
  0x99   : > { %v343_v61 = vld [vmem:[%s8743_s22 + $0xd8] sm:$0xff] }
  0x9a   : > { %v282_v0 = vld [vmem:[%s8736_s12 + $0x30] sm:$0xff]  ;;  %v7678_v3 = vpack.c.bf16 %v502_v62, %v343_v61  ;;  %v283_v31 = vld [vmem:[%s8736_s12 + $0x38] sm:$0xff]  ;;  %v284_v61 = vld [vmem:[%s8736_s12 + $0x40] sm:$0xff] }
  0x9b   : > { %v659_v9 = vld [vmem:[%s8743_s22 + $0xab8] sm:$0xff]  ;;  %v1101_v11 = vrot.slane %v282_v0, %v8770_v28 }
  0x9c   : > { %2035 = vmatmul.mubr.f32.vlgmr.msra.gmra.mrb[2].mxu0 %v1016_v51  ;;  %v1057_v51 = vrot.slane %v1043_v41, %v8770_v28  ;;  %v338_v41 = vld [vmem:[%s8743_s22 + $0xb0] sm:$0xff] }
  0x9d   : > { %7609 = vmatpush1.bf16.xpose.msra.mxu0 %v7608_v21  ;;  %2105 = vmatmul.mubr.f32.vlgmr.msra.gmra.mrb[2].mxu1 %v1023_v54  ;;  %v7626_v54 = vpack.c.bf16 %v806_v47, %v647_v46  ;;  %v7650_v21 = vpack.c.bf16 %v812_v16, %v653_v15  ;;  %v657_v46 = vld [vmem:[%s8743_s22 + $0xaa8] sm:$0xff]  ;;  %v816_v47 = vld [vmem:[%s8743_s22 + $0xfa0] sm:$0xff]  ;;  %v7664_v50 = vpack.c.bf16 %v497_v42, %v338_v41  ;;  %v822_v41 = vld [vmem:[%s8743_s22 + $0xfd0] sm:$0xff] }
  0x9e   : > { %7617 = vmatpush1.bf16.xpose.msra.mxu1 %v7616_v22  ;;  %7611 = vmatprep.subr.bf16.mxu0 %v7610_v23  ;;  %v1059_v57 = vcombine.high %v1057_v51, %v1057_v51  ;;  %v1075_v22 = vcombine.high %v1067_v14, %v1067_v14  ;;  %v1118_v42 = vrot.slane %v283_v31, %v8770_v28 }
  0x9f   : > { %7619 = vmatprep.subr.bf16.mxu1 %v7618_v24  ;;  %2174 = vmatprep.mubr.f32.mxu0 %v1041_v25  ;;  %v650_v24 = vld [vmem:[%s8743_s22 + $0xa70] sm:$0xff]  ;;  %v809_v25 = vld [vmem:[%s8743_s22 + $0xf68] sm:$0xff] }
  0xa0   : > { %2244 = vmatprep.mubr.f32.mxu1 %v1042_v26  ;;  %v652_v26 = vld [vmem:[%s8743_s22 + $0xa80] sm:$0xff]  ;;  %v7644_v33 = vpack.c.bf16 %v809_v25, %v650_v24  ;;  %v819_v24 = vld [vmem:[%s8743_s22 + $0xfb8] sm:$0xff]  ;;  %v345_v25 = vld [vmem:[%s8743_s22 + $0xe8] sm:$0xff] }
  0xa1   : > { %v7652_v35 = vpack.c.bf16 %v811_v27, %v652_v26  ;;  %v504_v26 = vld [vmem:[%s8743_s22 + $0x5e0] sm:$0xff]  ;;  %v347_v27 = vld [vmem:[%s8743_s22 + $0xf8] sm:$0xff] }
  0xa5   : > { %7613 = vmatpush1.bf16.xpose.msra.mxu0 %v7612_v36  ;;  %v7654_v36 = vpack.c.bf16 %v496_v30, %v337_v29  ;;  %v506_v29 = vld [vmem:[%s8743_s22 + $0x5f0] sm:$0xff] }
  0xa6   : > { %7621 = vmatpush1.bf16.xpose.msra.mxu1 %v7620_v38  ;;  %7623 = vmatprep.subr.bf16.mxu0 %v7622_v39  ;;  %v1077_v38 = vcombine.high %v281_v34, %v281_v34  ;;  %v336_v39 = vld [vmem:[%s8743_s22 + $0xa0] sm:$0xff]  ;;  %v7694_v34 = vpack.c.bf16 %v506_v29, %v347_v27  ;;  %v285_v27 = vld [vmem:[%s8736_s12 + $0x48] sm:$0xff] }
  0xa7   : > { %7631 = vmatprep.subr.bf16.mxu1 %v7630_v40  ;;  %v495_v40 = vld [vmem:[%s8743_s22 + $0x598] sm:$0xff] }
  0xa8   : > { %v7656_v49 = vpack.c.bf16 %v495_v40, %v336_v39  ;;  %v505_v39 = vld [vmem:[%s8743_s22 + $0x5e8] sm:$0xff]  ;;  %v663_v40 = vld [vmem:[%s8743_s22 + $0xad8] sm:$0xff] }
  0xac   : > { %2175 = vmatmul.mubr.f32.vlgmr.msra.gmra.mrb[4].mxu0 %v1033_v17  ;;  %v1074_v17 = vrot.slane %v1060_v7, %v8770_v28  ;;  %v342_v7 = vld [vmem:[%s8743_s22 + $0xd0] sm:$0xff] }
  0xad   : > { %7625 = vmatpush1.bf16.xpose.msra.mxu0 %v7624_v52  ;;  %2245 = vmatmul.mubr.f32.vlgmr.msra.gmra.mrb[4].mxu1 %v1040_v20  ;;  %v7642_v20 = vpack.c.bf16 %v810_v13, %v651_v12  ;;  %v7666_v52 = vpack.c.bf16 %v816_v47, %v657_v46  ;;  %v661_v12 = vld [vmem:[%s8743_s22 + $0xac8] sm:$0xff]  ;;  %v820_v13 = vld [vmem:[%s8743_s22 + $0xfc0] sm:$0xff]  ;;  %v7680_v16 = vpack.c.bf16 %v501_v8, %v342_v7  ;;  %v826_v7 = vld [vmem:[%s8743_s22 + $0xff0] sm:$0xff] }
  0xae   : > { %7633 = vmatpush1.bf16.xpose.msra.mxu1 %v7632_v53  ;;  %7627 = vmatprep.subr.bf16.mxu0 %v7626_v54  ;;  %v1076_v23 = vcombine.high %v1074_v17, %v1074_v17  ;;  %v1092_v53 = vcombine.high %v1084_v45, %v1084_v45  ;;  %v1135_v8 = vrot.slane %v284_v61, %v8770_v28 }
  0xaf   : > { %7635 = vmatprep.subr.bf16.mxu1 %v7634_v55  ;;  %2314 = vmatprep.mubr.f32.mxu0 %v1058_v56  ;;  %v654_v55 = vld [vmem:[%s8743_s22 + $0xa90] sm:$0xff]  ;;  %v813_v56 = vld [vmem:[%s8743_s22 + $0xf88] sm:$0xff] }
  0xb0   : > { %2384 = vmatprep.mubr.f32.mxu1 %v1059_v57  ;;  %v656_v57 = vld [vmem:[%s8743_s22 + $0xaa0] sm:$0xff]  ;;  %v7660_v63 = vpack.c.bf16 %v813_v56, %v654_v55  ;;  %v823_v55 = vld [vmem:[%s8743_s22 + $0xfd8] sm:$0xff]  ;;  %v349_v56 = vld [vmem:[%s8743_s22 + $0x108] sm:$0xff] }
  0xb1   : > { %v7668_v1 = vpack.c.bf16 %v815_v58, %v656_v57  ;;  %v508_v57 = vld [vmem:[%s8743_s22 + $0x600] sm:$0xff]  ;;  %v351_v58 = vld [vmem:[%s8743_s22 + $0x118] sm:$0xff] }
  0xb5   : > { %7629 = vmatpush1.bf16.xpose.msra.mxu0 %v7628_v2  ;;  %v7670_v2 = vpack.c.bf16 %v500_v60, %v341_v59  ;;  %v510_v59 = vld [vmem:[%s8743_s22 + $0x610] sm:$0xff] }
  0xb6   : > { %7637 = vmatpush1.bf16.xpose.msra.mxu1 %v7636_v4  ;;  %7639 = vmatprep.subr.bf16.mxu0 %v7638_v5  ;;  %v1094_v4 = vcombine.high %v282_v0, %v282_v0  ;;  %v340_v5 = vld [vmem:[%s8743_s22 + $0xc0] sm:$0xff]  ;;  %v7710_v0 = vpack.c.bf16 %v510_v59, %v351_v58  ;;  %v286_v58 = vld [vmem:[%s8736_s12 + $0x50] sm:$0xff] }
  0xb7   : > { %7647 = vmatprep.subr.bf16.mxu1 %v7646_v6  ;;  %v499_v6 = vld [vmem:[%s8743_s22 + $0x5b8] sm:$0xff] }
  0xb8   : > { %v7672_v15 = vpack.c.bf16 %v499_v6, %v340_v5  ;;  %v509_v5 = vld [vmem:[%s8743_s22 + $0x608] sm:$0xff]  ;;  %v667_v6 = vld [vmem:[%s8743_s22 + $0xaf8] sm:$0xff] }
  0xbc   : > { %2315 = vmatmul.mubr.f32.vlgmr.msra.gmra.mrb[6].mxu0 %v1050_v48  ;;  %v1091_v48 = vrot.slane %v1077_v38, %v8770_v28  ;;  %v346_v38 = vld [vmem:[%s8743_s22 + $0xf0] sm:$0xff] }
  0xbd   : > { %7641 = vmatpush1.bf16.xpose.msra.mxu0 %v7640_v18  ;;  %2385 = vmatmul.mubr.f32.vlgmr.msra.gmra.mrb[6].mxu1 %v1057_v51  ;;  %v7658_v51 = vpack.c.bf16 %v814_v44, %v655_v43  ;;  %v7682_v18 = vpack.c.bf16 %v820_v13, %v661_v12  ;;  %v665_v43 = vld [vmem:[%s8743_s22 + $0xae8] sm:$0xff]  ;;  %v824_v44 = vld [vmem:[%s8743_s22 + $0xfe0] sm:$0xff]  ;;  %v7696_v47 = vpack.c.bf16 %v505_v39, %v346_v38  ;;  %v830_v38 = vld [vmem:[%s8743_s22 + $0x1010] sm:$0xff] }
  0xbe   : > { %7649 = vmatpush1.bf16.xpose.msra.mxu1 %v7648_v19  ;;  %7643 = vmatprep.subr.bf16.mxu0 %v7642_v20  ;;  %v1093_v54 = vcombine.high %v1091_v48, %v1091_v48  ;;  %v1109_v19 = vcombine.high %v1101_v11, %v1101_v11  ;;  %v1152_v39 = vrot.slane %v285_v27, %v8770_v28 }
  0xbf   : > { %7651 = vmatprep.subr.bf16.mxu1 %v7650_v21  ;;  %2454 = vmatprep.mubr.f32.mxu0 %v1075_v22  ;;  %v658_v21 = vld [vmem:[%s8743_s22 + $0xab0] sm:$0xff]  ;;  %v817_v22 = vld [vmem:[%s8743_s22 + $0xfa8] sm:$0xff] }
  0xc0   : > { %2524 = vmatprep.mubr.f32.mxu1 %v1076_v23  ;;  %v660_v23 = vld [vmem:[%s8743_s22 + $0xac0] sm:$0xff]  ;;  %v7676_v30 = vpack.c.bf16 %v817_v22, %v658_v21  ;;  %v827_v21 = vld [vmem:[%s8743_s22 + $0xff8] sm:$0xff]  ;;  %v353_v22 = vld [vmem:[%s8743_s22 + $0x128] sm:$0xff] }
  0xc1   : > { %v7684_v32 = vpack.c.bf16 %v819_v24, %v660_v23  ;;  %v512_v23 = vld [vmem:[%s8743_s22 + $0x620] sm:$0xff]  ;;  %v355_v24 = vld [vmem:[%s8743_s22 + $0x138] sm:$0xff] }
  0xc5   : > { %7645 = vmatpush1.bf16.xpose.msra.mxu0 %v7644_v33  ;;  %v7686_v33 = vpack.c.bf16 %v504_v26, %v345_v25  ;;  %v514_v25 = vld [vmem:[%s8743_s22 + $0x630] sm:$0xff] }
  0xc6   : > { %7653 = vmatpush1.bf16.xpose.msra.mxu1 %v7652_v35  ;;  %7655 = vmatprep.subr.bf16.mxu0 %v7654_v36  ;;  %v1111_v35 = vcombine.high %v283_v31, %v283_v31  ;;  %v344_v36 = vld [vmem:[%s8743_s22 + $0xe0] sm:$0xff]  ;;  %v7726_v31 = vpack.c.bf16 %v514_v25, %v355_v24 }
  0xc7   : > { %7663 = vmatprep.subr.bf16.mxu1 %v7662_v37  ;;  %v503_v37 = vld [vmem:[%s8743_s22 + $0x5d8] sm:$0xff] }
  0xc8   : > { %v7688_v46 = vpack.c.bf16 %v503_v37, %v344_v36  ;;  %v513_v36 = vld [vmem:[%s8743_s22 + $0x628] sm:$0xff]  ;;  %v671_v37 = vld [vmem:[%s8743_s22 + $0xb18] sm:$0xff] }
  0xc9   : > { %v287_v24 = vld [vmem:[%s8736_s12 + $0x58] sm:$0xff] }
  0xcc   : > { %2455 = vmatmul.mubr.f32.vlgmr.msra.gmra.mrb[8].mxu0 %v1067_v14  ;;  %v1108_v14 = vrot.slane %v1094_v4, %v8770_v28  ;;  %v350_v4 = vld [vmem:[%s8743_s22 + $0x110] sm:$0xff] }
  0xcd   : > { %7657 = vmatpush1.bf16.xpose.msra.mxu0 %v7656_v49  ;;  %2525 = vmatmul.mubr.f32.vlgmr.msra.gmra.mrb[8].mxu1 %v1074_v17  ;;  %v7674_v17 = vpack.c.bf16 %v818_v10, %v659_v9  ;;  %v7698_v49 = vpack.c.bf16 %v824_v44, %v665_v43  ;;  %v669_v9 = vld [vmem:[%s8743_s22 + $0xb08] sm:$0xff]  ;;  %v828_v10 = vld [vmem:[%s8743_s22 + $0x1000] sm:$0xff]  ;;  %v7712_v13 = vpack.c.bf16 %v509_v5, %v350_v4  ;;  %v834_v4 = vld [vmem:[%s8743_s22 + $0x1030] sm:$0xff] }
  0xce   : > { %7665 = vmatpush1.bf16.xpose.msra.mxu1 %v7664_v50  ;;  %7659 = vmatprep.subr.bf16.mxu0 %v7658_v51  ;;  %v1110_v20 = vcombine.high %v1108_v14, %v1108_v14  ;;  %v1126_v50 = vcombine.high %v1118_v42, %v1118_v42  ;;  %v1169_v5 = vrot.slane %v286_v58, %v8770_v28 }
  0xcf   : > { %7667 = vmatprep.subr.bf16.mxu1 %v7666_v52  ;;  %2594 = vmatprep.mubr.f32.mxu0 %v1092_v53  ;;  %v662_v52 = vld [vmem:[%s8743_s22 + $0xad0] sm:$0xff]  ;;  %v821_v53 = vld [vmem:[%s8743_s22 + $0xfc8] sm:$0xff] }
  0xd0   : > { %2664 = vmatprep.mubr.f32.mxu1 %v1093_v54  ;;  %v664_v54 = vld [vmem:[%s8743_s22 + $0xae0] sm:$0xff]  ;;  %v7692_v60 = vpack.c.bf16 %v821_v53, %v662_v52  ;;  %v831_v52 = vld [vmem:[%s8743_s22 + $0x1018] sm:$0xff]  ;;  %v357_v53 = vld [vmem:[%s8743_s22 + $0x148] sm:$0xff] }
  0xd1   : > { %v7700_v62 = vpack.c.bf16 %v823_v55, %v664_v54  ;;  %v516_v54 = vld [vmem:[%s8743_s22 + $0x640] sm:$0xff]  ;;  %v359_v55 = vld [vmem:[%s8743_s22 + $0x158] sm:$0xff] }
  0xd5   : > { %7661 = vmatpush1.bf16.xpose.msra.mxu0 %v7660_v63  ;;  %v7702_v63 = vpack.c.bf16 %v508_v57, %v349_v56  ;;  %v518_v56 = vld [vmem:[%s8743_s22 + $0x650] sm:$0xff] }
  0xd6   : > { %7669 = vmatpush1.bf16.xpose.msra.mxu1 %v7668_v1  ;;  %7671 = vmatprep.subr.bf16.mxu0 %v7670_v2  ;;  %v1128_v1 = vcombine.high %v284_v61, %v284_v61  ;;  %v348_v2 = vld [vmem:[%s8743_s22 + $0x100] sm:$0xff]  ;;  %v7742_v61 = vpack.c.bf16 %v518_v56, %v359_v55 }
  0xd7   : > { %7679 = vmatprep.subr.bf16.mxu1 %v7678_v3  ;;  %v507_v3 = vld [vmem:[%s8743_s22 + $0x5f8] sm:$0xff]  ;;  %v288_v55 = vld [vmem:[%s8736_s12 + $0x60] sm:$0xff] }
  0xd8   : > { %v7704_v12 = vpack.c.bf16 %v507_v3, %v348_v2  ;;  %v517_v2 = vld [vmem:[%s8743_s22 + $0x648] sm:$0xff]  ;;  %v675_v3 = vld [vmem:[%s8743_s22 + $0xb38] sm:$0xff] }
  0xdc   : > { %2595 = vmatmul.mubr.f32.vlgmr.msra.gmra.mrb[10].mxu0 %v1084_v45  ;;  %v1125_v45 = vrot.slane %v1111_v35, %v8770_v28  ;;  %v354_v35 = vld [vmem:[%s8743_s22 + $0x130] sm:$0xff] }
  0xdd   : > { %7673 = vmatpush1.bf16.xpose.msra.mxu0 %v7672_v15  ;;  %2665 = vmatmul.mubr.f32.vlgmr.msra.gmra.mrb[10].mxu1 %v1091_v48  ;;  %v7690_v48 = vpack.c.bf16 %v822_v41, %v663_v40  ;;  %v7714_v15 = vpack.c.bf16 %v828_v10, %v669_v9  ;;  %v673_v40 = vld [vmem:[%s8743_s22 + $0xb28] sm:$0xff]  ;;  %v832_v41 = vld [vmem:[%s8743_s22 + $0x1020] sm:$0xff]  ;;  %v7728_v44 = vpack.c.bf16 %v513_v36, %v354_v35  ;;  %v838_v35 = vld [vmem:[%s8743_s22 + $0x1050] sm:$0xff] }
  0xde   : > { %7681 = vmatpush1.bf16.xpose.msra.mxu1 %v7680_v16  ;;  %7675 = vmatprep.subr.bf16.mxu0 %v7674_v17  ;;  %v1127_v51 = vcombine.high %v1125_v45, %v1125_v45  ;;  %v1143_v16 = vcombine.high %v1135_v8, %v1135_v8  ;;  %v1186_v36 = vrot.slane %v287_v24, %v8770_v28 }
  0xdf   : > { %7683 = vmatprep.subr.bf16.mxu1 %v7682_v18  ;;  %2734 = vmatprep.mubr.f32.mxu0 %v1109_v19  ;;  %v666_v18 = vld [vmem:[%s8743_s22 + $0xaf0] sm:$0xff]  ;;  %v825_v19 = vld [vmem:[%s8743_s22 + $0xfe8] sm:$0xff] }
  0xe0   : > { %2804 = vmatprep.mubr.f32.mxu1 %v1110_v20  ;;  %v668_v20 = vld [vmem:[%s8743_s22 + $0xb00] sm:$0xff]  ;;  %v7708_v26 = vpack.c.bf16 %v825_v19, %v666_v18  ;;  %v835_v18 = vld [vmem:[%s8743_s22 + $0x1038] sm:$0xff]  ;;  %v361_v19 = vld [vmem:[%s8743_s22 + $0x168] sm:$0xff] }
  0xe1   : > { %v7716_v29 = vpack.c.bf16 %v827_v21, %v668_v20  ;;  %v520_v20 = vld [vmem:[%s8743_s22 + $0x660] sm:$0xff]  ;;  %v363_v21 = vld [vmem:[%s8743_s22 + $0x178] sm:$0xff] }
  0xe5   : > { %7677 = vmatpush1.bf16.xpose.msra.mxu0 %v7676_v30  ;;  %v7718_v30 = vpack.c.bf16 %v512_v23, %v353_v22  ;;  %v522_v22 = vld [vmem:[%s8743_s22 + $0x670] sm:$0xff] }
  0xe6   : > { %7685 = vmatpush1.bf16.xpose.msra.mxu1 %v7684_v32  ;;  %7687 = vmatprep.subr.bf16.mxu0 %v7686_v33  ;;  %v1145_v32 = vcombine.high %v285_v27, %v285_v27  ;;  %v352_v33 = vld [vmem:[%s8743_s22 + $0x120] sm:$0xff]  ;;  %v7758_v27 = vpack.c.bf16 %v522_v22, %v363_v21  ;;  %v289_v21 = vld [vmem:[%s8736_s12 + $0x68] sm:$0xff] }
  0xe7   : > { %7695 = vmatprep.subr.bf16.mxu1 %v7694_v34  ;;  %v511_v34 = vld [vmem:[%s8743_s22 + $0x618] sm:$0xff] }
  0xe8   : > { %v7720_v43 = vpack.c.bf16 %v511_v34, %v352_v33  ;;  %v521_v33 = vld [vmem:[%s8743_s22 + $0x668] sm:$0xff]  ;;  %v679_v34 = vld [vmem:[%s8743_s22 + $0xb58] sm:$0xff] }
  0xec   : > { %2735 = vmatmul.mubr.f32.vlgmr.msra.gmra.mrb[12].mxu0 %v1101_v11  ;;  %v1142_v11 = vrot.slane %v1128_v1, %v8770_v28  ;;  %v358_v1 = vld [vmem:[%s8743_s22 + $0x150] sm:$0xff] }
  0xed   : > { %7689 = vmatpush1.bf16.xpose.msra.mxu0 %v7688_v46  ;;  %2805 = vmatmul.mubr.f32.vlgmr.msra.gmra.mrb[12].mxu1 %v1108_v14  ;;  %v7706_v14 = vpack.c.bf16 %v826_v7, %v667_v6  ;;  %v7730_v46 = vpack.c.bf16 %v832_v41, %v673_v40  ;;  %v677_v6 = vld [vmem:[%s8743_s22 + $0xb48] sm:$0xff]  ;;  %v836_v7 = vld [vmem:[%s8743_s22 + $0x1040] sm:$0xff]  ;;  %v7744_v10 = vpack.c.bf16 %v517_v2, %v358_v1  ;;  %v842_v1 = vld [vmem:[%s8743_s22 + $0x1070] sm:$0xff] }
  0xee   : > { %7697 = vmatpush1.bf16.xpose.msra.mxu1 %v7696_v47  ;;  %7691 = vmatprep.subr.bf16.mxu0 %v7690_v48  ;;  %v1144_v17 = vcombine.high %v1142_v11, %v1142_v11  ;;  %v1160_v47 = vcombine.high %v1152_v39, %v1152_v39  ;;  %v1203_v2 = vrot.slane %v288_v55, %v8770_v28 }
  0xef   : > { %7699 = vmatprep.subr.bf16.mxu1 %v7698_v49  ;;  %2874 = vmatprep.mubr.f32.mxu0 %v1126_v50  ;;  %v670_v49 = vld [vmem:[%s8743_s22 + $0xb10] sm:$0xff]  ;;  %v829_v50 = vld [vmem:[%s8743_s22 + $0x1008] sm:$0xff] }
  0xf0   : > { %2944 = vmatprep.mubr.f32.mxu1 %v1127_v51  ;;  %v672_v51 = vld [vmem:[%s8743_s22 + $0xb20] sm:$0xff]  ;;  %v7724_v57 = vpack.c.bf16 %v829_v50, %v670_v49  ;;  %v839_v49 = vld [vmem:[%s8743_s22 + $0x1058] sm:$0xff]  ;;  %v365_v50 = vld [vmem:[%s8743_s22 + $0x188] sm:$0xff] }
  0xf1   : > { %v7732_v59 = vpack.c.bf16 %v831_v52, %v672_v51  ;;  %v524_v51 = vld [vmem:[%s8743_s22 + $0x680] sm:$0xff]  ;;  %v367_v52 = vld [vmem:[%s8743_s22 + $0x198] sm:$0xff] }
  0xf5   : > { %7693 = vmatpush1.bf16.xpose.msra.mxu0 %v7692_v60  ;;  %v7734_v60 = vpack.c.bf16 %v516_v54, %v357_v53  ;;  %v526_v53 = vld [vmem:[%s8743_s22 + $0x690] sm:$0xff] }
  0xf6   : > { %7701 = vmatpush1.bf16.xpose.msra.mxu1 %v7700_v62  ;;  %7703 = vmatprep.subr.bf16.mxu0 %v7702_v63  ;;  %v1162_v62 = vcombine.high %v286_v58, %v286_v58  ;;  %v356_v63 = vld [vmem:[%s8743_s22 + $0x140] sm:$0xff]  ;;  %v7774_v58 = vpack.c.bf16 %v526_v53, %v367_v52  ;;  %v290_v52 = vld [vmem:[%s8736_s12 + $0x70] sm:$0xff] }
  0xf7   : > { %7711 = vmatprep.subr.bf16.mxu1 %v7710_v0  ;;  %v515_v0 = vld [vmem:[%s8743_s22 + $0x638] sm:$0xff] }
  0xf8   : > { %v7736_v9 = vpack.c.bf16 %v515_v0, %v356_v63  ;;  %v525_v63 = vld [vmem:[%s8743_s22 + $0x688] sm:$0xff]  ;;  %v683_v0 = vld [vmem:[%s8743_s22 + $0xb78] sm:$0xff] }
  0xfc   : > { %2875 = vmatmul.mubr.f32.vlgmr.msra.gmra.mrb[14].mxu0 %v1118_v42  ;;  %v1159_v42 = vrot.slane %v1145_v32, %v8770_v28  ;;  %v362_v32 = vld [vmem:[%s8743_s22 + $0x170] sm:$0xff] }
  0xfd   : > { %7705 = vmatpush1.bf16.xpose.msra.mxu0 %v7704_v12  ;;  %2945 = vmatmul.mubr.f32.vlgmr.msra.gmra.mrb[14].mxu1 %v1125_v45  ;;  %v7722_v45 = vpack.c.bf16 %v830_v38, %v671_v37  ;;  %v7746_v12 = vpack.c.bf16 %v836_v7, %v677_v6  ;;  %v681_v37 = vld [vmem:[%s8743_s22 + $0xb68] sm:$0xff]  ;;  %v840_v38 = vld [vmem:[%s8743_s22 + $0x1060] sm:$0xff]  ;;  %v7760_v41 = vpack.c.bf16 %v521_v33, %v362_v32  ;;  %v846_v32 = vld [vmem:[%s8743_s22 + $0x1090] sm:$0xff] }
  0xfe   : > { %7713 = vmatpush1.bf16.xpose.msra.mxu1 %v7712_v13  ;;  %7707 = vmatprep.subr.bf16.mxu0 %v7706_v14  ;;  %v1161_v48 = vcombine.high %v1159_v42, %v1159_v42  ;;  %v1177_v13 = vcombine.high %v1169_v5, %v1169_v5  ;;  %v1220_v33 = vrot.slane %v289_v21, %v8770_v28 }
  0xff   : > { %7715 = vmatprep.subr.bf16.mxu1 %v7714_v15  ;;  %3014 = vmatprep.mubr.f32.mxu0 %v1143_v16  ;;  %v674_v15 = vld [vmem:[%s8743_s22 + $0xb30] sm:$0xff]  ;;  %v833_v16 = vld [vmem:[%s8743_s22 + $0x1028] sm:$0xff] }
 0x100   : > { %3084 = vmatprep.mubr.f32.mxu1 %v1144_v17  ;;  %v676_v17 = vld [vmem:[%s8743_s22 + $0xb40] sm:$0xff]  ;;  %v7740_v23 = vpack.c.bf16 %v833_v16, %v674_v15  ;;  %v843_v15 = vld [vmem:[%s8743_s22 + $0x1078] sm:$0xff]  ;;  %v369_v16 = vld [vmem:[%s8743_s22 + $0x1a8] sm:$0xff] }
 0x101   : > { %v7748_v25 = vpack.c.bf16 %v835_v18, %v676_v17  ;;  %v528_v17 = vld [vmem:[%s8743_s22 + $0x6a0] sm:$0xff]  ;;  %v371_v18 = vld [vmem:[%s8743_s22 + $0x1b8] sm:$0xff] }
 0x105   : > { %7709 = vmatpush1.bf16.xpose.msra.mxu0 %v7708_v26  ;;  %v7750_v26 = vpack.c.bf16 %v520_v20, %v361_v19  ;;  %v530_v19 = vld [vmem:[%s8743_s22 + $0x6b0] sm:$0xff] }
 0x106   : > { %7717 = vmatpush1.bf16.xpose.msra.mxu1 %v7716_v29  ;;  %7719 = vmatprep.subr.bf16.mxu0 %v7718_v30  ;;  %v1179_v29 = vcombine.high %v287_v24, %v287_v24  ;;  %v360_v30 = vld [vmem:[%s8743_s22 + $0x160] sm:$0xff]  ;;  %v7790_v24 = vpack.c.bf16 %v530_v19, %v371_v18  ;;  %v379_v18 = vld [vmem:[%s8743_s22 + $0x1f8] sm:$0xff]  ;;  %v538_v19 = vld [vmem:[%s8743_s22 + $0x6f0] sm:$0xff] }
 0x107   : > { %7727 = vmatprep.subr.bf16.mxu1 %v7726_v31  ;;  %v519_v31 = vld [vmem:[%s8743_s22 + $0x658] sm:$0xff] }
 0x108   : > { %v7752_v40 = vpack.c.bf16 %v519_v31, %v360_v30  ;;  %v529_v30 = vld [vmem:[%s8743_s22 + $0x6a8] sm:$0xff]  ;;  %v687_v31 = vld [vmem:[%s8743_s22 + $0xb98] sm:$0xff] }
 0x10c   : > { %3015 = vmatmul.mubr.f32.vlgmr.msra.gmra.mrb[16].mxu0 %v1135_v8  ;;  %v1176_v8 = vrot.slane %v1162_v62, %v8770_v28  ;;  %v366_v62 = vld [vmem:[%s8743_s22 + $0x190] sm:$0xff] }
 0x10d   : > { %7721 = vmatpush1.bf16.xpose.msra.mxu0 %v7720_v43  ;;  %3085 = vmatmul.mubr.f32.vlgmr.msra.gmra.mrb[16].mxu1 %v1142_v11  ;;  %v7738_v11 = vpack.c.bf16 %v834_v4, %v675_v3  ;;  %v7762_v43 = vpack.c.bf16 %v840_v38, %v681_v37  ;;  %v685_v3 = vld [vmem:[%s8743_s22 + $0xb88] sm:$0xff]  ;;  %v844_v4 = vld [vmem:[%s8743_s22 + $0x1080] sm:$0xff]  ;;  %v7776_v7 = vpack.c.bf16 %v525_v63, %v366_v62  ;;  %v850_v62 = vld [vmem:[%s8743_s22 + $0x10b0] sm:$0xff] }
 0x10e   : > { %7729 = vmatpush1.bf16.xpose.msra.mxu1 %v7728_v44  ;;  %7723 = vmatprep.subr.bf16.mxu0 %v7722_v45  ;;  %v1178_v14 = vcombine.high %v1176_v8, %v1176_v8  ;;  %v1194_v44 = vcombine.high %v1186_v36, %v1186_v36  ;;  %v1237_v63 = vrot.slane %v290_v52, %v8770_v28 }
 0x10f   : > { %7731 = vmatprep.subr.bf16.mxu1 %v7730_v46  ;;  %3154 = vmatprep.mubr.f32.mxu0 %v1160_v47  ;;  %v678_v46 = vld [vmem:[%s8743_s22 + $0xb50] sm:$0xff]  ;;  %v837_v47 = vld [vmem:[%s8743_s22 + $0x1048] sm:$0xff] }
 0x110   : > { %3224 = vmatprep.mubr.f32.mxu1 %v1161_v48  ;;  %v680_v48 = vld [vmem:[%s8743_s22 + $0xb60] sm:$0xff]  ;;  %v7756_v54 = vpack.c.bf16 %v837_v47, %v678_v46  ;;  %v847_v46 = vld [vmem:[%s8743_s22 + $0x1098] sm:$0xff]  ;;  %v373_v47 = vld [vmem:[%s8743_s22 + $0x1c8] sm:$0xff] }
 0x111   : > { %v7764_v56 = vpack.c.bf16 %v839_v49, %v680_v48  ;;  %v532_v48 = vld [vmem:[%s8743_s22 + $0x6c0] sm:$0xff]  ;;  %v375_v49 = vld [vmem:[%s8743_s22 + $0x1d8] sm:$0xff] }
 0x115   : > { %7725 = vmatpush1.bf16.xpose.msra.mxu0 %v7724_v57  ;;  %v7766_v57 = vpack.c.bf16 %v524_v51, %v365_v50  ;;  %v534_v50 = vld [vmem:[%s8743_s22 + $0x6d0] sm:$0xff] }
 0x116   : > { %7733 = vmatpush1.bf16.xpose.msra.mxu1 %v7732_v59  ;;  %7735 = vmatprep.subr.bf16.mxu0 %v7734_v60  ;;  %v1196_v59 = vcombine.high %v288_v55, %v288_v55  ;;  %v364_v60 = vld [vmem:[%s8743_s22 + $0x180] sm:$0xff]  ;;  %v7806_v55 = vpack.c.bf16 %v534_v50, %v375_v49  ;;  %v855_v49 = vld [vmem:[%s8743_s22 + $0x10d8] sm:$0xff]  ;;  %v381_v50 = vld [vmem:[%s8743_s22 + $0x208] sm:$0xff] }
 0x117   : > { %7743 = vmatprep.subr.bf16.mxu1 %v7742_v61  ;;  %v523_v61 = vld [vmem:[%s8743_s22 + $0x678] sm:$0xff] }
 0x118   : > { %v7768_v6 = vpack.c.bf16 %v523_v61, %v364_v60  ;;  %v533_v60 = vld [vmem:[%s8743_s22 + $0x6c8] sm:$0xff]  ;;  %v691_v61 = vld [vmem:[%s8743_s22 + $0xbb8] sm:$0xff] }
 0x11c   : > { %3155 = vmatmul.mubr.f32.vlgmr.msra.gmra.mrb[18].mxu0 %v1152_v39  ;;  %v1193_v39 = vrot.slane %v1179_v29, %v8770_v28  ;;  %v370_v29 = vld [vmem:[%s8743_s22 + $0x1b0] sm:$0xff] }
 0x11d   : > { %7737 = vmatpush1.bf16.xpose.msra.mxu0 %v7736_v9  ;;  %3225 = vmatmul.mubr.f32.vlgmr.msra.gmra.mrb[18].mxu1 %v1159_v42  ;;  %v7754_v42 = vpack.c.bf16 %v838_v35, %v679_v34  ;;  %v7778_v9 = vpack.c.bf16 %v844_v4, %v685_v3  ;;  %v689_v34 = vld [vmem:[%s8743_s22 + $0xba8] sm:$0xff]  ;;  %v848_v35 = vld [vmem:[%s8743_s22 + $0x10a0] sm:$0xff]  ;;  %v7792_v38 = vpack.c.bf16 %v529_v30, %v370_v29  ;;  %v535_v30 = vld [vmem:[%s8743_s22 + $0x6d8] sm:$0xff] }
 0x11e   : > { %7745 = vmatpush1.bf16.xpose.msra.mxu1 %v7744_v10  ;;  %7739 = vmatprep.subr.bf16.mxu0 %v7738_v11  ;;  %v1195_v45 = vcombine.high %v1193_v39, %v1193_v39  ;;  %v1211_v10 = vcombine.high %v1203_v2, %v1203_v2  ;;  %v376_v29 = vld [vmem:[%s8743_s22 + $0x1e0] sm:$0xff] }
 0x11f   : > { %7747 = vmatprep.subr.bf16.mxu1 %v7746_v12  ;;  %3294 = vmatprep.mubr.f32.mxu0 %v1177_v13  ;;  %v682_v12 = vld [vmem:[%s8743_s22 + $0xb70] sm:$0xff]  ;;  %v841_v13 = vld [vmem:[%s8743_s22 + $0x1068] sm:$0xff] }
 0x120   : > { %3364 = vmatprep.mubr.f32.mxu1 %v1178_v14  ;;  %v684_v14 = vld [vmem:[%s8743_s22 + $0xb80] sm:$0xff]  ;;  %v7772_v20 = vpack.c.bf16 %v841_v13, %v682_v12  ;;  %v851_v13 = vld [vmem:[%s8743_s22 + $0x10b8] sm:$0xff] }
 0x121   : > { %v7780_v22 = vpack.c.bf16 %v843_v15, %v684_v14  ;;  %v377_v14 = vld [vmem:[%s8743_s22 + $0x1e8] sm:$0xff]  ;;  %v536_v15 = vld [vmem:[%s8743_s22 + $0x6e0] sm:$0xff] }
 0x125   : > { %7741 = vmatpush1.bf16.xpose.msra.mxu0 %v7740_v23  ;;  %v7782_v23 = vpack.c.bf16 %v528_v17, %v369_v16 }
 0x126   : > { %7749 = vmatpush1.bf16.xpose.msra.mxu1 %v7748_v25  ;;  %7751 = vmatprep.subr.bf16.mxu0 %v7750_v26  ;;  %v1213_v25 = vcombine.high %v289_v21, %v289_v21  ;;  %v368_v26 = vld [vmem:[%s8743_s22 + $0x1a0] sm:$0xff] }
 0x127   : > { %7759 = vmatprep.subr.bf16.mxu1 %v7758_v27  ;;  %v527_v27 = vld [vmem:[%s8743_s22 + $0x698] sm:$0xff] }
 0x128   : > { %v7784_v37 = vpack.c.bf16 %v527_v27, %v368_v26  ;;  %v7822_v26 = vpack.c.bf16 %v538_v19, %v379_v18  ;;  %v857_v18 = vld [vmem:[%s8743_s22 + $0x10e8] sm:$0xff]  ;;  %v700_v19 = vld [vmem:[%s8743_s22 + $0xc00] sm:$0xff] }
 0x12c   : > { %3295 = vmatmul.mubr.f32.vlgmr.msra.gmra.mrb[20].mxu0 %v1169_v5  ;;  %v1210_v5 = vrot.slane %v1196_v59, %v8770_v28  ;;  %v374_v59 = vld [vmem:[%s8743_s22 + $0x1d0] sm:$0xff] }
 0x12d   : > { %7753 = vmatpush1.bf16.xpose.msra.mxu0 %v7752_v40  ;;  %3365 = vmatmul.mubr.f32.vlgmr.msra.gmra.mrb[20].mxu1 %v1176_v8  ;;  %v7770_v8 = vpack.c.bf16 %v842_v1, %v683_v0  ;;  %v7794_v40 = vpack.c.bf16 %v848_v35, %v689_v34  ;;  %v693_v0 = vld [vmem:[%s8743_s22 + $0xbc8] sm:$0xff]  ;;  %v852_v1 = vld [vmem:[%s8743_s22 + $0x10c0] sm:$0xff]  ;;  %v7808_v4 = vpack.c.bf16 %v533_v60, %v374_v59  ;;  %v854_v34 = vld [vmem:[%s8743_s22 + $0x10d0] sm:$0xff] }
 0x12e   : > { %7761 = vmatpush1.bf16.xpose.msra.mxu1 %v7760_v41  ;;  %7755 = vmatprep.subr.bf16.mxu0 %v7754_v42  ;;  %v1212_v11 = vcombine.high %v1210_v5, %v1210_v5  ;;  %v1228_v41 = vcombine.high %v1220_v33, %v1220_v33  ;;  %v292_v59 = vld [vmem:[%s8736_s12 + $0x80] sm:$0xff] }
 0x12f   : > { %7763 = vmatprep.subr.bf16.mxu1 %v7762_v43  ;;  %3434 = vmatprep.mubr.f32.mxu0 %v1194_v44  ;;  %v686_v43 = vld [vmem:[%s8743_s22 + $0xb90] sm:$0xff]  ;;  %v845_v44 = vld [vmem:[%s8743_s22 + $0x1088] sm:$0xff] }
 0x130   : > { %3504 = vmatprep.mubr.f32.mxu1 %v1195_v45  ;;  %v688_v45 = vld [vmem:[%s8743_s22 + $0xba0] sm:$0xff]  ;;  %v7788_v51 = vpack.c.bf16 %v845_v44, %v686_v43 }
 0x131   : > { %v7796_v53 = vpack.c.bf16 %v847_v46, %v688_v45  ;;  %v694_v45 = vld [vmem:[%s8743_s22 + $0xbd0] sm:$0xff]  ;;  %v853_v46 = vld [vmem:[%s8743_s22 + $0x10c8] sm:$0xff] }
 0x135   : > { %7757 = vmatpush1.bf16.xpose.msra.mxu0 %v7756_v54  ;;  %v7798_v54 = vpack.c.bf16 %v532_v48, %v373_v47  ;;  %v696_v47 = vld [vmem:[%s8743_s22 + $0xbe0] sm:$0xff] }
 0x136   : > { %7765 = vmatpush1.bf16.xpose.msra.mxu1 %v7764_v56  ;;  %7767 = vmatprep.subr.bf16.mxu0 %v7766_v57  ;;  %v1230_v56 = vcombine.high %v290_v52, %v290_v52  ;;  %v372_v57 = vld [vmem:[%s8743_s22 + $0x1c0] sm:$0xff] }
 0x137   : > { %7775 = vmatprep.subr.bf16.mxu1 %v7774_v58  ;;  %v531_v58 = vld [vmem:[%s8743_s22 + $0x6b8] sm:$0xff] }
 0x138   : > { %v7800_v3 = vpack.c.bf16 %v531_v58, %v372_v57  ;;  %v7820_v58 = vpack.c.bf16 %v853_v46, %v694_v45  ;;  %v705_v45 = vld [vmem:[%s8743_s22 + $0xc28] sm:$0xff]  ;;  %v864_v46 = vld [vmem:[%s8743_s22 + $0x1120] sm:$0xff] }
 0x13c   : > { %3435 = vmatmul.mubr.f32.vlgmr.msra.gmra.mrb[22].mxu0 %v1186_v36  ;;  %v1227_v36 = vrot.slane %v1213_v25, %v8770_v28  ;;  %v7814_v25 = vpack.c.bf16 %v536_v15, %v377_v14 }
 0x13d   : > { %7769 = vmatpush1.bf16.xpose.msra.mxu0 %v7768_v6  ;;  %3505 = vmatmul.mubr.f32.vlgmr.msra.gmra.mrb[22].mxu1 %v1193_v39  ;;  %v7786_v39 = vpack.c.bf16 %v846_v32, %v687_v31  ;;  %v7810_v6 = vpack.c.bf16 %v852_v1, %v693_v0  ;;  %v378_v31 = vld [vmem:[%s8743_s22 + $0x1f0] sm:$0xff]  ;;  %v537_v32 = vld [vmem:[%s8743_s22 + $0x6e8] sm:$0xff]  ;;  %v1264_v0 = vcombine.high %v292_v59, %v292_v59  ;;  %v380_v1 = vld [vmem:[%s8743_s22 + $0x200] sm:$0xff] }
 0x13e   : > { %7777 = vmatpush1.bf16.xpose.msra.mxu1 %v7776_v7  ;;  %7771 = vmatprep.subr.bf16.mxu0 %v7770_v8  ;;  %v1229_v42 = vcombine.high %v1227_v36, %v1227_v36  ;;  %v1245_v7 = vcombine.high %v1237_v63, %v1237_v63 }
 0x13f   : > { %7779 = vmatprep.subr.bf16.mxu1 %v7778_v9  ;;  %3574 = vmatprep.mubr.f32.mxu0 %v1211_v10  ;;  %v690_v9 = vld [vmem:[%s8743_s22 + $0xbb0] sm:$0xff]  ;;  %v849_v10 = vld [vmem:[%s8743_s22 + $0x10a8] sm:$0xff] }
 0x140   : > { %3644 = vmatprep.mubr.f32.mxu1 %v1212_v11  ;;  %v692_v11 = vld [vmem:[%s8743_s22 + $0xbc0] sm:$0xff] }
 0x145   : > { %7773 = vmatpush1.bf16.xpose.msra.mxu0 %v7772_v20 }
 0x146   : > { %7781 = vmatpush1.bf16.xpose.msra.mxu1 %v7780_v22  ;;  %7783 = vmatprep.subr.bf16.mxu0 %v7782_v23  ;;  %v7804_v22 = vpack.c.bf16 %v849_v10, %v690_v9  ;;  %v291_v23 = vld [vmem:[%s8736_s12 + $0x78] sm:$0xff]  ;;  %v1278_v10 = vrot.slane %v1264_v0, %v8770_v28 }
 0x147   : > { %7791 = vmatprep.subr.bf16.mxu1 %v7790_v24  ;;  %v7812_v24 = vpack.c.bf16 %v851_v13, %v692_v11  ;;  %v1247_v27 = vcombine.high %v291_v23, %v291_v23  ;;  %v1254_v35 = vrot.slane %v291_v23, %v8770_v28  ;;  %v860_v9 = vld [vmem:[%s8743_s22 + $0x1100] sm:$0xff]  ;;  %v391_v0 = vld [vmem:[%s8743_s22 + $0x258] sm:$0xff] }
 0x148   : > { %v544_v23 = vld [vmem:[%s8743_s22 + $0x720] sm:$0xff] }
 0x149   : > { %v1262_v43 = vcombine.high %v1254_v35, %v1254_v35 }
 0x14c   : > { %3575 = vmatmul.mubr.f32.vlgmr.msra.gmra.mrb[24].mxu0 %v1203_v2  ;;  %v1244_v2 = vrot.slane %v1230_v56, %v8770_v28  ;;  %v542_v56 = vld [vmem:[%s8743_s22 + $0x710] sm:$0xff] }
 0x14d   : > { %7785 = vmatpush1.bf16.xpose.msra.mxu0 %v7784_v37  ;;  %3645 = vmatmul.mubr.f32.vlgmr.msra.gmra.mrb[24].mxu1 %v1210_v5  ;;  %v7802_v5 = vpack.c.bf16 %v850_v62, %v691_v61  ;;  %v856_v37 = vld [vmem:[%s8743_s22 + $0x10e0] sm:$0xff]  ;;  %v7828_v61 = vpack.c.bf16 %v855_v49, %v696_v47 }
 0x14e   : > { %7793 = vmatpush1.bf16.xpose.msra.mxu1 %v7792_v38  ;;  %7787 = vmatprep.subr.bf16.mxu0 %v7786_v39  ;;  %v1246_v8 = vcombine.high %v1244_v2, %v1244_v2  ;;  %v1261_v38 = vrot.slane %v1247_v27, %v8770_v28  ;;  %v7816_v39 = vpack.c.bf16 %v535_v30, %v376_v29  ;;  %v387_v27 = vld [vmem:[%s8743_s22 + $0x238] sm:$0xff]  ;;  %v546_v29 = vld [vmem:[%s8743_s22 + $0x730] sm:$0xff] }
 0x14f   : > { %7795 = vmatprep.subr.bf16.mxu1 %v7794_v40  ;;  %3714 = vmatprep.mubr.f32.mxu0 %v1228_v41  ;;  %v7824_v40 = vpack.c.bf16 %v537_v32, %v378_v31  ;;  %v293_v32 = vld [vmem:[%s8736_s12 + $0x88] sm:$0xff] }
 0x150   : > { %3784 = vmatprep.mubr.f32.mxu1 %v1229_v42  ;;  %v1263_v44 = vcombine.high %v1261_v38, %v1261_v38 }
 0x155   : > { %7789 = vmatpush1.bf16.xpose.msra.mxu0 %v7788_v51  ;;  %v540_v51 = vld [vmem:[%s8743_s22 + $0x700] sm:$0xff] }
 0x156   : > { %7797 = vmatpush1.bf16.xpose.msra.mxu1 %v7796_v53  ;;  %7799 = vmatprep.subr.bf16.mxu0 %v7798_v54  ;;  %v7830_v62 = vpack.c.bf16 %v540_v51, %v381_v50  ;;  %v7858_v51 = vpack.c.bf16 %v864_v46, %v705_v45 }
 0x157   : > { %7807 = vmatprep.subr.bf16.mxu1 %v7806_v55  ;;  %v383_v55 = vld [vmem:[%s8743_s22 + $0x218] sm:$0xff] }
 0x15c   : > { %3715 = vmatmul.mubr.f32.vlgmr.msra.gmra.mrb[26].mxu0 %v1220_v33  ;;  %v695_v33 = vld [vmem:[%s8743_s22 + $0xbd8] sm:$0xff] }
 0x15d   : > { %7801 = vmatpush1.bf16.xpose.msra.mxu0 %v7800_v3  ;;  %3785 = vmatmul.mubr.f32.vlgmr.msra.gmra.mrb[26].mxu1 %v1227_v36  ;;  %v697_v36 = vld [vmem:[%s8743_s22 + $0xbe8] sm:$0xff]  ;;  %v7818_v41 = vpack.c.bf16 %v854_v34, %v695_v33  ;;  %v382_v3 = vld [vmem:[%s8743_s22 + $0x210] sm:$0xff] }
 0x15e   : > { %7809 = vmatpush1.bf16.xpose.msra.mxu1 %v7808_v4  ;;  %7803 = vmatprep.subr.bf16.mxu0 %v7802_v5  ;;  %v7826_v42 = vpack.c.bf16 %v856_v37, %v697_v36  ;;  %v541_v4 = vld [vmem:[%s8743_s22 + $0x708] sm:$0xff]  ;;  %v699_v5 = vld [vmem:[%s8743_s22 + $0xbf8] sm:$0xff]  ;;  %v7854_v36 = vpack.c.bf16 %v546_v29, %v387_v27  ;;  %v1281_v37 = vcombine.high %v293_v32, %v293_v32  ;;  %v708_v29 = vld [vmem:[%s8743_s22 + $0xc40] sm:$0xff] }
 0x15f   : > { %v1896_v12 = vpop.f32.mrb[0].mxu0  ;;  %7811 = vmatprep.subr.bf16.mxu1 %v7810_v6  ;;  %3854 = vmatprep.mubr.f32.mxu0 %v1245_v7  ;;  %v858_v6 = vld [vmem:[%s8743_s22 + $0x10f0] sm:$0xff]  ;;  %v1271_v7 = vrot.slane %v292_v59, %v8770_v28  ;;  %v389_v59 = vld [vmem:[%s8743_s22 + $0x248] sm:$0xff] }
 0x160   : > { %v1898_v16 = vpop.f32.mrb[1].mxu0  ;;  %v1966_v17 = vpop.f32.mrb[0].mxu1  ;;  %3924 = vmatprep.mubr.f32.mxu1 %v1246_v8  ;;  %v701_v8 = vld [vmem:[%s8743_s22 + $0xc08] sm:$0xff]  ;;  %v7834_v13 = vpack.c.bf16 %v858_v6, %v699_v5  ;;  %v1295_v47 = vrot.slane %v1281_v37, %v8770_v28  ;;  %v395_v37 = vld [vmem:[%s8743_s22 + $0x278] sm:$0xff] }
 0x161   : > { %v1967_v20 = vadd.f32 %v1966_v17, %v1896_v12  ;;  %v1968_v21 = vpop.f32.mrb[1].mxu1  ;;  %v7840_v12 = vpack.c.bf16 %v541_v4, %v382_v3  ;;  %v7842_v14 = vpack.c.bf16 %v860_v9, %v701_v8  ;;  %v1279_v15 = vcombine.high %v1271_v7, %v1271_v7  ;;  %v698_v17 = vld [vmem:[%s8743_s22 + $0xbf0] sm:$0xff]  ;;  %v865_v27 = vld [vmem:[%s8743_s22 + $0x1128] sm:$0xff] }
 0x162   : > { %v1280_v16 = vcombine.high %v1278_v10, %v1278_v10  ;;  %v859_v21 = vld [vmem:[%s8743_s22 + $0x10f8] sm:$0xff]  ;;  %v7836_v31 = vpack.c.bf16 %v857_v18, %v698_v17  ;;  %v709_v17 = vld [vmem:[%s8743_s22 + $0xc48] sm:$0xff]  ;;  %v868_v18 = vld [vmem:[%s8743_s22 + $0x1140] sm:$0xff] }
 0x163   : > { %v7844_v34 = vpack.c.bf16 %v859_v21, %v700_v19  ;;  %v294_v4 = vld [vmem:[%s8736_s12 + $0x90] sm:$0xff] }
 0x164   : > { %v1298_v9 = vcombine.high %v294_v4, %v294_v4 }
 0x165   : > { %7805 = vmatpush1.bf16.xpose.msra.mxu0 %v7804_v22  ;;  %v385_v22 = vld [vmem:[%s8743_s22 + $0x228] sm:$0xff] }
 0x166   : > { %7813 = vmatpush1.bf16.xpose.msra.mxu1 %v7812_v24  ;;  %7815 = vmatprep.subr.bf16.mxu0 %v7814_v25  ;;  %v1312_v19 = vrot.slane %v1298_v9, %v8770_v28  ;;  %v399_v9 = vld [vmem:[%s8743_s22 + $0x298] sm:$0xff] }
 0x167   : > { %7823 = vmatprep.subr.bf16.mxu1 %v7822_v26 }
 0x16c   : > { %3855 = vmatmul.mubr.f32.vlgmr.msra.gmra.mrb[28].mxu0 %v1237_v63  ;;  %v7838_v63 = vpack.c.bf16 %v542_v56, %v383_v55  ;;  %v861_v55 = vld [vmem:[%s8743_s22 + $0x1108] sm:$0xff]  ;;  %v704_v56 = vld [vmem:[%s8743_s22 + $0xc20] sm:$0xff] }
 0x16d   : > { %7817 = vmatpush1.bf16.xpose.msra.mxu0 %v7816_v39  ;;  %3925 = vmatmul.mubr.f32.vlgmr.msra.gmra.mrb[28].mxu1 %v1244_v2  ;;  %v539_v2 = vld [vmem:[%s8743_s22 + $0x6f8] sm:$0xff] }
 0x16e   : > { %7825 = vmatpush1.bf16.xpose.msra.mxu1 %v7824_v40  ;;  %7819 = vmatprep.subr.bf16.mxu0 %v7818_v41  ;;  %v7832_v11 = vpack.c.bf16 %v539_v2, %v380_v1  ;;  %v543_v39 = vld [vmem:[%s8743_s22 + $0x718] sm:$0xff]  ;;  %v386_v40 = vld [vmem:[%s8743_s22 + $0x230] sm:$0xff]  ;;  %v545_v41 = vld [vmem:[%s8743_s22 + $0x728] sm:$0xff] }
 0x16f   : > { %v2036_v48 = vpop.f32.mrb[2].mxu0  ;;  %7827 = vmatprep.subr.bf16.mxu1 %v7826_v42  ;;  %3994 = vmatprep.mubr.f32.mxu0 %v1262_v43  ;;  %v703_v42 = vld [vmem:[%s8743_s22 + $0xc18] sm:$0xff]  ;;  %v862_v43 = vld [vmem:[%s8743_s22 + $0x1110] sm:$0xff]  ;;  %v7856_v49 = vpack.c.bf16 %v545_v41, %v386_v40 }
 0x170   : > { %v2037_v52 = vadd.f32 %v2036_v48, %v1967_v20  ;;  %v2038_v53 = vpop.f32.mrb[3].mxu0  ;;  %v2106_v54 = vpop.f32.mrb[2].mxu1  ;;  %4064 = vmatprep.mubr.f32.mxu1 %v1263_v44  ;;  %v1288_v44 = vrot.slane %v293_v32, %v8770_v28  ;;  %v7850_v50 = vpack.c.bf16 %v862_v43, %v703_v42  ;;  %v550_v1 = vld [vmem:[%s8743_s22 + $0x750] sm:$0xff]  ;;  %v393_v32 = vld [vmem:[%s8743_s22 + $0x268] sm:$0xff]  ;;  %v295_v41 = vld [vmem:[%s8736_s12 + $0x98] sm:$0xff] }
 0x171   : > { %v2108_v57 = vpop.f32.mrb[3].mxu1  ;;  %v1297_v53 = vcombine.high %v1295_v47, %v1295_v47  ;;  %v7870_v8 = vpack.c.bf16 %v550_v1, %v391_v0  ;;  %v1315_v46 = vcombine.high %v295_v41, %v295_v41  ;;  %v869_v0 = vld [vmem:[%s8743_s22 + $0x1148] sm:$0xff]  ;;  %v712_v1 = vld [vmem:[%s8743_s22 + $0xc60] sm:$0xff] }
 0x172   : > { %v2107_v60 = vadd.f32 %v2106_v54, %v2037_v52  ;;  %v1296_v52 = vcombine.high %v1288_v44, %v1288_v44  ;;  %v702_v54 = vld [vmem:[%s8743_s22 + $0xc10] sm:$0xff] }
 0x173   : > { %v7852_v3 = vpack.c.bf16 %v861_v55, %v702_v54  ;;  %v713_v54 = vld [vmem:[%s8743_s22 + $0xc68] sm:$0xff]  ;;  %v872_v55 = vld [vmem:[%s8743_s22 + $0x1160] sm:$0xff] }
 0x175   : > { %7821 = vmatpush1.bf16.xpose.msra.mxu0 %v7820_v58  ;;  %v863_v58 = vld [vmem:[%s8743_s22 + $0x1118] sm:$0xff] }
 0x176   : > { %7829 = vmatpush1.bf16.xpose.msra.mxu1 %v7828_v61  ;;  %7831 = vmatprep.subr.bf16.mxu0 %v7830_v62  ;;  %v7860_v6 = vpack.c.bf16 %v863_v58, %v704_v56  ;;  %v1329_v56 = vrot.slane %v1315_v46, %v8770_v28  ;;  %v403_v46 = vld [vmem:[%s8743_s22 + $0x2b8] sm:$0xff] }
 0x177   : > { %7839 = vmatprep.subr.bf16.mxu1 %v7838_v63 }
 0x17c   : > { %3995 = vmatmul.mubr.f32.vlgmr.msra.gmra.mrb[30].mxu0 %v1254_v35  ;;  %v7846_v35 = vpack.c.bf16 %v544_v23, %v385_v22  ;;  %v7874_v23 = vpack.c.bf16 %v868_v18, %v709_v17 }
 0x17d   : > { %7833 = vmatpush1.bf16.xpose.msra.mxu0 %v7832_v11  ;;  %4065 = vmatmul.mubr.f32.vlgmr.msra.gmra.mrb[30].mxu1 %v1261_v38  ;;  %v384_v38 = vld [vmem:[%s8743_s22 + $0x220] sm:$0xff]  ;;  %v547_v11 = vld [vmem:[%s8743_s22 + $0x738] sm:$0xff] }
 0x17e   : > { %7841 = vmatpush1.bf16.xpose.msra.mxu1 %v7840_v12  ;;  %7835 = vmatprep.subr.bf16.mxu0 %v7834_v13  ;;  %v7848_v48 = vpack.c.bf16 %v543_v39, %v384_v38  ;;  %v390_v12 = vld [vmem:[%s8743_s22 + $0x250] sm:$0xff]  ;;  %v549_v13 = vld [vmem:[%s8743_s22 + $0x748] sm:$0xff] }
 0x17f   : > { %v2176_v20 = vpop.f32.mrb[4].mxu0  ;;  %7843 = vmatprep.subr.bf16.mxu1 %v7842_v14  ;;  %4134 = vmatprep.mubr.f32.mxu0 %v1279_v15  ;;  %v707_v14 = vld [vmem:[%s8743_s22 + $0xc38] sm:$0xff]  ;;  %v866_v15 = vld [vmem:[%s8743_s22 + $0x1130] sm:$0xff]  ;;  %v7872_v21 = vpack.c.bf16 %v549_v13, %v390_v12  ;;  %v296_v13 = vld [vmem:[%s8736_s12 + $0xa0] sm:$0xff] }
 0x180   : > { %v2177_v24 = vadd.f32 %v2176_v20, %v2107_v60  ;;  %v2178_v25 = vpop.f32.mrb[5].mxu0  ;;  %v2246_v26 = vpop.f32.mrb[4].mxu1  ;;  %4204 = vmatprep.mubr.f32.mxu1 %v1280_v16  ;;  %v548_v60 = vld [vmem:[%s8743_s22 + $0x740] sm:$0xff]  ;;  %v1305_v16 = vrot.slane %v294_v4, %v8770_v28  ;;  %v7866_v22 = vpack.c.bf16 %v866_v15, %v707_v14  ;;  %v554_v38 = vld [vmem:[%s8743_s22 + $0x770] sm:$0xff]  ;;  %v397_v4 = vld [vmem:[%s8743_s22 + $0x288] sm:$0xff]  ;;  %v1332_v18 = vcombine.high %v296_v13, %v296_v13 }
 0x181   : > { %v2248_v30 = vpop.f32.mrb[5].mxu1  ;;  %v1314_v25 = vcombine.high %v1312_v19, %v1312_v19  ;;  %v7886_v45 = vpack.c.bf16 %v554_v38, %v395_v37  ;;  %v873_v37 = vld [vmem:[%s8743_s22 + $0x1168] sm:$0xff]  ;;  %v716_v38 = vld [vmem:[%s8743_s22 + $0xc80] sm:$0xff] }
 0x182   : > { %v2247_v33 = vadd.f32 %v2246_v26, %v2177_v24  ;;  %v1313_v24 = vcombine.high %v1305_v16, %v1305_v16  ;;  %v706_v26 = vld [vmem:[%s8743_s22 + $0xc30] sm:$0xff] }
 0x183   : > { %v7868_v40 = vpack.c.bf16 %v865_v27, %v706_v26  ;;  %v717_v26 = vld [vmem:[%s8743_s22 + $0xc88] sm:$0xff]  ;;  %v876_v27 = vld [vmem:[%s8743_s22 + $0x1180] sm:$0xff] }
 0x185   : > { %7837 = vmatpush1.bf16.xpose.msra.mxu0 %v7836_v31  ;;  %v867_v31 = vld [vmem:[%s8743_s22 + $0x1138] sm:$0xff] }
 0x186   : > { %7845 = vmatpush1.bf16.xpose.msra.mxu1 %v7844_v34  ;;  %7847 = vmatprep.subr.bf16.mxu0 %v7846_v35  ;;  %v7876_v43 = vpack.c.bf16 %v867_v31, %v708_v29  ;;  %v1346_v29 = vrot.slane %v1332_v18, %v8770_v28  ;;  %v407_v18 = vld [vmem:[%s8743_s22 + $0x2d8] sm:$0xff] }
 0x187   : > { %7855 = vmatprep.subr.bf16.mxu1 %v7854_v36 }
 0x18c   : > { %4135 = vmatmul.mubr.f32.vlgmr.msra.gmra.mrb[32].mxu0 %v1271_v7  ;;  %v7862_v7 = vpack.c.bf16 %v548_v60, %v389_v59  ;;  %v7890_v60 = vpack.c.bf16 %v872_v55, %v713_v54 }
 0x18d   : > { %7849 = vmatpush1.bf16.xpose.msra.mxu0 %v7848_v48  ;;  %4205 = vmatmul.mubr.f32.vlgmr.msra.gmra.mrb[32].mxu1 %v1278_v10  ;;  %v388_v10 = vld [vmem:[%s8743_s22 + $0x240] sm:$0xff]  ;;  %v551_v48 = vld [vmem:[%s8743_s22 + $0x758] sm:$0xff] }
 0x18e   : > { %7857 = vmatpush1.bf16.xpose.msra.mxu1 %v7856_v49  ;;  %7851 = vmatprep.subr.bf16.mxu0 %v7850_v50  ;;  %v7864_v20 = vpack.c.bf16 %v547_v11, %v388_v10  ;;  %v394_v49 = vld [vmem:[%s8743_s22 + $0x270] sm:$0xff]  ;;  %v553_v50 = vld [vmem:[%s8743_s22 + $0x768] sm:$0xff] }
 0x18f   : > { %v2316_v57 = vpop.f32.mrb[6].mxu0  ;;  %7859 = vmatprep.subr.bf16.mxu1 %v7858_v51  ;;  %4274 = vmatprep.mubr.f32.mxu0 %v1296_v52  ;;  %v711_v51 = vld [vmem:[%s8743_s22 + $0xc58] sm:$0xff]  ;;  %v870_v52 = vld [vmem:[%s8743_s22 + $0x1150] sm:$0xff]  ;;  %v7888_v58 = vpack.c.bf16 %v553_v50, %v394_v49 }
 0x190   : > { %v2317_v61 = vadd.f32 %v2316_v57, %v2247_v33  ;;  %v2318_v62 = vpop.f32.mrb[7].mxu0  ;;  %v2386_v63 = vpop.f32.mrb[6].mxu1  ;;  %4344 = vmatprep.mubr.f32.mxu1 %v1297_v53  ;;  %v552_v33 = vld [vmem:[%s8743_s22 + $0x760] sm:$0xff]  ;;  %v1322_v53 = vrot.slane %v295_v41, %v8770_v28  ;;  %v7882_v59 = vpack.c.bf16 %v870_v52, %v711_v51  ;;  %v558_v10 = vld [vmem:[%s8743_s22 + $0x790] sm:$0xff]  ;;  %v401_v41 = vld [vmem:[%s8743_s22 + $0x2a8] sm:$0xff] }
 0x191   : > { %v2388_v2 = vpop.f32.mrb[7].mxu1  ;;  %v1331_v62 = vcombine.high %v1329_v56, %v1329_v56  ;;  %v7902_v17 = vpack.c.bf16 %v558_v10, %v399_v9  ;;  %v297_v50 = vld [vmem:[%s8736_s12 + $0xa8] sm:$0xff]  ;;  %v720_v10 = vld [vmem:[%s8743_s22 + $0xca0] sm:$0xff] }
 0x192   : > { %v2387_v5 = vadd.f32 %v2386_v63, %v2317_v61  ;;  %v1330_v61 = vcombine.high %v1322_v53, %v1322_v53  ;;  %v710_v63 = vld [vmem:[%s8743_s22 + $0xc50] sm:$0xff]  ;;  %v1349_v55 = vcombine.high %v297_v50, %v297_v50  ;;  %v877_v9 = vld [vmem:[%s8743_s22 + $0x1188] sm:$0xff] }
 0x193   : > { %v7884_v12 = vpack.c.bf16 %v869_v0, %v710_v63  ;;  %v721_v63 = vld [vmem:[%s8743_s22 + $0xca8] sm:$0xff]  ;;  %v880_v0 = vld [vmem:[%s8743_s22 + $0x11a0] sm:$0xff] }
 0x195   : > { %7853 = vmatpush1.bf16.xpose.msra.mxu0 %v7852_v3  ;;  %v871_v3 = vld [vmem:[%s8743_s22 + $0x1158] sm:$0xff] }
 0x196   : > { %7861 = vmatpush1.bf16.xpose.msra.mxu1 %v7860_v6  ;;  %7863 = vmatprep.subr.bf16.mxu0 %v7862_v7  ;;  %v7892_v15 = vpack.c.bf16 %v871_v3, %v712_v1  ;;  %v1363_v1 = vrot.slane %v1349_v55, %v8770_v28  ;;  %v411_v55 = vld [vmem:[%s8743_s22 + $0x2f8] sm:$0xff] }
 0x197   : > { %7871 = vmatprep.subr.bf16.mxu1 %v7870_v8 }
 0x19c   : > { %4275 = vmatmul.mubr.f32.vlgmr.msra.gmra.mrb[34].mxu0 %v1288_v44  ;;  %v7878_v44 = vpack.c.bf16 %v552_v33, %v393_v32  ;;  %v7906_v33 = vpack.c.bf16 %v876_v27, %v717_v26 }
 0x19d   : > { %7865 = vmatpush1.bf16.xpose.msra.mxu0 %v7864_v20  ;;  %4345 = vmatmul.mubr.f32.vlgmr.msra.gmra.mrb[34].mxu1 %v1295_v47  ;;  %v392_v47 = vld [vmem:[%s8743_s22 + $0x260] sm:$0xff]  ;;  %v555_v20 = vld [vmem:[%s8743_s22 + $0x778] sm:$0xff] }
 0x19e   : > { %7873 = vmatpush1.bf16.xpose.msra.mxu1 %v7872_v21  ;;  %7867 = vmatprep.subr.bf16.mxu0 %v7866_v22  ;;  %v7880_v57 = vpack.c.bf16 %v551_v48, %v392_v47  ;;  %v398_v21 = vld [vmem:[%s8743_s22 + $0x290] sm:$0xff]  ;;  %v557_v22 = vld [vmem:[%s8743_s22 + $0x788] sm:$0xff] }
 0x19f   : > { %v2456_v30 = vpop.f32.mrb[8].mxu0  ;;  %7875 = vmatprep.subr.bf16.mxu1 %v7874_v23  ;;  %4414 = vmatprep.mubr.f32.mxu0 %v1313_v24  ;;  %v715_v23 = vld [vmem:[%s8743_s22 + $0xc78] sm:$0xff]  ;;  %v874_v24 = vld [vmem:[%s8743_s22 + $0x1170] sm:$0xff]  ;;  %v7904_v31 = vpack.c.bf16 %v557_v22, %v398_v21 }
 0x1a0   : > { %v2457_v34 = vadd.f32 %v2456_v30, %v2387_v5  ;;  %v2458_v35 = vpop.f32.mrb[9].mxu0  ;;  %v2526_v36 = vpop.f32.mrb[8].mxu1  ;;  %4484 = vmatprep.mubr.f32.mxu1 %v1314_v25  ;;  %v556_v5 = vld [vmem:[%s8743_s22 + $0x780] sm:$0xff]  ;;  %v1339_v25 = vrot.slane %v296_v13, %v8770_v28  ;;  %v7898_v32 = vpack.c.bf16 %v874_v24, %v715_v23  ;;  %v562_v47 = vld [vmem:[%s8743_s22 + $0x7b0] sm:$0xff]  ;;  %v405_v13 = vld [vmem:[%s8743_s22 + $0x2c8] sm:$0xff] }
 0x1a1   : > { %v2528_v39 = vpop.f32.mrb[9].mxu1  ;;  %v1348_v35 = vcombine.high %v1346_v29, %v1346_v29  ;;  %v7918_v54 = vpack.c.bf16 %v562_v47, %v403_v46  ;;  %v298_v22 = vld [vmem:[%s8736_s12 + $0xb0] sm:$0xff]  ;;  %v881_v46 = vld [vmem:[%s8743_s22 + $0x11a8] sm:$0xff]  ;;  %v724_v47 = vld [vmem:[%s8743_s22 + $0xcc0] sm:$0xff] }
 0x1a2   : > { %v2527_v42 = vadd.f32 %v2526_v36, %v2457_v34  ;;  %v1347_v34 = vcombine.high %v1339_v25, %v1339_v25  ;;  %v714_v36 = vld [vmem:[%s8743_s22 + $0xc70] sm:$0xff]  ;;  %v1366_v27 = vcombine.high %v298_v22, %v298_v22 }
 0x1a3   : > { %v7900_v49 = vpack.c.bf16 %v873_v37, %v714_v36  ;;  %v725_v36 = vld [vmem:[%s8743_s22 + $0xcc8] sm:$0xff]  ;;  %v884_v37 = vld [vmem:[%s8743_s22 + $0x11c0] sm:$0xff] }
 0x1a5   : > { %7869 = vmatpush1.bf16.xpose.msra.mxu0 %v7868_v40  ;;  %v875_v40 = vld [vmem:[%s8743_s22 + $0x1178] sm:$0xff] }
 0x1a6   : > { %7877 = vmatpush1.bf16.xpose.msra.mxu1 %v7876_v43  ;;  %7879 = vmatprep.subr.bf16.mxu0 %v7878_v44  ;;  %v7908_v52 = vpack.c.bf16 %v875_v40, %v716_v38  ;;  %v1380_v38 = vrot.slane %v1366_v27, %v8770_v28  ;;  %v415_v27 = vld [vmem:[%s8743_s22 + $0x318] sm:$0xff] }
 0x1a7   : > { %7887 = vmatprep.subr.bf16.mxu1 %v7886_v45 }
 0x1ac   : > { %4415 = vmatmul.mubr.f32.vlgmr.msra.gmra.mrb[36].mxu0 %v1305_v16  ;;  %v7894_v16 = vpack.c.bf16 %v556_v5, %v397_v4  ;;  %v7922_v5 = vpack.c.bf16 %v880_v0, %v721_v63 }
 0x1ad   : > { %7881 = vmatpush1.bf16.xpose.msra.mxu0 %v7880_v57  ;;  %4485 = vmatmul.mubr.f32.vlgmr.msra.gmra.mrb[36].mxu1 %v1312_v19  ;;  %v396_v19 = vld [vmem:[%s8743_s22 + $0x280] sm:$0xff]  ;;  %v559_v57 = vld [vmem:[%s8743_s22 + $0x798] sm:$0xff] }
 0x1ae   : > { %7889 = vmatpush1.bf16.xpose.msra.mxu1 %v7888_v58  ;;  %7883 = vmatprep.subr.bf16.mxu0 %v7882_v59  ;;  %v7896_v30 = vpack.c.bf16 %v555_v20, %v396_v19  ;;  %v402_v58 = vld [vmem:[%s8743_s22 + $0x2b0] sm:$0xff]  ;;  %v561_v59 = vld [vmem:[%s8743_s22 + $0x7a8] sm:$0xff] }
 0x1af   : > { %v2596_v2 = vpop.f32.mrb[10].mxu0  ;;  %7891 = vmatprep.subr.bf16.mxu1 %v7890_v60  ;;  %4554 = vmatprep.mubr.f32.mxu0 %v1330_v61  ;;  %v719_v60 = vld [vmem:[%s8743_s22 + $0xc98] sm:$0xff]  ;;  %v878_v61 = vld [vmem:[%s8743_s22 + $0x1190] sm:$0xff]  ;;  %v7920_v3 = vpack.c.bf16 %v561_v59, %v402_v58 }
 0x1b0   : > { %v2597_v6 = vadd.f32 %v2596_v2, %v2527_v42  ;;  %v2598_v7 = vpop.f32.mrb[11].mxu0  ;;  %v2666_v8 = vpop.f32.mrb[10].mxu1  ;;  %4624 = vmatprep.mubr.f32.mxu1 %v1331_v62  ;;  %v560_v42 = vld [vmem:[%s8743_s22 + $0x7a0] sm:$0xff]  ;;  %v1356_v62 = vrot.slane %v297_v50, %v8770_v28  ;;  %v7914_v4 = vpack.c.bf16 %v878_v61, %v719_v60  ;;  %v566_v19 = vld [vmem:[%s8743_s22 + $0x7d0] sm:$0xff]  ;;  %v409_v50 = vld [vmem:[%s8743_s22 + $0x2e8] sm:$0xff] }
 0x1b1   : > { %v2668_v11 = vpop.f32.mrb[11].mxu1  ;;  %v1365_v7 = vcombine.high %v1363_v1, %v1363_v1  ;;  %v7934_v26 = vpack.c.bf16 %v566_v19, %v407_v18  ;;  %v299_v59 = vld [vmem:[%s8736_s12 + $0xb8] sm:$0xff]  ;;  %v885_v18 = vld [vmem:[%s8743_s22 + $0x11c8] sm:$0xff] }
 0x1b2   : > { %v2667_v14 = vadd.f32 %v2666_v8, %v2597_v6  ;;  %v1364_v6 = vcombine.high %v1356_v62, %v1356_v62  ;;  %v718_v8 = vld [vmem:[%s8743_s22 + $0xc90] sm:$0xff]  ;;  %v1383_v0 = vcombine.high %v299_v59, %v299_v59  ;;  %v728_v19 = vld [vmem:[%s8743_s22 + $0xce0] sm:$0xff] }
 0x1b3   : > { %v7916_v21 = vpack.c.bf16 %v877_v9, %v718_v8  ;;  %v729_v8 = vld [vmem:[%s8743_s22 + $0xce8] sm:$0xff]  ;;  %v888_v9 = vld [vmem:[%s8743_s22 + $0x11e0] sm:$0xff] }
 0x1b5   : > { %7885 = vmatpush1.bf16.xpose.msra.mxu0 %v7884_v12  ;;  %v879_v12 = vld [vmem:[%s8743_s22 + $0x1198] sm:$0xff] }
 0x1b6   : > { %7893 = vmatpush1.bf16.xpose.msra.mxu1 %v7892_v15  ;;  %7895 = vmatprep.subr.bf16.mxu0 %v7894_v16  ;;  %v7924_v24 = vpack.c.bf16 %v879_v12, %v720_v10  ;;  %v1397_v10 = vrot.slane %v1383_v0, %v8770_v28  ;;  %v419_v0 = vld [vmem:[%s8743_s22 + $0x338] sm:$0xff] }
 0x1b7   : > { %7903 = vmatprep.subr.bf16.mxu1 %v7902_v17 }
 0x1bc   : > { %4555 = vmatmul.mubr.f32.vlgmr.msra.gmra.mrb[38].mxu0 %v1322_v53  ;;  %v7910_v53 = vpack.c.bf16 %v560_v42, %v401_v41  ;;  %v7938_v42 = vpack.c.bf16 %v884_v37, %v725_v36 }
 0x1bd   : > { %7897 = vmatpush1.bf16.xpose.msra.mxu0 %v7896_v30  ;;  %4625 = vmatmul.mubr.f32.vlgmr.msra.gmra.mrb[38].mxu1 %v1329_v56  ;;  %v400_v56 = vld [vmem:[%s8743_s22 + $0x2a0] sm:$0xff]  ;;  %v563_v30 = vld [vmem:[%s8743_s22 + $0x7b8] sm:$0xff] }
 0x1be   : > { %7905 = vmatpush1.bf16.xpose.msra.mxu1 %v7904_v31  ;;  %7899 = vmatprep.subr.bf16.mxu0 %v7898_v32  ;;  %v7912_v2 = vpack.c.bf16 %v559_v57, %v400_v56  ;;  %v406_v31 = vld [vmem:[%s8743_s22 + $0x2d0] sm:$0xff]  ;;  %v565_v32 = vld [vmem:[%s8743_s22 + $0x7c8] sm:$0xff] }
 0x1bf   : > { %v2736_v39 = vpop.f32.mrb[12].mxu0  ;;  %7907 = vmatprep.subr.bf16.mxu1 %v7906_v33  ;;  %4694 = vmatprep.mubr.f32.mxu0 %v1347_v34  ;;  %v723_v33 = vld [vmem:[%s8743_s22 + $0xcb8] sm:$0xff]  ;;  %v882_v34 = vld [vmem:[%s8743_s22 + $0x11b0] sm:$0xff]  ;;  %v7936_v40 = vpack.c.bf16 %v565_v32, %v406_v31  ;;  %v300_v32 = vld [vmem:[%s8736_s12 + $0xc0] sm:$0xff] }
 0x1c0   : > { %v2737_v43 = vadd.f32 %v2736_v39, %v2667_v14  ;;  %v2738_v44 = vpop.f32.mrb[13].mxu0  ;;  %v2806_v45 = vpop.f32.mrb[12].mxu1  ;;  %4764 = vmatprep.mubr.f32.mxu1 %v1348_v35  ;;  %v564_v14 = vld [vmem:[%s8743_s22 + $0x7c0] sm:$0xff]  ;;  %v1373_v35 = vrot.slane %v298_v22, %v8770_v28  ;;  %v7930_v41 = vpack.c.bf16 %v882_v34, %v723_v33  ;;  %v570_v56 = vld [vmem:[%s8743_s22 + $0x7f0] sm:$0xff]  ;;  %v413_v22 = vld [vmem:[%s8743_s22 + $0x308] sm:$0xff]  ;;  %v1400_v37 = vcombine.high %v300_v32, %v300_v32 }
 0x1c1   : > { %v2808_v48 = vpop.f32.mrb[13].mxu1  ;;  %v1382_v44 = vcombine.high %v1380_v38, %v1380_v38  ;;  %v7950_v63 = vpack.c.bf16 %v570_v56, %v411_v55  ;;  %v889_v55 = vld [vmem:[%s8743_s22 + $0x11e8] sm:$0xff]  ;;  %v732_v56 = vld [vmem:[%s8743_s22 + $0xd00] sm:$0xff] }
 0x1c2   : > { %v2807_v51 = vadd.f32 %v2806_v45, %v2737_v43  ;;  %v1381_v43 = vcombine.high %v1373_v35, %v1373_v35  ;;  %v722_v45 = vld [vmem:[%s8743_s22 + $0xcb0] sm:$0xff] }
 0x1c3   : > { %v7932_v58 = vpack.c.bf16 %v881_v46, %v722_v45  ;;  %v733_v45 = vld [vmem:[%s8743_s22 + $0xd08] sm:$0xff]  ;;  %v892_v46 = vld [vmem:[%s8743_s22 + $0x1200] sm:$0xff] }
 0x1c5   : > { %7901 = vmatpush1.bf16.xpose.msra.mxu0 %v7900_v49  ;;  %v883_v49 = vld [vmem:[%s8743_s22 + $0x11b8] sm:$0xff] }
 0x1c6   : > { %7909 = vmatpush1.bf16.xpose.msra.mxu1 %v7908_v52  ;;  %7911 = vmatprep.subr.bf16.mxu0 %v7910_v53  ;;  %v7940_v61 = vpack.c.bf16 %v883_v49, %v724_v47  ;;  %v1414_v47 = vrot.slane %v1400_v37, %v8770_v28  ;;  %v423_v37 = vld [vmem:[%s8743_s22 + $0x358] sm:$0xff] }
 0x1c7   : > { %7919 = vmatprep.subr.bf16.mxu1 %v7918_v54 }
 0x1cc   : > { %4695 = vmatmul.mubr.f32.vlgmr.msra.gmra.mrb[40].mxu0 %v1339_v25  ;;  %v7926_v25 = vpack.c.bf16 %v564_v14, %v405_v13  ;;  %v7954_v14 = vpack.c.bf16 %v888_v9, %v729_v8 }
 0x1cd   : > { %7913 = vmatpush1.bf16.xpose.msra.mxu0 %v7912_v2  ;;  %4765 = vmatmul.mubr.f32.vlgmr.msra.gmra.mrb[40].mxu1 %v1346_v29  ;;  %v404_v29 = vld [vmem:[%s8743_s22 + $0x2c0] sm:$0xff]  ;;  %v567_v2 = vld [vmem:[%s8743_s22 + $0x7d8] sm:$0xff] }
 0x1ce   : > { %7921 = vmatpush1.bf16.xpose.msra.mxu1 %v7920_v3  ;;  %7915 = vmatprep.subr.bf16.mxu0 %v7914_v4  ;;  %v7928_v39 = vpack.c.bf16 %v563_v30, %v404_v29  ;;  %v410_v3 = vld [vmem:[%s8743_s22 + $0x2f0] sm:$0xff]  ;;  %v569_v4 = vld [vmem:[%s8743_s22 + $0x7e8] sm:$0xff] }
 0x1cf   : > { %v2876_v11 = vpop.f32.mrb[14].mxu0  ;;  %7923 = vmatprep.subr.bf16.mxu1 %v7922_v5  ;;  %4834 = vmatprep.mubr.f32.mxu0 %v1364_v6  ;;  %v727_v5 = vld [vmem:[%s8743_s22 + $0xcd8] sm:$0xff]  ;;  %v886_v6 = vld [vmem:[%s8743_s22 + $0x11d0] sm:$0xff]  ;;  %v7952_v12 = vpack.c.bf16 %v569_v4, %v410_v3 }
 0x1d0   : > { %v2877_v15 = vadd.f32 %v2876_v11, %v2807_v51  ;;  %v2878_v16 = vpop.f32.mrb[15].mxu0  ;;  %v2946_v17 = vpop.f32.mrb[14].mxu1  ;;  %4904 = vmatprep.mubr.f32.mxu1 %v1365_v7  ;;  %v568_v51 = vld [vmem:[%s8743_s22 + $0x7e0] sm:$0xff]  ;;  %v1390_v7 = vrot.slane %v299_v59, %v8770_v28  ;;  %v7946_v13 = vpack.c.bf16 %v886_v6, %v727_v5  ;;  %v574_v29 = vld [vmem:[%s8743_s22 + $0x810] sm:$0xff]  ;;  %v417_v59 = vld [vmem:[%s8743_s22 + $0x328] sm:$0xff] }
 0x1d1   : > { %v2948_v20 = vpop.f32.mrb[15].mxu1  ;;  %v1399_v16 = vcombine.high %v1397_v10, %v1397_v10  ;;  %v7966_v36 = vpack.c.bf16 %v574_v29, %v415_v27  ;;  %v301_v4 = vld [vmem:[%s8736_s12 + $0xc8] sm:$0xff]  ;;  %v736_v29 = vld [vmem:[%s8743_s22 + $0xd20] sm:$0xff] }
 0x1d2   : > { %v2947_v23 = vadd.f32 %v2946_v17, %v2877_v15  ;;  %v1398_v15 = vcombine.high %v1390_v7, %v1390_v7  ;;  %v726_v17 = vld [vmem:[%s8743_s22 + $0xcd0] sm:$0xff]  ;;  %v1417_v9 = vcombine.high %v301_v4, %v301_v4  ;;  %v893_v27 = vld [vmem:[%s8743_s22 + $0x1208] sm:$0xff] }
 0x1d3   : > { %v7948_v31 = vpack.c.bf16 %v885_v18, %v726_v17  ;;  %v737_v17 = vld [vmem:[%s8743_s22 + $0xd28] sm:$0xff]  ;;  %v896_v18 = vld [vmem:[%s8743_s22 + $0x1220] sm:$0xff] }
 0x1d5   : > { %7917 = vmatpush1.bf16.xpose.msra.mxu0 %v7916_v21  ;;  %v887_v21 = vld [vmem:[%s8743_s22 + $0x11d8] sm:$0xff] }
 0x1d6   : > { %7925 = vmatpush1.bf16.xpose.msra.mxu1 %v7924_v24  ;;  %7927 = vmatprep.subr.bf16.mxu0 %v7926_v25  ;;  %v7956_v34 = vpack.c.bf16 %v887_v21, %v728_v19  ;;  %v1431_v19 = vrot.slane %v1417_v9, %v8770_v28  ;;  %v427_v9 = vld [vmem:[%s8743_s22 + $0x378] sm:$0xff] }
 0x1d7   : > { %7935 = vmatprep.subr.bf16.mxu1 %v7934_v26 }
 0x1dc   : > { %4835 = vmatmul.mubr.f32.vlgmr.msra.gmra.mrb[42].mxu0 %v1356_v62  ;;  %v7942_v62 = vpack.c.bf16 %v568_v51, %v409_v50  ;;  %v7970_v51 = vpack.c.bf16 %v892_v46, %v733_v45 }
 0x1dd   : > { %7929 = vmatpush1.bf16.xpose.msra.mxu0 %v7928_v39  ;;  %4905 = vmatmul.mubr.f32.vlgmr.msra.gmra.mrb[42].mxu1 %v1363_v1  ;;  %v408_v1 = vld [vmem:[%s8743_s22 + $0x2e0] sm:$0xff]  ;;  %v571_v39 = vld [vmem:[%s8743_s22 + $0x7f8] sm:$0xff] }
 0x1de   : > { %7937 = vmatpush1.bf16.xpose.msra.mxu1 %v7936_v40  ;;  %7931 = vmatprep.subr.bf16.mxu0 %v7930_v41  ;;  %v7944_v11 = vpack.c.bf16 %v567_v2, %v408_v1  ;;  %v414_v40 = vld [vmem:[%s8743_s22 + $0x310] sm:$0xff]  ;;  %v573_v41 = vld [vmem:[%s8743_s22 + $0x808] sm:$0xff] }
 0x1df   : > { %v3016_v48 = vpop.f32.mrb[16].mxu0  ;;  %7939 = vmatprep.subr.bf16.mxu1 %v7938_v42  ;;  %4974 = vmatprep.mubr.f32.mxu0 %v1381_v43  ;;  %v731_v42 = vld [vmem:[%s8743_s22 + $0xcf8] sm:$0xff]  ;;  %v890_v43 = vld [vmem:[%s8743_s22 + $0x11f0] sm:$0xff]  ;;  %v7968_v49 = vpack.c.bf16 %v573_v41, %v414_v40 }
 0x1e0   : > { %v3017_v52 = vadd.f32 %v3016_v48, %v2947_v23  ;;  %v3018_v53 = vpop.f32.mrb[17].mxu0  ;;  %v3086_v54 = vpop.f32.mrb[16].mxu1  ;;  %5044 = vmatprep.mubr.f32.mxu1 %v1382_v44  ;;  %v572_v23 = vld [vmem:[%s8743_s22 + $0x800] sm:$0xff]  ;;  %v1407_v44 = vrot.slane %v300_v32, %v8770_v28  ;;  %v7962_v50 = vpack.c.bf16 %v890_v43, %v731_v42  ;;  %v578_v1 = vld [vmem:[%s8743_s22 + $0x830] sm:$0xff]  ;;  %v421_v32 = vld [vmem:[%s8743_s22 + $0x348] sm:$0xff] }
 0x1e1   : > { %v3088_v57 = vpop.f32.mrb[17].mxu1  ;;  %v1416_v53 = vcombine.high %v1414_v47, %v1414_v47  ;;  %v7982_v8 = vpack.c.bf16 %v578_v1, %v419_v0  ;;  %v302_v41 = vld [vmem:[%s8736_s12 + $0xd0] sm:$0xff]  ;;  %v897_v0 = vld [vmem:[%s8743_s22 + $0x1228] sm:$0xff]  ;;  %v740_v1 = vld [vmem:[%s8743_s22 + $0xd40] sm:$0xff] }
 0x1e2   : > { %v3087_v60 = vadd.f32 %v3086_v54, %v3017_v52  ;;  %v1415_v52 = vcombine.high %v1407_v44, %v1407_v44  ;;  %v730_v54 = vld [vmem:[%s8743_s22 + $0xcf0] sm:$0xff]  ;;  %v1434_v46 = vcombine.high %v302_v41, %v302_v41 }
 0x1e3   : > { %v7964_v3 = vpack.c.bf16 %v889_v55, %v730_v54  ;;  %v741_v54 = vld [vmem:[%s8743_s22 + $0xd48] sm:$0xff]  ;;  %v900_v55 = vld [vmem:[%s8743_s22 + $0x1240] sm:$0xff] }
 0x1e5   : > { %7933 = vmatpush1.bf16.xpose.msra.mxu0 %v7932_v58  ;;  %v891_v58 = vld [vmem:[%s8743_s22 + $0x11f8] sm:$0xff] }
 0x1e6   : > { %7941 = vmatpush1.bf16.xpose.msra.mxu1 %v7940_v61  ;;  %7943 = vmatprep.subr.bf16.mxu0 %v7942_v62  ;;  %v7972_v6 = vpack.c.bf16 %v891_v58, %v732_v56  ;;  %v1448_v56 = vrot.slane %v1434_v46, %v8770_v28  ;;  %v431_v46 = vld [vmem:[%s8743_s22 + $0x398] sm:$0xff] }
 0x1e7   : > { %7951 = vmatprep.subr.bf16.mxu1 %v7950_v63 }
 0x1ec   : > { %4975 = vmatmul.mubr.f32.vlgmr.msra.gmra.mrb[44].mxu0 %v1373_v35  ;;  %v7958_v35 = vpack.c.bf16 %v572_v23, %v413_v22  ;;  %v7986_v23 = vpack.c.bf16 %v896_v18, %v737_v17 }
 0x1ed   : > { %7945 = vmatpush1.bf16.xpose.msra.mxu0 %v7944_v11  ;;  %5045 = vmatmul.mubr.f32.vlgmr.msra.gmra.mrb[44].mxu1 %v1380_v38  ;;  %v412_v38 = vld [vmem:[%s8743_s22 + $0x300] sm:$0xff]  ;;  %v575_v11 = vld [vmem:[%s8743_s22 + $0x818] sm:$0xff] }
 0x1ee   : > { %7953 = vmatpush1.bf16.xpose.msra.mxu1 %v7952_v12  ;;  %7947 = vmatprep.subr.bf16.mxu0 %v7946_v13  ;;  %v7960_v48 = vpack.c.bf16 %v571_v39, %v412_v38  ;;  %v418_v12 = vld [vmem:[%s8743_s22 + $0x330] sm:$0xff]  ;;  %v577_v13 = vld [vmem:[%s8743_s22 + $0x828] sm:$0xff] }
 0x1ef   : > { %v3156_v20 = vpop.f32.mrb[18].mxu0  ;;  %7955 = vmatprep.subr.bf16.mxu1 %v7954_v14  ;;  %5114 = vmatprep.mubr.f32.mxu0 %v1398_v15  ;;  %v735_v14 = vld [vmem:[%s8743_s22 + $0xd18] sm:$0xff]  ;;  %v894_v15 = vld [vmem:[%s8743_s22 + $0x1210] sm:$0xff]  ;;  %v7984_v21 = vpack.c.bf16 %v577_v13, %v418_v12 }
 0x1f0   : > { %v3157_v24 = vadd.f32 %v3156_v20, %v3087_v60  ;;  %v3158_v25 = vpop.f32.mrb[19].mxu0  ;;  %v3226_v26 = vpop.f32.mrb[18].mxu1  ;;  %5184 = vmatprep.mubr.f32.mxu1 %v1399_v16  ;;  %v576_v60 = vld [vmem:[%s8743_s22 + $0x820] sm:$0xff]  ;;  %v1424_v16 = vrot.slane %v301_v4, %v8770_v28  ;;  %v7978_v22 = vpack.c.bf16 %v894_v15, %v735_v14  ;;  %v582_v38 = vld [vmem:[%s8743_s22 + $0x850] sm:$0xff]  ;;  %v425_v4 = vld [vmem:[%s8743_s22 + $0x368] sm:$0xff] }
 0x1f1   : > { %v3228_v30 = vpop.f32.mrb[19].mxu1  ;;  %v1433_v25 = vcombine.high %v1431_v19, %v1431_v19  ;;  %v7998_v45 = vpack.c.bf16 %v582_v38, %v423_v37  ;;  %v303_v13 = vld [vmem:[%s8736_s12 + $0xd8] sm:$0xff]  ;;  %v901_v37 = vld [vmem:[%s8743_s22 + $0x1248] sm:$0xff] }
 0x1f2   : > { %v3227_v33 = vadd.f32 %v3226_v26, %v3157_v24  ;;  %v1432_v24 = vcombine.high %v1424_v16, %v1424_v16  ;;  %v734_v26 = vld [vmem:[%s8743_s22 + $0xd10] sm:$0xff]  ;;  %v1451_v18 = vcombine.high %v303_v13, %v303_v13  ;;  %v744_v38 = vld [vmem:[%s8743_s22 + $0xd60] sm:$0xff] }
 0x1f3   : > { %v7980_v40 = vpack.c.bf16 %v893_v27, %v734_v26  ;;  %v745_v26 = vld [vmem:[%s8743_s22 + $0xd68] sm:$0xff]  ;;  %v904_v27 = vld [vmem:[%s8743_s22 + $0x1260] sm:$0xff] }
 0x1f5   : > { %7949 = vmatpush1.bf16.xpose.msra.mxu0 %v7948_v31  ;;  %v895_v31 = vld [vmem:[%s8743_s22 + $0x1218] sm:$0xff] }
 0x1f6   : > { %7957 = vmatpush1.bf16.xpose.msra.mxu1 %v7956_v34  ;;  %7959 = vmatprep.subr.bf16.mxu0 %v7958_v35  ;;  %v7988_v43 = vpack.c.bf16 %v895_v31, %v736_v29  ;;  %v1465_v29 = vrot.slane %v1451_v18, %v8770_v28  ;;  %v435_v18 = vld [vmem:[%s8743_s22 + $0x3b8] sm:$0xff] }
 0x1f7   : > { %7967 = vmatprep.subr.bf16.mxu1 %v7966_v36 }
 0x1fc   : > { %5115 = vmatmul.mubr.f32.vlgmr.msra.gmra.mrb[46].mxu0 %v1390_v7  ;;  %v7974_v7 = vpack.c.bf16 %v576_v60, %v417_v59  ;;  %v8002_v60 = vpack.c.bf16 %v900_v55, %v741_v54 }
 0x1fd   : > { %7961 = vmatpush1.bf16.xpose.msra.mxu0 %v7960_v48  ;;  %5185 = vmatmul.mubr.f32.vlgmr.msra.gmra.mrb[46].mxu1 %v1397_v10  ;;  %v416_v10 = vld [vmem:[%s8743_s22 + $0x320] sm:$0xff]  ;;  %v579_v48 = vld [vmem:[%s8743_s22 + $0x838] sm:$0xff] }
 0x1fe   : > { %7969 = vmatpush1.bf16.xpose.msra.mxu1 %v7968_v49  ;;  %7963 = vmatprep.subr.bf16.mxu0 %v7962_v50  ;;  %v7976_v20 = vpack.c.bf16 %v575_v11, %v416_v10  ;;  %v422_v49 = vld [vmem:[%s8743_s22 + $0x350] sm:$0xff]  ;;  %v581_v50 = vld [vmem:[%s8743_s22 + $0x848] sm:$0xff] }
 0x1ff   : > { %v3296_v57 = vpop.f32.mrb[20].mxu0  ;;  %7971 = vmatprep.subr.bf16.mxu1 %v7970_v51  ;;  %5254 = vmatprep.mubr.f32.mxu0 %v1415_v52  ;;  %v739_v51 = vld [vmem:[%s8743_s22 + $0xd38] sm:$0xff]  ;;  %v898_v52 = vld [vmem:[%s8743_s22 + $0x1230] sm:$0xff]  ;;  %v8000_v58 = vpack.c.bf16 %v581_v50, %v422_v49  ;;  %v304_v50 = vld [vmem:[%s8736_s12 + $0xe0] sm:$0xff] }
 0x200   : > { %v3297_v61 = vadd.f32 %v3296_v57, %v3227_v33  ;;  %v3298_v62 = vpop.f32.mrb[21].mxu0  ;;  %v3366_v63 = vpop.f32.mrb[20].mxu1  ;;  %5324 = vmatprep.mubr.f32.mxu1 %v1416_v53  ;;  %v580_v33 = vld [vmem:[%s8743_s22 + $0x840] sm:$0xff]  ;;  %v1441_v53 = vrot.slane %v302_v41, %v8770_v28  ;;  %v7994_v59 = vpack.c.bf16 %v898_v52, %v739_v51  ;;  %v586_v10 = vld [vmem:[%s8743_s22 + $0x870] sm:$0xff]  ;;  %v429_v41 = vld [vmem:[%s8743_s22 + $0x388] sm:$0xff]  ;;  %v1468_v55 = vcombine.high %v304_v50, %v304_v50 }
 0x201   : > { %v3368_v2 = vpop.f32.mrb[21].mxu1  ;;  %v1450_v62 = vcombine.high %v1448_v56, %v1448_v56  ;;  %v8014_v17 = vpack.c.bf16 %v586_v10, %v427_v9  ;;  %v905_v9 = vld [vmem:[%s8743_s22 + $0x1268] sm:$0xff]  ;;  %v748_v10 = vld [vmem:[%s8743_s22 + $0xd80] sm:$0xff] }
 0x202   : > { %v3367_v5 = vadd.f32 %v3366_v63, %v3297_v61  ;;  %v1449_v61 = vcombine.high %v1441_v53, %v1441_v53  ;;  %v738_v63 = vld [vmem:[%s8743_s22 + $0xd30] sm:$0xff] }
 0x203   : > { %v7996_v12 = vpack.c.bf16 %v897_v0, %v738_v63  ;;  %v749_v63 = vld [vmem:[%s8743_s22 + $0xd88] sm:$0xff]  ;;  %v908_v0 = vld [vmem:[%s8743_s22 + $0x1280] sm:$0xff] }
 0x205   : > { %7965 = vmatpush1.bf16.xpose.msra.mxu0 %v7964_v3  ;;  %v899_v3 = vld [vmem:[%s8743_s22 + $0x1238] sm:$0xff] }
 0x206   : > { %7973 = vmatpush1.bf16.xpose.msra.mxu1 %v7972_v6  ;;  %7975 = vmatprep.subr.bf16.mxu0 %v7974_v7  ;;  %v8004_v15 = vpack.c.bf16 %v899_v3, %v740_v1  ;;  %v1482_v1 = vrot.slane %v1468_v55, %v8770_v28  ;;  %v439_v55 = vld [vmem:[%s8743_s22 + $0x3d8] sm:$0xff] }
 0x207   : > { %7983 = vmatprep.subr.bf16.mxu1 %v7982_v8 }
 0x20c   : > { %5255 = vmatmul.mubr.f32.vlgmr.msra.gmra.mrb[48].mxu0 %v1407_v44  ;;  %v7990_v44 = vpack.c.bf16 %v580_v33, %v421_v32  ;;  %v8018_v33 = vpack.c.bf16 %v904_v27, %v745_v26 }
 0x20d   : > { %7977 = vmatpush1.bf16.xpose.msra.mxu0 %v7976_v20  ;;  %5325 = vmatmul.mubr.f32.vlgmr.msra.gmra.mrb[48].mxu1 %v1414_v47  ;;  %v420_v47 = vld [vmem:[%s8743_s22 + $0x340] sm:$0xff]  ;;  %v583_v20 = vld [vmem:[%s8743_s22 + $0x858] sm:$0xff] }
 0x20e   : > { %7985 = vmatpush1.bf16.xpose.msra.mxu1 %v7984_v21  ;;  %7979 = vmatprep.subr.bf16.mxu0 %v7978_v22  ;;  %v7992_v57 = vpack.c.bf16 %v579_v48, %v420_v47  ;;  %v426_v21 = vld [vmem:[%s8743_s22 + $0x370] sm:$0xff]  ;;  %v585_v22 = vld [vmem:[%s8743_s22 + $0x868] sm:$0xff] }
 0x20f   : > { %v3436_v30 = vpop.f32.mrb[22].mxu0  ;;  %7987 = vmatprep.subr.bf16.mxu1 %v7986_v23  ;;  %5394 = vmatprep.mubr.f32.mxu0 %v1432_v24  ;;  %v743_v23 = vld [vmem:[%s8743_s22 + $0xd58] sm:$0xff]  ;;  %v902_v24 = vld [vmem:[%s8743_s22 + $0x1250] sm:$0xff]  ;;  %v8016_v31 = vpack.c.bf16 %v585_v22, %v426_v21 }
 0x210   : > { %v3437_v34 = vadd.f32 %v3436_v30, %v3367_v5  ;;  %v3438_v35 = vpop.f32.mrb[23].mxu0  ;;  %v3506_v36 = vpop.f32.mrb[22].mxu1  ;;  %5464 = vmatprep.mubr.f32.mxu1 %v1433_v25  ;;  %v584_v5 = vld [vmem:[%s8743_s22 + $0x860] sm:$0xff]  ;;  %v1458_v25 = vrot.slane %v303_v13, %v8770_v28  ;;  %v8010_v32 = vpack.c.bf16 %v902_v24, %v743_v23  ;;  %v590_v47 = vld [vmem:[%s8743_s22 + $0x890] sm:$0xff]  ;;  %v433_v13 = vld [vmem:[%s8743_s22 + $0x3a8] sm:$0xff] }
 0x211   : > { %v3508_v39 = vpop.f32.mrb[23].mxu1  ;;  %v1467_v35 = vcombine.high %v1465_v29, %v1465_v29  ;;  %v8030_v54 = vpack.c.bf16 %v590_v47, %v431_v46  ;;  %v305_v22 = vld [vmem:[%s8736_s12 + $0xe8] sm:$0xff]  ;;  %v752_v47 = vld [vmem:[%s8743_s22 + $0xda0] sm:$0xff] }
 0x212   : > { %v3507_v42 = vadd.f32 %v3506_v36, %v3437_v34  ;;  %v1466_v34 = vcombine.high %v1458_v25, %v1458_v25  ;;  %v742_v36 = vld [vmem:[%s8743_s22 + $0xd50] sm:$0xff]  ;;  %v1485_v27 = vcombine.high %v305_v22, %v305_v22  ;;  %v909_v46 = vld [vmem:[%s8743_s22 + $0x1288] sm:$0xff] }
 0x213   : > { %v8012_v49 = vpack.c.bf16 %v901_v37, %v742_v36  ;;  %v753_v36 = vld [vmem:[%s8743_s22 + $0xda8] sm:$0xff]  ;;  %v912_v37 = vld [vmem:[%s8743_s22 + $0x12a0] sm:$0xff] }
 0x215   : > { %7981 = vmatpush1.bf16.xpose.msra.mxu0 %v7980_v40  ;;  %v903_v40 = vld [vmem:[%s8743_s22 + $0x1258] sm:$0xff] }
 0x216   : > { %7989 = vmatpush1.bf16.xpose.msra.mxu1 %v7988_v43  ;;  %7991 = vmatprep.subr.bf16.mxu0 %v7990_v44  ;;  %v8020_v52 = vpack.c.bf16 %v903_v40, %v744_v38  ;;  %v1499_v38 = vrot.slane %v1485_v27, %v8770_v28  ;;  %v443_v27 = vld [vmem:[%s8743_s22 + $0x3f8] sm:$0xff] }
 0x217   : > { %7999 = vmatprep.subr.bf16.mxu1 %v7998_v45 }
 0x21c   : > { %5395 = vmatmul.mubr.f32.vlgmr.msra.gmra.mrb[50].mxu0 %v1424_v16  ;;  %v8006_v16 = vpack.c.bf16 %v584_v5, %v425_v4  ;;  %v8034_v5 = vpack.c.bf16 %v908_v0, %v749_v63 }
 0x21d   : > { %7993 = vmatpush1.bf16.xpose.msra.mxu0 %v7992_v57  ;;  %5465 = vmatmul.mubr.f32.vlgmr.msra.gmra.mrb[50].mxu1 %v1431_v19  ;;  %v424_v19 = vld [vmem:[%s8743_s22 + $0x360] sm:$0xff]  ;;  %v587_v57 = vld [vmem:[%s8743_s22 + $0x878] sm:$0xff] }
 0x21e   : > { %8001 = vmatpush1.bf16.xpose.msra.mxu1 %v8000_v58  ;;  %7995 = vmatprep.subr.bf16.mxu0 %v7994_v59  ;;  %v8008_v30 = vpack.c.bf16 %v583_v20, %v424_v19  ;;  %v430_v58 = vld [vmem:[%s8743_s22 + $0x390] sm:$0xff]  ;;  %v589_v59 = vld [vmem:[%s8743_s22 + $0x888] sm:$0xff] }
 0x21f   : > { %v3576_v2 = vpop.f32.mrb[24].mxu0  ;;  %8003 = vmatprep.subr.bf16.mxu1 %v8002_v60  ;;  %5534 = vmatprep.mubr.f32.mxu0 %v1449_v61  ;;  %v747_v60 = vld [vmem:[%s8743_s22 + $0xd78] sm:$0xff]  ;;  %v906_v61 = vld [vmem:[%s8743_s22 + $0x1270] sm:$0xff]  ;;  %v8032_v3 = vpack.c.bf16 %v589_v59, %v430_v58 }
 0x220   : > { %v3577_v6 = vadd.f32 %v3576_v2, %v3507_v42  ;;  %v3578_v7 = vpop.f32.mrb[25].mxu0  ;;  %v3646_v8 = vpop.f32.mrb[24].mxu1  ;;  %5604 = vmatprep.mubr.f32.mxu1 %v1450_v62  ;;  %v588_v42 = vld [vmem:[%s8743_s22 + $0x880] sm:$0xff]  ;;  %v1475_v62 = vrot.slane %v304_v50, %v8770_v28  ;;  %v8026_v4 = vpack.c.bf16 %v906_v61, %v747_v60  ;;  %v594_v19 = vld [vmem:[%s8743_s22 + $0x8b0] sm:$0xff]  ;;  %v437_v50 = vld [vmem:[%s8743_s22 + $0x3c8] sm:$0xff] }
 0x221   : > { %v3648_v11 = vpop.f32.mrb[25].mxu1  ;;  %v1484_v7 = vcombine.high %v1482_v1, %v1482_v1  ;;  %v8046_v26 = vpack.c.bf16 %v594_v19, %v435_v18  ;;  %v306_v59 = vld [vmem:[%s8736_s12 + $0xf0] sm:$0xff]  ;;  %v913_v18 = vld [vmem:[%s8743_s22 + $0x12a8] sm:$0xff]  ;;  %v756_v19 = vld [vmem:[%s8743_s22 + $0xdc0] sm:$0xff] }
 0x222   : > { %v3647_v14 = vadd.f32 %v3646_v8, %v3577_v6  ;;  %v1483_v6 = vcombine.high %v1475_v62, %v1475_v62  ;;  %v746_v8 = vld [vmem:[%s8743_s22 + $0xd70] sm:$0xff]  ;;  %v1502_v0 = vcombine.high %v306_v59, %v306_v59 }
 0x223   : > { %v8028_v21 = vpack.c.bf16 %v905_v9, %v746_v8  ;;  %v757_v8 = vld [vmem:[%s8743_s22 + $0xdc8] sm:$0xff]  ;;  %v916_v9 = vld [vmem:[%s8743_s22 + $0x12c0] sm:$0xff] }
 0x225   : > { %7997 = vmatpush1.bf16.xpose.msra.mxu0 %v7996_v12  ;;  %v907_v12 = vld [vmem:[%s8743_s22 + $0x1278] sm:$0xff] }
 0x226   : > { %8005 = vmatpush1.bf16.xpose.msra.mxu1 %v8004_v15  ;;  %8007 = vmatprep.subr.bf16.mxu0 %v8006_v16  ;;  %v8036_v24 = vpack.c.bf16 %v907_v12, %v748_v10  ;;  %v1516_v10 = vrot.slane %v1502_v0, %v8770_v28  ;;  %v447_v0 = vld [vmem:[%s8743_s22 + $0x418] sm:$0xff] }
 0x227   : > { %8015 = vmatprep.subr.bf16.mxu1 %v8014_v17 }
 0x22c   : > { %5535 = vmatmul.mubr.f32.vlgmr.msra.gmra.mrb[52].mxu0 %v1441_v53  ;;  %v8022_v53 = vpack.c.bf16 %v588_v42, %v429_v41  ;;  %v8050_v42 = vpack.c.bf16 %v912_v37, %v753_v36 }
 0x22d   : > { %8009 = vmatpush1.bf16.xpose.msra.mxu0 %v8008_v30  ;;  %5605 = vmatmul.mubr.f32.vlgmr.msra.gmra.mrb[52].mxu1 %v1448_v56  ;;  %v428_v56 = vld [vmem:[%s8743_s22 + $0x380] sm:$0xff]  ;;  %v591_v30 = vld [vmem:[%s8743_s22 + $0x898] sm:$0xff] }
 0x22e   : > { %8017 = vmatpush1.bf16.xpose.msra.mxu1 %v8016_v31  ;;  %8011 = vmatprep.subr.bf16.mxu0 %v8010_v32  ;;  %v8024_v2 = vpack.c.bf16 %v587_v57, %v428_v56  ;;  %v434_v31 = vld [vmem:[%s8743_s22 + $0x3b0] sm:$0xff]  ;;  %v593_v32 = vld [vmem:[%s8743_s22 + $0x8a8] sm:$0xff] }
 0x22f   : > { %v3716_v39 = vpop.f32.mrb[26].mxu0  ;;  %8019 = vmatprep.subr.bf16.mxu1 %v8018_v33  ;;  %5674 = vmatprep.mubr.f32.mxu0 %v1466_v34  ;;  %v751_v33 = vld [vmem:[%s8743_s22 + $0xd98] sm:$0xff]  ;;  %v910_v34 = vld [vmem:[%s8743_s22 + $0x1290] sm:$0xff]  ;;  %v8048_v40 = vpack.c.bf16 %v593_v32, %v434_v31 }
 0x230   : > { %v3717_v43 = vadd.f32 %v3716_v39, %v3647_v14  ;;  %v3718_v44 = vpop.f32.mrb[27].mxu0  ;;  %v3786_v45 = vpop.f32.mrb[26].mxu1  ;;  %5744 = vmatprep.mubr.f32.mxu1 %v1467_v35  ;;  %v592_v14 = vld [vmem:[%s8743_s22 + $0x8a0] sm:$0xff]  ;;  %v1492_v35 = vrot.slane %v305_v22, %v8770_v28  ;;  %v8042_v41 = vpack.c.bf16 %v910_v34, %v751_v33  ;;  %v598_v56 = vld [vmem:[%s8743_s22 + $0x8d0] sm:$0xff]  ;;  %v441_v22 = vld [vmem:[%s8743_s22 + $0x3e8] sm:$0xff] }
 0x231   : > { %v3788_v48 = vpop.f32.mrb[27].mxu1  ;;  %v1501_v44 = vcombine.high %v1499_v38, %v1499_v38  ;;  %v8062_v63 = vpack.c.bf16 %v598_v56, %v439_v55  ;;  %v307_v32 = vld [vmem:[%s8736_s12 + $0xf8] sm:$0xff]  ;;  %v917_v55 = vld [vmem:[%s8743_s22 + $0x12c8] sm:$0xff] }
 0x232   : > { %v3787_v51 = vadd.f32 %v3786_v45, %v3717_v43  ;;  %v1500_v43 = vcombine.high %v1492_v35, %v1492_v35  ;;  %v750_v45 = vld [vmem:[%s8743_s22 + $0xd90] sm:$0xff]  ;;  %v1519_v37 = vcombine.high %v307_v32, %v307_v32  ;;  %v760_v56 = vld [vmem:[%s8743_s22 + $0xde0] sm:$0xff] }
 0x233   : > { %v8044_v58 = vpack.c.bf16 %v909_v46, %v750_v45  ;;  %v761_v45 = vld [vmem:[%s8743_s22 + $0xde8] sm:$0xff]  ;;  %v920_v46 = vld [vmem:[%s8743_s22 + $0x12e0] sm:$0xff] }
 0x235   : > { %8013 = vmatpush1.bf16.xpose.msra.mxu0 %v8012_v49  ;;  %v911_v49 = vld [vmem:[%s8743_s22 + $0x1298] sm:$0xff] }
 0x236   : > { %8021 = vmatpush1.bf16.xpose.msra.mxu1 %v8020_v52  ;;  %8023 = vmatprep.subr.bf16.mxu0 %v8022_v53  ;;  %v8052_v61 = vpack.c.bf16 %v911_v49, %v752_v47  ;;  %v1533_v47 = vrot.slane %v1519_v37, %v8770_v28  ;;  %v451_v37 = vld [vmem:[%s8743_s22 + $0x438] sm:$0xff] }
 0x237   : > { %8031 = vmatprep.subr.bf16.mxu1 %v8030_v54 }
 0x23c   : > { %5675 = vmatmul.mubr.f32.vlgmr.msra.gmra.mrb[54].mxu0 %v1458_v25  ;;  %v8038_v25 = vpack.c.bf16 %v592_v14, %v433_v13  ;;  %v8066_v14 = vpack.c.bf16 %v916_v9, %v757_v8 }
 0x23d   : > { %8025 = vmatpush1.bf16.xpose.msra.mxu0 %v8024_v2  ;;  %5745 = vmatmul.mubr.f32.vlgmr.msra.gmra.mrb[54].mxu1 %v1465_v29  ;;  %v432_v29 = vld [vmem:[%s8743_s22 + $0x3a0] sm:$0xff]  ;;  %v595_v2 = vld [vmem:[%s8743_s22 + $0x8b8] sm:$0xff] }
 0x23e   : > { %8033 = vmatpush1.bf16.xpose.msra.mxu1 %v8032_v3  ;;  %8027 = vmatprep.subr.bf16.mxu0 %v8026_v4  ;;  %v8040_v39 = vpack.c.bf16 %v591_v30, %v432_v29  ;;  %v438_v3 = vld [vmem:[%s8743_s22 + $0x3d0] sm:$0xff]  ;;  %v597_v4 = vld [vmem:[%s8743_s22 + $0x8c8] sm:$0xff] }
 0x23f   : > { %v3856_v11 = vpop.f32.mrb[28].mxu0  ;;  %8035 = vmatprep.subr.bf16.mxu1 %v8034_v5  ;;  %5814 = vmatprep.mubr.f32.mxu0 %v1483_v6  ;;  %v755_v5 = vld [vmem:[%s8743_s22 + $0xdb8] sm:$0xff]  ;;  %v914_v6 = vld [vmem:[%s8743_s22 + $0x12b0] sm:$0xff]  ;;  %v8064_v12 = vpack.c.bf16 %v597_v4, %v438_v3  ;;  %v308_v4 = vld [vmem:[%s8736_s12 + $0x100] sm:$0xff] }
 0x240   : > { %v3857_v15 = vadd.f32 %v3856_v11, %v3787_v51  ;;  %v3858_v16 = vpop.f32.mrb[29].mxu0  ;;  %v3926_v17 = vpop.f32.mrb[28].mxu1  ;;  %5884 = vmatprep.mubr.f32.mxu1 %v1484_v7  ;;  %v596_v51 = vld [vmem:[%s8743_s22 + $0x8c0] sm:$0xff]  ;;  %v1509_v7 = vrot.slane %v306_v59, %v8770_v28  ;;  %v8058_v13 = vpack.c.bf16 %v914_v6, %v755_v5  ;;  %v602_v29 = vld [vmem:[%s8743_s22 + $0x8f0] sm:$0xff]  ;;  %v445_v59 = vld [vmem:[%s8743_s22 + $0x408] sm:$0xff]  ;;  %v1536_v9 = vcombine.high %v308_v4, %v308_v4 }
 0x241   : > { %v3928_v20 = vpop.f32.mrb[29].mxu1  ;;  %v1518_v16 = vcombine.high %v1516_v10, %v1516_v10  ;;  %v8078_v36 = vpack.c.bf16 %v602_v29, %v443_v27  ;;  %v921_v27 = vld [vmem:[%s8743_s22 + $0x12e8] sm:$0xff]  ;;  %v764_v29 = vld [vmem:[%s8743_s22 + $0xe00] sm:$0xff] }
 0x242   : > { %v3927_v23 = vadd.f32 %v3926_v17, %v3857_v15  ;;  %v1517_v15 = vcombine.high %v1509_v7, %v1509_v7  ;;  %v754_v17 = vld [vmem:[%s8743_s22 + $0xdb0] sm:$0xff] }
 0x243   : > { %v8060_v31 = vpack.c.bf16 %v913_v18, %v754_v17  ;;  %v765_v17 = vld [vmem:[%s8743_s22 + $0xe08] sm:$0xff]  ;;  %v924_v18 = vld [vmem:[%s8743_s22 + $0x1300] sm:$0xff] }
 0x245   : > { %8029 = vmatpush1.bf16.xpose.msra.mxu0 %v8028_v21  ;;  %v915_v21 = vld [vmem:[%s8743_s22 + $0x12b8] sm:$0xff] }
 0x246   : > { %8037 = vmatpush1.bf16.xpose.msra.mxu1 %v8036_v24  ;;  %8039 = vmatprep.subr.bf16.mxu0 %v8038_v25  ;;  %v8068_v34 = vpack.c.bf16 %v915_v21, %v756_v19  ;;  %v1550_v19 = vrot.slane %v1536_v9, %v8770_v28  ;;  %v455_v9 = vld [vmem:[%s8743_s22 + $0x458] sm:$0xff] }
 0x247   : > { %8047 = vmatprep.subr.bf16.mxu1 %v8046_v26 }
 0x24c   : > { %5815 = vmatmul.mubr.f32.vlgmr.msra.gmra.mrb[56].mxu0 %v1475_v62  ;;  %v8054_v62 = vpack.c.bf16 %v596_v51, %v437_v50  ;;  %v8082_v51 = vpack.c.bf16 %v920_v46, %v761_v45 }
 0x24d   : > { %8041 = vmatpush1.bf16.xpose.msra.mxu0 %v8040_v39  ;;  %5885 = vmatmul.mubr.f32.vlgmr.msra.gmra.mrb[56].mxu1 %v1482_v1  ;;  %v436_v1 = vld [vmem:[%s8743_s22 + $0x3c0] sm:$0xff]  ;;  %v599_v39 = vld [vmem:[%s8743_s22 + $0x8d8] sm:$0xff] }
 0x24e   : > { %8049 = vmatpush1.bf16.xpose.msra.mxu1 %v8048_v40  ;;  %8043 = vmatprep.subr.bf16.mxu0 %v8042_v41  ;;  %v8056_v11 = vpack.c.bf16 %v595_v2, %v436_v1  ;;  %v442_v40 = vld [vmem:[%s8743_s22 + $0x3f0] sm:$0xff]  ;;  %v601_v41 = vld [vmem:[%s8743_s22 + $0x8e8] sm:$0xff] }
 0x24f   : > { %v3996_v48 = vpop.f32.mrb[30].mxu0  ;;  %8051 = vmatprep.subr.bf16.mxu1 %v8050_v42  ;;  %5954 = vmatprep.mubr.f32.mxu0 %v1500_v43  ;;  %v759_v42 = vld [vmem:[%s8743_s22 + $0xdd8] sm:$0xff]  ;;  %v918_v43 = vld [vmem:[%s8743_s22 + $0x12d0] sm:$0xff]  ;;  %v8080_v49 = vpack.c.bf16 %v601_v41, %v442_v40 }
 0x250   : > { %v3997_v52 = vadd.f32 %v3996_v48, %v3927_v23  ;;  %v3998_v53 = vpop.f32.mrb[31].mxu0  ;;  %v4066_v54 = vpop.f32.mrb[30].mxu1  ;;  %6024 = vmatprep.mubr.f32.mxu1 %v1501_v44  ;;  %v600_v23 = vld [vmem:[%s8743_s22 + $0x8e0] sm:$0xff]  ;;  %v1526_v44 = vrot.slane %v307_v32, %v8770_v28  ;;  %v8074_v50 = vpack.c.bf16 %v918_v43, %v759_v42  ;;  %v606_v1 = vld [vmem:[%s8743_s22 + $0x910] sm:$0xff]  ;;  %v449_v32 = vld [vmem:[%s8743_s22 + $0x428] sm:$0xff] }
 0x251   : > { %v4068_v57 = vpop.f32.mrb[31].mxu1  ;;  %v1535_v53 = vcombine.high %v1533_v47, %v1533_v47  ;;  %v8094_v8 = vpack.c.bf16 %v606_v1, %v447_v0  ;;  %v309_v41 = vld [vmem:[%s8736_s12 + $0x108] sm:$0xff]  ;;  %v768_v1 = vld [vmem:[%s8743_s22 + $0xe20] sm:$0xff] }
 0x252   : > { %v4067_v60 = vadd.f32 %v4066_v54, %v3997_v52  ;;  %v1534_v52 = vcombine.high %v1526_v44, %v1526_v44  ;;  %v758_v54 = vld [vmem:[%s8743_s22 + $0xdd0] sm:$0xff]  ;;  %v1553_v46 = vcombine.high %v309_v41, %v309_v41  ;;  %v925_v0 = vld [vmem:[%s8743_s22 + $0x1308] sm:$0xff] }
 0x253   : > { %v8076_v3 = vpack.c.bf16 %v917_v55, %v758_v54  ;;  %v769_v54 = vld [vmem:[%s8743_s22 + $0xe28] sm:$0xff]  ;;  %v928_v55 = vld [vmem:[%s8743_s22 + $0x1320] sm:$0xff] }
 0x255   : > { %8045 = vmatpush1.bf16.xpose.msra.mxu0 %v8044_v58  ;;  %v919_v58 = vld [vmem:[%s8743_s22 + $0x12d8] sm:$0xff] }
 0x256   : > { %8053 = vmatpush1.bf16.xpose.msra.mxu1 %v8052_v61  ;;  %8055 = vmatprep.subr.bf16.mxu0 %v8054_v62  ;;  %v8084_v6 = vpack.c.bf16 %v919_v58, %v760_v56  ;;  %v1567_v56 = vrot.slane %v1553_v46, %v8770_v28  ;;  %v459_v46 = vld [vmem:[%s8743_s22 + $0x478] sm:$0xff] }
 0x257   : > { %8063 = vmatprep.subr.bf16.mxu1 %v8062_v63 }
 0x25c   : > { %5955 = vmatmul.mubr.f32.vlgmr.msra.gmra.mrb[58].mxu0 %v1492_v35  ;;  %v8070_v35 = vpack.c.bf16 %v600_v23, %v441_v22  ;;  %v8098_v23 = vpack.c.bf16 %v924_v18, %v765_v17 }
 0x25d   : > { %8057 = vmatpush1.bf16.xpose.msra.mxu0 %v8056_v11  ;;  %6025 = vmatmul.mubr.f32.vlgmr.msra.gmra.mrb[58].mxu1 %v1499_v38  ;;  %v440_v38 = vld [vmem:[%s8743_s22 + $0x3e0] sm:$0xff]  ;;  %v603_v11 = vld [vmem:[%s8743_s22 + $0x8f8] sm:$0xff] }
 0x25e   : > { %8065 = vmatpush1.bf16.xpose.msra.mxu1 %v8064_v12  ;;  %8059 = vmatprep.subr.bf16.mxu0 %v8058_v13  ;;  %v8072_v48 = vpack.c.bf16 %v599_v39, %v440_v38  ;;  %v446_v12 = vld [vmem:[%s8743_s22 + $0x410] sm:$0xff]  ;;  %v605_v13 = vld [vmem:[%s8743_s22 + $0x908] sm:$0xff] }
 0x25f   : > { %v4136_v20 = vpop.f32.mrb[32].mxu0  ;;  %8067 = vmatprep.subr.bf16.mxu1 %v8066_v14  ;;  %6094 = vmatprep.mubr.f32.mxu0 %v1517_v15  ;;  %v763_v14 = vld [vmem:[%s8743_s22 + $0xdf8] sm:$0xff]  ;;  %v922_v15 = vld [vmem:[%s8743_s22 + $0x12f0] sm:$0xff]  ;;  %v8096_v21 = vpack.c.bf16 %v605_v13, %v446_v12 }
 0x260   : > { %v4137_v24 = vadd.f32 %v4136_v20, %v4067_v60  ;;  %v4138_v25 = vpop.f32.mrb[33].mxu0  ;;  %v4206_v26 = vpop.f32.mrb[32].mxu1  ;;  %6164 = vmatprep.mubr.f32.mxu1 %v1518_v16  ;;  %v604_v60 = vld [vmem:[%s8743_s22 + $0x900] sm:$0xff]  ;;  %v1543_v16 = vrot.slane %v308_v4, %v8770_v28  ;;  %v8090_v22 = vpack.c.bf16 %v922_v15, %v763_v14  ;;  %v610_v38 = vld [vmem:[%s8743_s22 + $0x930] sm:$0xff]  ;;  %v453_v4 = vld [vmem:[%s8743_s22 + $0x448] sm:$0xff] }
 0x261   : > { %v4208_v30 = vpop.f32.mrb[33].mxu1  ;;  %v1552_v25 = vcombine.high %v1550_v19, %v1550_v19  ;;  %v8110_v45 = vpack.c.bf16 %v610_v38, %v451_v37  ;;  %v310_v13 = vld [vmem:[%s8736_s12 + $0x110] sm:$0xff]  ;;  %v929_v37 = vld [vmem:[%s8743_s22 + $0x1328] sm:$0xff]  ;;  %v772_v38 = vld [vmem:[%s8743_s22 + $0xe40] sm:$0xff] }
 0x262   : > { %v4207_v33 = vadd.f32 %v4206_v26, %v4137_v24  ;;  %v1551_v24 = vcombine.high %v1543_v16, %v1543_v16  ;;  %v762_v26 = vld [vmem:[%s8743_s22 + $0xdf0] sm:$0xff]  ;;  %v1570_v18 = vcombine.high %v310_v13, %v310_v13 }
 0x263   : > { %v8092_v40 = vpack.c.bf16 %v921_v27, %v762_v26  ;;  %v773_v26 = vld [vmem:[%s8743_s22 + $0xe48] sm:$0xff]  ;;  %v932_v27 = vld [vmem:[%s8743_s22 + $0x1340] sm:$0xff] }
 0x265   : > { %8061 = vmatpush1.bf16.xpose.msra.mxu0 %v8060_v31  ;;  %v923_v31 = vld [vmem:[%s8743_s22 + $0x12f8] sm:$0xff] }
 0x266   : > { %8069 = vmatpush1.bf16.xpose.msra.mxu1 %v8068_v34  ;;  %8071 = vmatprep.subr.bf16.mxu0 %v8070_v35  ;;  %v8100_v43 = vpack.c.bf16 %v923_v31, %v764_v29  ;;  %v1584_v29 = vrot.slane %v1570_v18, %v8770_v28  ;;  %v463_v18 = vld [vmem:[%s8743_s22 + $0x498] sm:$0xff] }
 0x267   : > { %8079 = vmatprep.subr.bf16.mxu1 %v8078_v36 }
 0x26c   : > { %6095 = vmatmul.mubr.f32.vlgmr.msra.gmra.mrb[60].mxu0 %v1509_v7  ;;  %v8086_v7 = vpack.c.bf16 %v604_v60, %v445_v59  ;;  %v8114_v60 = vpack.c.bf16 %v928_v55, %v769_v54 }
 0x26d   : > { %8073 = vmatpush1.bf16.xpose.msra.mxu0 %v8072_v48  ;;  %6165 = vmatmul.mubr.f32.vlgmr.msra.gmra.mrb[60].mxu1 %v1516_v10  ;;  %v444_v10 = vld [vmem:[%s8743_s22 + $0x400] sm:$0xff]  ;;  %v607_v48 = vld [vmem:[%s8743_s22 + $0x918] sm:$0xff] }
 0x26e   : > { %8081 = vmatpush1.bf16.xpose.msra.mxu1 %v8080_v49  ;;  %8075 = vmatprep.subr.bf16.mxu0 %v8074_v50  ;;  %v8088_v20 = vpack.c.bf16 %v603_v11, %v444_v10  ;;  %v450_v49 = vld [vmem:[%s8743_s22 + $0x430] sm:$0xff]  ;;  %v609_v50 = vld [vmem:[%s8743_s22 + $0x928] sm:$0xff] }
 0x26f   : > { %v4276_v57 = vpop.f32.mrb[34].mxu0  ;;  %8083 = vmatprep.subr.bf16.mxu1 %v8082_v51  ;;  %6234 = vmatprep.mubr.f32.mxu0 %v1534_v52  ;;  %v767_v51 = vld [vmem:[%s8743_s22 + $0xe18] sm:$0xff]  ;;  %v926_v52 = vld [vmem:[%s8743_s22 + $0x1310] sm:$0xff]  ;;  %v8112_v58 = vpack.c.bf16 %v609_v50, %v450_v49 }
 0x270   : > { %v4277_v61 = vadd.f32 %v4276_v57, %v4207_v33  ;;  %v4278_v62 = vpop.f32.mrb[35].mxu0  ;;  %v4346_v63 = vpop.f32.mrb[34].mxu1  ;;  %6304 = vmatprep.mubr.f32.mxu1 %v1535_v53  ;;  %v608_v33 = vld [vmem:[%s8743_s22 + $0x920] sm:$0xff]  ;;  %v1560_v53 = vrot.slane %v309_v41, %v8770_v28  ;;  %v8106_v59 = vpack.c.bf16 %v926_v52, %v767_v51  ;;  %v614_v10 = vld [vmem:[%s8743_s22 + $0x950] sm:$0xff]  ;;  %v457_v41 = vld [vmem:[%s8743_s22 + $0x468] sm:$0xff] }
 0x271   : > { %v4348_v2 = vpop.f32.mrb[35].mxu1  ;;  %v1569_v62 = vcombine.high %v1567_v56, %v1567_v56  ;;  %v8126_v17 = vpack.c.bf16 %v614_v10, %v455_v9  ;;  %v311_v50 = vld [vmem:[%s8736_s12 + $0x118] sm:$0xff]  ;;  %v933_v9 = vld [vmem:[%s8743_s22 + $0x1348] sm:$0xff] }
 0x272   : > { %v4347_v5 = vadd.f32 %v4346_v63, %v4277_v61  ;;  %v1568_v61 = vcombine.high %v1560_v53, %v1560_v53  ;;  %v766_v63 = vld [vmem:[%s8743_s22 + $0xe10] sm:$0xff]  ;;  %v1587_v55 = vcombine.high %v311_v50, %v311_v50  ;;  %v776_v10 = vld [vmem:[%s8743_s22 + $0xe60] sm:$0xff] }
 0x273   : > { %v8108_v12 = vpack.c.bf16 %v925_v0, %v766_v63  ;;  %v777_v63 = vld [vmem:[%s8743_s22 + $0xe68] sm:$0xff]  ;;  %v936_v0 = vld [vmem:[%s8743_s22 + $0x1360] sm:$0xff] }
 0x275   : > { %8077 = vmatpush1.bf16.xpose.msra.mxu0 %v8076_v3  ;;  %v927_v3 = vld [vmem:[%s8743_s22 + $0x1318] sm:$0xff] }
 0x276   : > { %8085 = vmatpush1.bf16.xpose.msra.mxu1 %v8084_v6  ;;  %8087 = vmatprep.subr.bf16.mxu0 %v8086_v7  ;;  %v8116_v15 = vpack.c.bf16 %v927_v3, %v768_v1  ;;  %v1601_v1 = vrot.slane %v1587_v55, %v8770_v28  ;;  %v467_v55 = vld [vmem:[%s8743_s22 + $0x4b8] sm:$0xff] }
 0x277   : > { %8095 = vmatprep.subr.bf16.mxu1 %v8094_v8 }
 0x27c   : > { %6235 = vmatmul.mubr.f32.vlgmr.msra.gmra.mrb[62].mxu0 %v1526_v44  ;;  %v8102_v44 = vpack.c.bf16 %v608_v33, %v449_v32  ;;  %v8130_v33 = vpack.c.bf16 %v932_v27, %v773_v26 }
 0x27d   : > { %8089 = vmatpush1.bf16.xpose.msra.mxu0 %v8088_v20  ;;  %6305 = vmatmul.mubr.f32.vlgmr.msra.gmra.mrb[62].mxu1 %v1533_v47  ;;  %v448_v47 = vld [vmem:[%s8743_s22 + $0x420] sm:$0xff]  ;;  %v611_v20 = vld [vmem:[%s8743_s22 + $0x938] sm:$0xff] }
 0x27e   : > { %8097 = vmatpush1.bf16.xpose.msra.mxu1 %v8096_v21  ;;  %8091 = vmatprep.subr.bf16.mxu0 %v8090_v22  ;;  %v8104_v57 = vpack.c.bf16 %v607_v48, %v448_v47  ;;  %v454_v21 = vld [vmem:[%s8743_s22 + $0x450] sm:$0xff]  ;;  %v613_v22 = vld [vmem:[%s8743_s22 + $0x948] sm:$0xff] }
 0x27f   : > { %v4416_v30 = vpop.f32.mrb[36].mxu0  ;;  %8099 = vmatprep.subr.bf16.mxu1 %v8098_v23  ;;  %6374 = vmatprep.mubr.f32.mxu0 %v1551_v24  ;;  %v771_v23 = vld [vmem:[%s8743_s22 + $0xe38] sm:$0xff]  ;;  %v930_v24 = vld [vmem:[%s8743_s22 + $0x1330] sm:$0xff]  ;;  %v8128_v31 = vpack.c.bf16 %v613_v22, %v454_v21  ;;  %v312_v22 = vld [vmem:[%s8736_s12 + $0x120] sm:$0xff] }
 0x280   : > { %v4417_v34 = vadd.f32 %v4416_v30, %v4347_v5  ;;  %v4418_v35 = vpop.f32.mrb[37].mxu0  ;;  %v4486_v36 = vpop.f32.mrb[36].mxu1  ;;  %6444 = vmatprep.mubr.f32.mxu1 %v1552_v25  ;;  %v612_v5 = vld [vmem:[%s8743_s22 + $0x940] sm:$0xff]  ;;  %v1577_v25 = vrot.slane %v310_v13, %v8770_v28  ;;  %v8122_v32 = vpack.c.bf16 %v930_v24, %v771_v23  ;;  %v618_v47 = vld [vmem:[%s8743_s22 + $0x970] sm:$0xff]  ;;  %v461_v13 = vld [vmem:[%s8743_s22 + $0x488] sm:$0xff]  ;;  %v1604_v27 = vcombine.high %v312_v22, %v312_v22 }
 0x281   : > { %v4488_v39 = vpop.f32.mrb[37].mxu1  ;;  %v1586_v35 = vcombine.high %v1584_v29, %v1584_v29  ;;  %v8142_v54 = vpack.c.bf16 %v618_v47, %v459_v46  ;;  %v937_v46 = vld [vmem:[%s8743_s22 + $0x1368] sm:$0xff]  ;;  %v780_v47 = vld [vmem:[%s8743_s22 + $0xe80] sm:$0xff] }
 0x282   : > { %v4487_v42 = vadd.f32 %v4486_v36, %v4417_v34  ;;  %v1585_v34 = vcombine.high %v1577_v25, %v1577_v25  ;;  %v770_v36 = vld [vmem:[%s8743_s22 + $0xe30] sm:$0xff] }
 0x283   : > { %v8124_v49 = vpack.c.bf16 %v929_v37, %v770_v36  ;;  %v781_v36 = vld [vmem:[%s8743_s22 + $0xe88] sm:$0xff]  ;;  %v940_v37 = vld [vmem:[%s8743_s22 + $0x1380] sm:$0xff] }
 0x285   : > { %8093 = vmatpush1.bf16.xpose.msra.mxu0 %v8092_v40  ;;  %v931_v40 = vld [vmem:[%s8743_s22 + $0x1338] sm:$0xff] }
 0x286   : > { %8101 = vmatpush1.bf16.xpose.msra.mxu1 %v8100_v43  ;;  %8103 = vmatprep.subr.bf16.mxu0 %v8102_v44  ;;  %v8132_v52 = vpack.c.bf16 %v931_v40, %v772_v38  ;;  %v1618_v38 = vrot.slane %v1604_v27, %v8770_v28  ;;  %v471_v27 = vld [vmem:[%s8743_s22 + $0x4d8] sm:$0xff] }
 0x287   : > { %8111 = vmatprep.subr.bf16.mxu1 %v8110_v45 }
 0x28c   : > { %6375 = vmatmul.mubr.f32.vlgmr.msra.gmra.mrb[64].mxu0 %v1543_v16  ;;  %v8118_v16 = vpack.c.bf16 %v612_v5, %v453_v4  ;;  %v8146_v5 = vpack.c.bf16 %v936_v0, %v777_v63 }
 0x28d   : > { %8105 = vmatpush1.bf16.xpose.msra.mxu0 %v8104_v57  ;;  %6445 = vmatmul.mubr.f32.vlgmr.msra.gmra.mrb[64].mxu1 %v1550_v19  ;;  %v452_v19 = vld [vmem:[%s8743_s22 + $0x440] sm:$0xff]  ;;  %v615_v57 = vld [vmem:[%s8743_s22 + $0x958] sm:$0xff] }
 0x28e   : > { %8113 = vmatpush1.bf16.xpose.msra.mxu1 %v8112_v58  ;;  %8107 = vmatprep.subr.bf16.mxu0 %v8106_v59  ;;  %v8120_v30 = vpack.c.bf16 %v611_v20, %v452_v19  ;;  %v458_v58 = vld [vmem:[%s8743_s22 + $0x470] sm:$0xff]  ;;  %v617_v59 = vld [vmem:[%s8743_s22 + $0x968] sm:$0xff] }
 0x28f   : > { %v4556_v2 = vpop.f32.mrb[38].mxu0  ;;  %8115 = vmatprep.subr.bf16.mxu1 %v8114_v60  ;;  %6514 = vmatprep.mubr.f32.mxu0 %v1568_v61  ;;  %v775_v60 = vld [vmem:[%s8743_s22 + $0xe58] sm:$0xff]  ;;  %v934_v61 = vld [vmem:[%s8743_s22 + $0x1350] sm:$0xff]  ;;  %v8144_v3 = vpack.c.bf16 %v617_v59, %v458_v58 }
 0x290   : > { %v4557_v6 = vadd.f32 %v4556_v2, %v4487_v42  ;;  %v4558_v7 = vpop.f32.mrb[39].mxu0  ;;  %v4626_v8 = vpop.f32.mrb[38].mxu1  ;;  %6584 = vmatprep.mubr.f32.mxu1 %v1569_v62  ;;  %v616_v42 = vld [vmem:[%s8743_s22 + $0x960] sm:$0xff]  ;;  %v1594_v62 = vrot.slane %v311_v50, %v8770_v28  ;;  %v8138_v4 = vpack.c.bf16 %v934_v61, %v775_v60  ;;  %v622_v19 = vld [vmem:[%s8743_s22 + $0x990] sm:$0xff]  ;;  %v465_v50 = vld [vmem:[%s8743_s22 + $0x4a8] sm:$0xff] }
 0x291   : > { %v4628_v11 = vpop.f32.mrb[39].mxu1  ;;  %v1603_v7 = vcombine.high %v1601_v1, %v1601_v1  ;;  %v8158_v26 = vpack.c.bf16 %v622_v19, %v463_v18  ;;  %v313_v59 = vld [vmem:[%s8736_s12 + $0x128] sm:$0xff]  ;;  %v784_v19 = vld [vmem:[%s8743_s22 + $0xea0] sm:$0xff] }
 0x292   : > { %v4627_v14 = vadd.f32 %v4626_v8, %v4557_v6  ;;  %v1602_v6 = vcombine.high %v1594_v62, %v1594_v62  ;;  %v774_v8 = vld [vmem:[%s8743_s22 + $0xe50] sm:$0xff]  ;;  %v1621_v0 = vcombine.high %v313_v59, %v313_v59  ;;  %v941_v18 = vld [vmem:[%s8743_s22 + $0x1388] sm:$0xff] }
 0x293   : > { %v8140_v21 = vpack.c.bf16 %v933_v9, %v774_v8  ;;  %v785_v8 = vld [vmem:[%s8743_s22 + $0xea8] sm:$0xff]  ;;  %v944_v9 = vld [vmem:[%s8743_s22 + $0x13a0] sm:$0xff] }
 0x295   : > { %8109 = vmatpush1.bf16.xpose.msra.mxu0 %v8108_v12  ;;  %v935_v12 = vld [vmem:[%s8743_s22 + $0x1358] sm:$0xff] }
 0x296   : > { %8117 = vmatpush1.bf16.xpose.msra.mxu1 %v8116_v15  ;;  %8119 = vmatprep.subr.bf16.mxu0 %v8118_v16  ;;  %v8148_v24 = vpack.c.bf16 %v935_v12, %v776_v10  ;;  %v1635_v10 = vrot.slane %v1621_v0, %v8770_v28 }
 0x297   : > { %8127 = vmatprep.subr.bf16.mxu1 %v8126_v17 }
 0x29c   : > { %6515 = vmatmul.mubr.f32.vlgmr.msra.gmra.mrb[66].mxu0 %v1560_v53  ;;  %v8134_v53 = vpack.c.bf16 %v616_v42, %v457_v41  ;;  %v8162_v42 = vpack.c.bf16 %v940_v37, %v781_v36 }
 0x29d   : > { %8121 = vmatpush1.bf16.xpose.msra.mxu0 %v8120_v30  ;;  %6585 = vmatmul.mubr.f32.vlgmr.msra.gmra.mrb[66].mxu1 %v1567_v56  ;;  %v456_v56 = vld [vmem:[%s8743_s22 + $0x460] sm:$0xff]  ;;  %v619_v30 = vld [vmem:[%s8743_s22 + $0x978] sm:$0xff] }
 0x29e   : > { %8129 = vmatpush1.bf16.xpose.msra.mxu1 %v8128_v31  ;;  %8123 = vmatprep.subr.bf16.mxu0 %v8122_v32  ;;  %v8136_v2 = vpack.c.bf16 %v615_v57, %v456_v56  ;;  %v462_v31 = vld [vmem:[%s8743_s22 + $0x490] sm:$0xff]  ;;  %v621_v32 = vld [vmem:[%s8743_s22 + $0x988] sm:$0xff] }
 0x29f   : > { %v4696_v39 = vpop.f32.mrb[40].mxu0  ;;  %8131 = vmatprep.subr.bf16.mxu1 %v8130_v33  ;;  %6654 = vmatprep.mubr.f32.mxu0 %v1585_v34  ;;  %v779_v33 = vld [vmem:[%s8743_s22 + $0xe78] sm:$0xff]  ;;  %v938_v34 = vld [vmem:[%s8743_s22 + $0x1370] sm:$0xff]  ;;  %v8160_v40 = vpack.c.bf16 %v621_v32, %v462_v31 }
 0x2a0   : > { %v4697_v43 = vadd.f32 %v4696_v39, %v4627_v14  ;;  %v4698_v44 = vpop.f32.mrb[41].mxu0  ;;  %v4766_v45 = vpop.f32.mrb[40].mxu1  ;;  %6724 = vmatprep.mubr.f32.mxu1 %v1586_v35  ;;  %v620_v14 = vld [vmem:[%s8743_s22 + $0x980] sm:$0xff]  ;;  %v1611_v35 = vrot.slane %v312_v22, %v8770_v28  ;;  %v8154_v41 = vpack.c.bf16 %v938_v34, %v779_v33  ;;  %v626_v56 = vld [vmem:[%s8743_s22 + $0x9b0] sm:$0xff]  ;;  %v469_v22 = vld [vmem:[%s8743_s22 + $0x4c8] sm:$0xff] }
 0x2a1   : > { %v4768_v48 = vpop.f32.mrb[41].mxu1  ;;  %v1620_v44 = vcombine.high %v1618_v38, %v1618_v38  ;;  %v8174_v63 = vpack.c.bf16 %v626_v56, %v467_v55  ;;  %v314_v32 = vld [vmem:[%s8736_s12 + $0x130] sm:$0xff]  ;;  %v945_v55 = vld [vmem:[%s8743_s22 + $0x13a8] sm:$0xff]  ;;  %v788_v56 = vld [vmem:[%s8743_s22 + $0xec0] sm:$0xff] }
 0x2a2   : > { %v4767_v51 = vadd.f32 %v4766_v45, %v4697_v43  ;;  %v1619_v43 = vcombine.high %v1611_v35, %v1611_v35  ;;  %v778_v45 = vld [vmem:[%s8743_s22 + $0xe70] sm:$0xff]  ;;  %v1638_v37 = vcombine.high %v314_v32, %v314_v32 }
 0x2a3   : > { %v8156_v58 = vpack.c.bf16 %v937_v46, %v778_v45  ;;  %v789_v45 = vld [vmem:[%s8743_s22 + $0xec8] sm:$0xff]  ;;  %v948_v46 = vld [vmem:[%s8743_s22 + $0x13c0] sm:$0xff] }
 0x2a5   : > { %8125 = vmatpush1.bf16.xpose.msra.mxu0 %v8124_v49  ;;  %v939_v49 = vld [vmem:[%s8743_s22 + $0x1378] sm:$0xff] }
 0x2a6   : > { %8133 = vmatpush1.bf16.xpose.msra.mxu1 %v8132_v52  ;;  %8135 = vmatprep.subr.bf16.mxu0 %v8134_v53  ;;  %v8164_v61 = vpack.c.bf16 %v939_v49, %v780_v47  ;;  %v1652_v47 = vrot.slane %v1638_v37, %v8770_v28 }
 0x2a7   : > { %8143 = vmatprep.subr.bf16.mxu1 %v8142_v54 }
 0x2ac   : > { %6655 = vmatmul.mubr.f32.vlgmr.msra.gmra.mrb[68].mxu0 %v1577_v25  ;;  %v8150_v25 = vpack.c.bf16 %v620_v14, %v461_v13  ;;  %v8178_v14 = vpack.c.bf16 %v944_v9, %v785_v8  ;;  %v474_v8 = vld [vmem:[%s8743_s22 + $0x4f0] sm:$0xff]  ;;  %v8526_v9 = vmov 0.0|0.0  }
 0x2ad   : > { %8137 = vmatpush1.bf16.xpose.msra.mxu0 %v8136_v2  ;;  %6725 = vmatmul.mubr.f32.vlgmr.msra.gmra.mrb[68].mxu1 %v1584_v29  ;;  %v460_v29 = vld [vmem:[%s8743_s22 + $0x480] sm:$0xff]  ;;  %v623_v2 = vld [vmem:[%s8743_s22 + $0x998] sm:$0xff] }
 0x2ae   : > { %8145 = vmatpush1.bf16.xpose.msra.mxu1 %v8144_v3  ;;  %8139 = vmatprep.subr.bf16.mxu0 %v8138_v4  ;;  %v8152_v39 = vpack.c.bf16 %v619_v30, %v460_v29  ;;  %v466_v3 = vld [vmem:[%s8743_s22 + $0x4b0] sm:$0xff]  ;;  %v625_v4 = vld [vmem:[%s8743_s22 + $0x9a8] sm:$0xff] }
 0x2af   : > { %v4836_v11 = vpop.f32.mrb[42].mxu0  ;;  %8147 = vmatprep.subr.bf16.mxu1 %v8146_v5  ;;  %6794 = vmatprep.mubr.f32.mxu0 %v1602_v6  ;;  %v783_v5 = vld [vmem:[%s8743_s22 + $0xe98] sm:$0xff]  ;;  %v942_v6 = vld [vmem:[%s8743_s22 + $0x1390] sm:$0xff]  ;;  %v8176_v12 = vpack.c.bf16 %v625_v4, %v466_v3 }
 0x2b0   : > { %v4837_v15 = vadd.f32 %v4836_v11, %v4767_v51  ;;  %v4838_v16 = vpop.f32.mrb[43].mxu0  ;;  %v4906_v17 = vpop.f32.mrb[42].mxu1  ;;  %6864 = vmatprep.mubr.f32.mxu1 %v1603_v7  ;;  %v624_v51 = vld [vmem:[%s8743_s22 + $0x9a0] sm:$0xff]  ;;  %v1628_v7 = vrot.slane %v313_v59, %v8770_v28  ;;  %v8170_v13 = vpack.c.bf16 %v942_v6, %v783_v5  ;;  %v630_v29 = vld [vmem:[%s8743_s22 + $0x9d0] sm:$0xff]  ;;  %v473_v59 = vld [vmem:[%s8743_s22 + $0x4e8] sm:$0xff] }
 0x2b1   : > { %v4908_v20 = vpop.f32.mrb[43].mxu1  ;;  %v1637_v16 = vcombine.high %v1635_v10, %v1635_v10  ;;  %v8190_v36 = vpack.c.bf16 %v630_v29, %v471_v27  ;;  %v315_v5 = vld [vmem:[%s8736_s12 + $0x138] sm:$0x3f] }
 0x2b2   : > { %v4907_v23 = vadd.f32 %v4906_v17, %v4837_v15  ;;  %v1636_v15 = vcombine.high %v1628_v7, %v1628_v7  ;;  %v782_v17 = vld [vmem:[%s8743_s22 + $0xe90] sm:$0xff]  ;;  %v472_v6 = vld [vmem:[%s8743_s22 + $0x4e0] sm:$0xff] }
 0x2b3   : > { %v8172_v31 = vpack.c.bf16 %v941_v18, %v782_v17  ;;  %v790_v18 = vld [vmem:[%s8743_s22 + $0xed0] sm:$0xff] }
 0x2b5   : > { %8141 = vmatpush1.bf16.xpose.msra.mxu0 %v8140_v21  ;;  %v943_v21 = vld [vmem:[%s8743_s22 + $0x1398] sm:$0xff] }
 0x2b6   : > { %8149 = vmatpush1.bf16.xpose.msra.mxu1 %v8148_v24  ;;  %8151 = vmatprep.subr.bf16.mxu0 %v8150_v25  ;;  %v8180_v34 = vpack.c.bf16 %v943_v21, %v784_v19  ;;  %v949_v19 = vld [vmem:[%s8743_s22 + $0x13c8] sm:$0xff]  ;;  %v792_v21 = vld [vmem:[%s8743_s22 + $0xee0] sm:$0xff] }
 0x2b7   : > { %8159 = vmatprep.subr.bf16.mxu1 %v8158_v26  ;;  %v8204_v29 = vpack.c.bf16 %v949_v19, %v790_v18 }
 0x2bc   : > { %6795 = vmatmul.mubr.f32.vlgmr.msra.gmra.mrb[70].mxu0 %v1594_v62  ;;  %v8166_v62 = vpack.c.bf16 %v624_v51, %v465_v50  ;;  %v8194_v51 = vpack.c.bf16 %v948_v46, %v789_v45 }
 0x2bd   : > { %8153 = vmatpush1.bf16.xpose.msra.mxu0 %v8152_v39  ;;  %6865 = vmatmul.mubr.f32.vlgmr.msra.gmra.mrb[70].mxu1 %v1601_v1  ;;  %v464_v1 = vld [vmem:[%s8743_s22 + $0x4a0] sm:$0xff]  ;;  %v627_v39 = vld [vmem:[%s8743_s22 + $0x9b8] sm:$0xff] }
 0x2be   : > { %8161 = vmatpush1.bf16.xpose.msra.mxu1 %v8160_v40  ;;  %8155 = vmatprep.subr.bf16.mxu0 %v8154_v41  ;;  %v8168_v11 = vpack.c.bf16 %v623_v2, %v464_v1  ;;  %v470_v40 = vld [vmem:[%s8743_s22 + $0x4d0] sm:$0xff]  ;;  %v629_v41 = vld [vmem:[%s8743_s22 + $0x9c8] sm:$0xff] }
 0x2bf   : > { %v4976_v48 = vpop.f32.mrb[44].mxu0  ;;  %8163 = vmatprep.subr.bf16.mxu1 %v8162_v42  ;;  %6934 = vmatprep.mubr.f32.mxu0 %v1619_v43  ;;  %v787_v42 = vld [vmem:[%s8743_s22 + $0xeb8] sm:$0xff]  ;;  %v946_v43 = vld [vmem:[%s8743_s22 + $0x13b0] sm:$0xff]  ;;  %v8192_v49 = vpack.c.bf16 %v629_v41, %v470_v40 }
 0x2c0   : > { %v4977_v52 = vadd.f32 %v4976_v48, %v4907_v23  ;;  %v4978_v53 = vpop.f32.mrb[45].mxu0  ;;  %v5046_v54 = vpop.f32.mrb[44].mxu1  ;;  %7004 = vmatprep.mubr.f32.mxu1 %v1620_v44  ;;  %v628_v23 = vld [vmem:[%s8743_s22 + $0x9c0] sm:$0xff]  ;;  %v1645_v44 = vrot.slane %v314_v32, %v8770_v28  ;;  %v8186_v50 = vpack.c.bf16 %v946_v43, %v787_v42  ;;  %v1655_v32 = vcombine.high %v315_v5, %v315_v5 }
 0x2c1   : > { %v5048_v57 = vpop.f32.mrb[45].mxu1  ;;  %v1654_v53 = vcombine.high %v1652_v47, %v1652_v47 }
 0x2c2   : > { %v5047_v60 = vadd.f32 %v5046_v54, %v4977_v52  ;;  %v1653_v52 = vcombine.high %v1645_v44, %v1645_v44  ;;  %v786_v54 = vld [vmem:[%s8743_s22 + $0xeb0] sm:$0xff] }
 0x2c3   : > { %v8188_v1 = vpack.c.bf16 %v945_v55, %v786_v54 }
 0x2c5   : > { %8157 = vmatpush1.bf16.xpose.msra.mxu0 %v8156_v58  ;;  %v947_v58 = vld [vmem:[%s8743_s22 + $0x13b8] sm:$0xff] }
 0x2c6   : > { %8165 = vmatpush1.bf16.xpose.msra.mxu1 %v8164_v61  ;;  %8167 = vmatprep.subr.bf16.mxu0 %v8166_v62  ;;  %v8196_v3 = vpack.c.bf16 %v947_v58, %v788_v56 }
 0x2c7   : > { %8175 = vmatprep.subr.bf16.mxu1 %v8174_v63 }
 0x2cc   : > { %6935 = vmatmul.mubr.f32.vlgmr.msra.gmra.mrb[72].mxu0 %v1611_v35  ;;  %v8182_v35 = vpack.c.bf16 %v628_v23, %v469_v22  ;;  %v951_v22 = vld [vmem:[%s8743_s22 + $0x13d8] sm:$0xff] }
 0x2cd   : > { %8169 = vmatpush1.bf16.xpose.msra.mxu0 %v8168_v11  ;;  %7005 = vmatmul.mubr.f32.vlgmr.msra.gmra.mrb[72].mxu1 %v1618_v38  ;;  %v468_v38 = vld [vmem:[%s8743_s22 + $0x4c0] sm:$0xff]  ;;  %v791_v11 = vld [vmem:[%s8743_s22 + $0xed8] sm:$0xff] }
 0x2ce   : > { %8177 = vmatpush1.bf16.xpose.msra.mxu1 %v8176_v12  ;;  %8171 = vmatprep.subr.bf16.mxu0 %v8170_v13  ;;  %v8184_v48 = vpack.c.bf16 %v627_v39, %v468_v38  ;;  %v950_v12 = vld [vmem:[%s8743_s22 + $0x13d0] sm:$0xff]  ;;  %v1662_v13 = vrot.slane %v315_v5, %v8770_v28 }
 0x2cf   : > { %v5116_v20 = vpop.f32.mrb[46].mxu0  ;;  %8179 = vmatprep.subr.bf16.mxu1 %v8178_v14  ;;  %7074 = vmatprep.mubr.f32.mxu0 %v1636_v15 }
 0x2d0   : > { %v5117_v24 = vadd.f32 %v5116_v20, %v5047_v60  ;;  %v5118_v25 = vpop.f32.mrb[47].mxu0  ;;  %v5186_v26 = vpop.f32.mrb[46].mxu1  ;;  %7144 = vmatprep.mubr.f32.mxu1 %v1637_v16  ;;  %v632_v60 = vld [vmem:[%s8743_s22 + $0x9e0] sm:$0xff]  ;;  %v8202_v16 = vpack.c.bf16 %v950_v12, %v791_v11  ;;  %v1670_v17 = vcombine.high %v1662_v13, %v1662_v13 }
 0x2d1   : > { %v5188_v30 = vpop.f32.mrb[47].mxu1  ;;  %v8198_v4 = vpack.c.bf16 %v632_v60, %v473_v59 }
 0x2d2   : > { %v5187_v33 = vadd.f32 %v5186_v26, %v5117_v24  ;;  %v8528_v26 = vmov 0.0  }
 0x2d5   : > { %8173 = vmatpush1.bf16.xpose.msra.mxu0 %v8172_v31  ;;  %v8210_v31 = vpack.c.bf16 %v951_v22, %v792_v21 }
 0x2d6   : > { %8181 = vmatpush1.bf16.xpose.msra.mxu1 %v8180_v34  ;;  %8183 = vmatprep.subr.bf16.mxu0 %v8182_v35 }
 0x2d7   : > { %8191 = vmatprep.subr.bf16.mxu1 %v8190_v36 }
 0x2dc   : > { %7075 = vmatmul.mubr.f32.vlgmr.msra.gmra.mrb[74].mxu0 %v1628_v7  ;;  %v631_v7 = vld [vmem:[%s8743_s22 + $0x9d8] sm:$0xff] }
 0x2dd   : > { %8185 = vmatpush1.bf16.xpose.msra.mxu0 %v8184_v48  ;;  %7145 = vmatmul.mubr.f32.vlgmr.msra.gmra.mrb[74].mxu1 %v1635_v10  ;;  %v633_v10 = vld [vmem:[%s8743_s22 + $0x9e8] sm:$0xff]  ;;  %v8200_v14 = vpack.c.bf16 %v631_v7, %v472_v6 }
 0x2de   : > { %8193 = vmatpush1.bf16.xpose.msra.mxu1 %v8192_v49  ;;  %8187 = vmatprep.subr.bf16.mxu0 %v8186_v50  ;;  %v8207_v15 = vpack.c.bf16 %v633_v10, %v474_v8 }
 0x2df   : > { %v5256_v57 = vpop.f32.mrb[48].mxu0  ;;  %8195 = vmatprep.subr.bf16.mxu1 %v8194_v51  ;;  %7214 = vmatprep.mubr.f32.mxu0 %v1653_v52 }
 0x2e0   : > { %v5257_v61 = vadd.f32 %v5256_v57, %v5187_v33  ;;  %v5258_v62 = vpop.f32.mrb[49].mxu0  ;;  %v5326_v63 = vpop.f32.mrb[48].mxu1  ;;  %7284 = vmatprep.mubr.f32.mxu1 %v1654_v53  ;;  %v1669_v33 = vrot.slane %v1655_v32, %v8770_v28 }
 0x2e1   : > { %v5328_v0 = vpop.f32.mrb[49].mxu1 }
 0x2e2   : > { %v5327_v2 = vadd.f32 %v5326_v63, %v5257_v61 }
 0x2e5   : > { %8189 = vmatpush1.bf16.xpose.msra.mxu0 %v8188_v1 }
 0x2e6   : > { %8197 = vmatpush1.bf16.xpose.msra.mxu1 %v8196_v3  ;;  %8199 = vmatprep.subr.bf16.mxu0 %v8198_v4 }
 0x2e7   : > { %8206 = vmatprep.subr.bf16.mxu1 %v8526_v9 }
 0x2ec   : > { %7215 = vmatmul.mubr.f32.vlgmr.msra.gmra.mrb[76].mxu0 %v1645_v44 }
 0x2ed   : > { %8201 = vmatpush1.bf16.xpose.msra.mxu0 %v8200_v14  ;;  %7285 = vmatmul.mubr.f32.vlgmr.msra.gmra.mrb[76].mxu1 %v1652_v47 }
 0x2ee   : > { %8208 = vmatpush3.bf16.xpose.msra.mxu1 %v8207_v15  ;;  %8203 = vmatprep.subr.bf16.mxu0 %v8202_v16 }
 0x2ef   : > { %v5396_v20 = vpop.f32.mrb[50].mxu0  ;;  %8209 = vmatprep.subr.bf16.mxu1 %v8526_v9  ;;  %7354 = vmatprep.mubr.f32.mxu0 %v1670_v17 }
 0x2f0   : > { %v5397_v23 = vadd.f32 %v5396_v20, %v5327_v2  ;;  %v5398_v24 = vpop.f32.mrb[51].mxu0  ;;  %v5466_v25 = vpop.f32.mrb[50].mxu1  ;;  %7571 = vmatprep.mubr.msk.f32.mxu1 %vm8527_vm1, %v8528_v26 }
 0x2f1   : > { %v5468_v27 = vpop.f32.mrb[51].mxu1 }
 0x2f2   : > { %v5467_v30 = vadd.f32 %v5466_v25, %v5397_v23 }
 0x2f5   : > { %8205 = vmatpush1.bf16.xpose.msra.mxu0 %v8204_v29 }
 0x2f6   : > { %8211 = vmatpush3.bf16.xpose.msra.mxu1 %v8210_v31 }
 0x2fc   : > { %7355 = vmatmul.mubr.f32.vlgmr.msra.gmra.mrb[78].mxu0 %v1662_v13 }
 0x2fd   : > { %7572 = vmatmul.mubr.f32.vlgmr.msra.gmra.mrb[78].mxu1 %v1669_v33 }
 0x2ff   : > { %v5536_v34 = vpop.f32.mrb[52].mxu0 }
 0x300   : > { %v5537_v35 = vadd.f32 %v5536_v34, %v5467_v30  ;;  %v5538_v36 = vpop.f32.mrb[53].mxu0  ;;  %v5606_v37 = vpop.f32.mrb[52].mxu1 }
 0x301   : > { %v5608_v38 = vpop.f32.mrb[53].mxu1 }
 0x302   : > { %v5607_v39 = vadd.f32 %v5606_v37, %v5537_v35 }
 0x30f   : > { %v5676_v40 = vpop.f32.mrb[54].mxu0 }
 0x310   : > { %v5677_v41 = vadd.f32 %v5676_v40, %v5607_v39  ;;  %v5678_v42 = vpop.f32.mrb[55].mxu0  ;;  %v5746_v43 = vpop.f32.mrb[54].mxu1 }
 0x311   : > { %v5748_v44 = vpop.f32.mrb[55].mxu1 }
 0x312   : > { %v5747_v45 = vadd.f32 %v5746_v43, %v5677_v41 }
 0x31f   : > { %v5816_v46 = vpop.f32.mrb[56].mxu0 }
 0x320   : > { %v5817_v47 = vadd.f32 %v5816_v46, %v5747_v45  ;;  %v5818_v48 = vpop.f32.mrb[57].mxu0  ;;  %v5886_v49 = vpop.f32.mrb[56].mxu1 }
 0x321   : > { %v5888_v50 = vpop.f32.mrb[57].mxu1 }
 0x322   : > { %v5887_v28 = vadd.f32 %v5886_v49, %v5817_v47 }
 0x32f   : > { %v5956_v51 = vpop.f32.mrb[58].mxu0 }
 0x330   : > { %v5957_v52 = vadd.f32 %v5956_v51, %v5887_v28  ;;  %v5958_v53 = vpop.f32.mrb[59].mxu0  ;;  %v6026_v54 = vpop.f32.mrb[58].mxu1  ;;  %v275_v51 = vld [vmem:[#allocation2] sm:$0x3] }
 0x331   : > { %v6028_v55 = vpop.f32.mrb[59].mxu1 }
 0x332   : > { %v6027_v56 = vadd.f32 %v6026_v54, %v5957_v52 }
 0x33f   : > { %v6096_v57 = vpop.f32.mrb[60].mxu0 }
 0x340   : > { %v6097_v58 = vadd.f32 %v6096_v57, %v6027_v56  ;;  %v6098_v59 = vpop.f32.mrb[61].mxu0  ;;  %v6166_v60 = vpop.f32.mrb[60].mxu1 }
 0x341   : > { %v6168_v61 = vpop.f32.mrb[61].mxu1 }
 0x342   : > { %v6167_v62 = vadd.f32 %v6166_v60, %v6097_v58 }
 0x34f   : > { %v6236_v63 = vpop.f32.mrb[62].mxu0 }
 0x350   : > { %v6237_v0 = vadd.f32 %v6236_v63, %v6167_v62  ;;  %v6238_v1 = vpop.f32.mrb[63].mxu0  ;;  %v6306_v2 = vpop.f32.mrb[62].mxu1 }
 0x351   : > { %v6308_v3 = vpop.f32.mrb[63].mxu1 }
 0x352   : > { %v6307_v4 = vadd.f32 %v6306_v2, %v6237_v0 }
 0x35f   : > { %v6376_v5 = vpop.f32.mrb[64].mxu0 }
 0x360   : > { %v6377_v6 = vadd.f32 %v6376_v5, %v6307_v4  ;;  %v6378_v7 = vpop.f32.mrb[65].mxu0  ;;  %v6446_v8 = vpop.f32.mrb[64].mxu1 }
 0x361   : > { %v6448_v9 = vpop.f32.mrb[65].mxu1 }
 0x362   : > { %v6447_v10 = vadd.f32 %v6446_v8, %v6377_v6 }
 0x36f   : > { %v6516_v11 = vpop.f32.mrb[66].mxu0 }
 0x370   : > { %v6517_v12 = vadd.f32 %v6516_v11, %v6447_v10  ;;  %v6518_v13 = vpop.f32.mrb[67].mxu0  ;;  %v6586_v14 = vpop.f32.mrb[66].mxu1 }
 0x371   : > { %v6588_v15 = vpop.f32.mrb[67].mxu1 }
 0x372   : > { %v6587_v16 = vadd.f32 %v6586_v14, %v6517_v12 }
 0x37f   : > { %v6656_v17 = vpop.f32.mrb[68].mxu0 }
 0x380   : > { %v6657_v18 = vadd.f32 %v6656_v17, %v6587_v16  ;;  %v6658_v19 = vpop.f32.mrb[69].mxu0  ;;  %v6726_v20 = vpop.f32.mrb[68].mxu1 }
 0x381   : > { %v6728_v21 = vpop.f32.mrb[69].mxu1 }
 0x382   : > { %v6727_v22 = vadd.f32 %v6726_v20, %v6657_v18 }
 0x38f   : > { %v6796_v23 = vpop.f32.mrb[70].mxu0 }
 0x390   : > { %v6797_v24 = vadd.f32 %v6796_v23, %v6727_v22  ;;  %v6798_v25 = vpop.f32.mrb[71].mxu0  ;;  %v6866_v26 = vpop.f32.mrb[70].mxu1 }
 0x391   : > { %v6868_v27 = vpop.f32.mrb[71].mxu1 }
 0x392   : > { %v6867_v29 = vadd.f32 %v6866_v26, %v6797_v24 }
 0x39f   : > { %v6936_v30 = vpop.f32.mrb[72].mxu0 }
 0x3a0   : > { %v6937_v31 = vadd.f32 %v6936_v30, %v6867_v29  ;;  %v6938_v32 = vpop.f32.mrb[73].mxu0  ;;  %v7006_v33 = vpop.f32.mrb[72].mxu1 }
 0x3a1   : > { %v7008_v34 = vpop.f32.mrb[73].mxu1 }
 0x3a2   : > { %v7007_v35 = vadd.f32 %v7006_v33, %v6937_v31 }
 0x3af   : > { %v7076_v36 = vpop.f32.mrb[74].mxu0 }
 0x3b0   : > { %v7077_v37 = vadd.f32 %v7076_v36, %v7007_v35  ;;  %v7078_v38 = vpop.f32.mrb[75].mxu0  ;;  %v7146_v39 = vpop.f32.mrb[74].mxu1 }
 0x3b1   : > { %v7148_v40 = vpop.f32.mrb[75].mxu1 }
 0x3b2   : > { %v7147_v41 = vadd.f32 %v7146_v39, %v7077_v37 }
 0x3bf   : > { %v7216_v42 = vpop.f32.mrb[76].mxu0 }
 0x3c0   : > { %v7217_v43 = vadd.f32 %v7216_v42, %v7147_v41  ;;  %v7218_v44 = vpop.f32.mrb[77].mxu0  ;;  %v7286_v45 = vpop.f32.mrb[76].mxu1 }
 0x3c1   : > { %v7288_v46 = vpop.f32.mrb[77].mxu1 }
 0x3c2   : > { %v7287_v47 = vadd.f32 %v7286_v45, %v7217_v43 }
 0x3cf   : > { %v7356_v48 = vpop.f32.mrb[78].mxu0 }
 0x3d0   : > { %v7357_v49 = vadd.f32 %v7356_v48, %v7287_v47  ;;  %v7358_v50 = vpop.f32.mrb[79].mxu0  ;;  %v7426_v28 = vpop.f32.mrb[78].mxu1  ;;  %7436 = sbr.rel (%p7551_p9) target bundleno = 991 (0x3df), region = 52 }
 0x3d1   : > { %v7573_v52 = vpop.f32.mrb[79].mxu1 }
 0x3d2   : > { %v7427_v53 = vadd.f32 %v7426_v28, %v7357_v49 }
 0x3d4   : > { %v7430_v54 = vadd.f32 %v7427_v53, %v275_v51 }
 0x3d6   : > { %7432 = vst.msk [vmem:[#allocation2] sm:$0x3] %vm7431_vm2, %v7430_v54 }
 0x3dd   : > { %v7437_v55 = vld [vmem:[#allocation2] sm:$0x3] }
 0x3de   : > { %7438 = vst.msk [vmem:[#allocation9] sm:$0x3] %vm7431_vm2, %v7437_v55 }
 0x3df PF: > { %p8242_p11 = scmp.eq.s32.totalorder %s8579_s18, 1  ;;  %s8529_s20 = smov [#allocation9]  }
 0x3e0   : > { %s7446_s21 = sshll.u32 %s8529_s20, 4  ;;  %s7447_s21 = int_to_ptr.vmem [resolvable:$true] %s7446_s21 }
 0x3e1   : > { %s8429_s28 = scalar_lea.vmem %s7447_s21, 32  ;;  %p8436_p1 = scmp.lt.s32.totalorder %s7447_s21, %s7447_s21 }
 0x3e2   : > { %p8430_p13 = scmp.ne.s32.totalorder %s7447_s21, %s8429_s28  ;;  %p8437_p0 = scmp.lt.s32.totalorder %s8429_s28, %s8429_s28 }
 0x3e4   : > { %p8431_p3 = pnand %p8430_p13, %p8242_p11  ;;  %p8438_p8 = por %p8437_p0, %p8436_p1 }
 0x3e6   : > { %p8432_p4 = pneg %p8431_p3 }
 0x3e8   : > { %p8439_p2 = pnand %p8438_p8, %p8432_p4 }
 0x3ea   : > { %8442 = shalt.err (!%p8439_p2)
}
 0x3eb   : > { %s8443_s7 = scalar_lea.hbm %s9557_s3, 32 }
 0x3ec   : > { %p8444_p12 = scmp.ne.s32.totalorder %s9557_s3, %s8443_s7  ;;  %p8449_p5 = scmp.lt.u32.totalorder %s8443_s7, %s9557_s3 }
 0x3ee   : > { %p8445_p7 = pnand %p8444_p12, %p8242_p11 }
 0x3f0   : > { %p8446_p10 = pneg %p8445_p7 }
 0x3f2   : > { %p8451_p6 = pnand %p8449_p5, %p8446_p10 }
 0x3f4   : > { %8454 = shalt.err (!%p8451_p6)
}
 0x3f5   : > { %8225 = dma.vmem_to_hbm [thread:$0]  (%p8242_p11), %s7447_s21, 32, %s9557_s3, [#allocation5]  }
 0x3f6   : > { %8492 = dma.done.wait (%p8242_p11), [#allocation5], 32  }
 0x3f7   : > { %8494 = vsyncadd (%p8242_p11), [#allocation5], 4294967264 }
 0x3f8 PF: > { %s20_s17 = sadd.s32 1, %s8517_s17   ;;  %s9574_s12 = smov %s8501_s13 }
 0x3f9   : > { %p17_p9 = scmp.ge.s32.totalorder %s20_s17, 4   ;;  %s9575_s13 = smov %s8505_s14 }
 0x3fa   : > { %s9576_s14 = smov %s8663_s26  ;;  %s9577_s15 = smov %s8513_s16 }
 0x3fb   : > { %s9578_s16 = smov %s9580_s25  ;;  %19 = sbr.rel (!%p17_p9) target bundleno = 7 (0x7), region = 94 }
 0x402   :  { %7459 = vsyncpa [#allocation4], 1 }
 0x403   :  { %7461 = vsyncpa [#allocation4 + $0x1], 1 }
 0x404   :  { %7462 = vsyncpa [#allocation7], 1 }
 0x405   :  { %7464 = vsyncpa [#allocation7 + $0x1], 1 }
 0x406   :  { %7465 = vsyncpa [#allocation5], 1 }
 0x407   :  { %7467 = vsyncpa [#allocation5 + $0x1], 1 }

</bundles_post_ra>
